<compile_context>
chip_gen: v6e
topology: v6e:2x2x1
jax: 0.10.0
libtpu: 0.0.40
codegen_flags: <defaults>
</compile_context>

<pallas_src>
import jax
import jax.numpy as jnp
from jax import lax
from jax.experimental import pallas as pl
from jax.experimental.pallas import tpu as pltpu


BT = 8                      # batch rows per grid tile (sublane-aligned)


def _round_up(x, m):
    return (x + m - 1) // m * m


# ----------------------------------------------------------------------------
# Fused Pallas kernel: BiLSTM stack + MLP head
# ----------------------------------------------------------------------------

def _make_fused_kernel(S, D, H_pad, n_layers):
    """Builds the fused kernel for static (S, D, H_pad, n_layers).

    Ref order: x, (W_l, U_l, b_l)*n_layers, w1, b1, w2, b2, w3, b3,
               out, xtm_scr, gx_scr, seq_scr, hfin_scr
      x:    (BT, S*D)      batch-major block of BERT hidden states (f32)
      W_l:  (Din_l, G)     bf16 fused input->gate weights, gate blocks ordered
                           [i, f, o, g], each block = [fwd H_pad | rev H_pad]
      U_l:  (2*H_pad, G)   bf16 block-diagonal recurrent weights
      b_l:  (1, G)         f32, b_ih + b_hh in the same column layout
    """
    D2 = 2 * H_pad          # width of [fwd | rev] hidden state == one gate block
    G = 4 * D2              # 4 gates (i, f, o, g)

    def kernel(*refs):
        x_ref = refs[0]
        layer_refs = refs[1:1 + 3 * n_layers]
        (w1_ref, b1_ref, w2_ref, b2_ref,
         w3_ref, b3_ref) = refs[1 + 3 * n_layers:7 + 3 * n_layers]
        out_ref = refs[7 + 3 * n_layers]
        xtm_scr, gx_scr, seq_scr, hfin_scr = refs[8 + 3 * n_layers:]

        # Reverse-direction lane mask (upper H_pad of every D2-wide gate block).
        lane = lax.broadcasted_iota(jnp.int32, (1, G), 1)
        rev_mask = (lane % D2) >= H_pad

        # Padded columns of seq_scr are read (as K rows against zero weights)
        # but never written; zero once so stale VMEM can't inject NaN.
        seq_scr[...] = jnp.zeros_like(seq_scr)

        # Layer-0 input relayout: batch-major (BT, S*D) block -> time-major
        # (S*BT, D) bf16 scratch.  Replaces the wrapper-side HBM transpose and
        # runs once per batch tile, off the recurrence critical path.
        for k in range(S):
            xtm_scr[k * BT:(k + 1) * BT, :] = (
                x_ref[:, k * D:(k + 1) * D].astype(jnp.bfloat16))

        for l in range(n_layers):
            w_ref = layer_refs[3 * l + 0]
            u_ref = layer_refs[3 * l + 1]
            b_ref = layer_refs[3 * l + 2]
            last_layer = (l == n_layers - 1)

            x_in = xtm_scr[...] if l == 0 else seq_scr[...]

            # Hoisted input projection: one bf16 MXU matmul (f32 accumulation)
            # for all timesteps and both directions; bias folded in.
            gx_scr[...] = (
                jnp.dot(x_in, w_ref[...], preferred_element_type=jnp.float32)
                + b_ref[...])

            # Recurrent state stays in vregs: h feeds the MXU -> bf16,
            # c accumulates -> f32.
            h = jnp.zeros((BT, D2), jnp.bfloat16)
            c = jnp.zeros((BT, D2), jnp.float32)

            # Fully unrolled time loop (S is small & static): step k advances
            # the forward direction at position k and the reverse direction at
            # position S-1-k.  All per-step loads/stores are (8, 128k)-aligned.
            # TODO(synk): for S >= ~32 use lax.fori_loop(unroll=4..8) with
            #   pl.ds(pl.multiple_of(k*BT, 8), BT) row offsets instead.
            for k in range(S):
                gf = gx_scr[k * BT:(k + 1) * BT, :]
                gr = gx_scr[(S - 1 - k) * BT:(S - k) * BT, :]
                g_in = jnp.where(rev_mask, gr, gf)
                gates = g_in + jnp.dot(h, u_ref[...],
                                       preferred_element_type=jnp.float32)
                # Gate blocks ordered [i, f, o, g]: one sigmoid over the three
                # sigmoid gates + one tanh (2 EUP calls per step).
                sig = jax.nn.sigmoid(gates[:, :3 * D2])
                i_g = sig[:, 0 * D2:1 * D2]
                f_g = sig[:, 1 * D2:2 * D2]
                o_g = sig[:, 2 * D2:3 * D2]
                g_g = jnp.tanh(gates[:, 3 * D2:])
                c = f_g * c + i_g * g_g
                h = (o_g * jnp.tanh(c)).astype(jnp.bfloat16)
                if not last_layer:
                    # Time-major sequence output feeds the next layer; the last
                    # layer's sequence output is unused by the head, skip it.
                    seq_scr[k * BT:(k + 1) * BT, 0:H_pad] = h[:, 0:H_pad]
                    seq_scr[(S - 1 - k) * BT:(S - k) * BT, H_pad:D2] = (
                        h[:, H_pad:D2])

            # Final hidden of both directions [h_fwd(T-1) | h_rev(0)], packed
            # contiguously so the head does a single matmul against w1.
            hfin_scr[:, l * D2:(l + 1) * D2] = h

        # MLP head: Linear -> Linear -> ELU -> Linear (widths lane-padded).
        h1 = (jnp.dot(hfin_scr[...], w1_ref[...],
                      preferred_element_type=jnp.float32) + b1_ref[...])
        h2 = (jnp.dot(h1.astype(jnp.bfloat16), w2_ref[...],
                      preferred_element_type=jnp.float32) + b2_ref[...])
        h2 = jnp.where(h2 > 0, h2, jnp.exp(jnp.minimum(h2, 0.0)) - 1.0)  # ELU
        out_ref[...] = (jnp.dot(h2.astype(jnp.bfloat16), w3_ref[...],
                                preferred_element_type=jnp.float32)
                        + b3_ref[...])

    return kernel


def sentiment_forward(fused, last_hidden_state):
    """BiLSTM stack + MLP head on BERT's last_hidden_state as one pallas_call."""
    B, S, D = last_hidden_state.shape
    H_pad = fused["H_pad"]
    n_layers = fused["n_layers"]
    n_classes = fused["n_classes"]
    D2 = 2 * H_pad
    G = 4 * D2
    C_pad = fused["out"]["w3"].shape[1]

    # No HBM transpose: (B, S, D) -> (B, S*D) is a free, layout-preserving
    # reshape; the time-major relayout happens inside the kernel in VMEM.
    x2 = last_hidden_state.astype(jnp.float32).reshape(B, S * D)
    Bp = _round_up(B, BT)
    if Bp != B:
        # Only needed when B % 8 != 0 (demo B=2); real serving batches are
        # multiples of the 8-row tile and skip this pad copy.
        x2 = jnp.pad(x2, ((0, Bp - B), (0, 0)))

    args = [x2]
    for l in range(n_layers):
        args += [fused["W"][l], fused["U"][l], fused["b"][l]]
    o = fused["out"]
    args += [o["w1"], o["b1"], o["w2"], o["b2"], o["w3"], o["b3"]]

    in_specs = [pl.BlockSpec((BT, S * D), lambda i: (i, 0))]
    in_specs += [pl.BlockSpec(a.shape, lambda i: (0, 0)) for a in args[1:]]

    kernel = _make_fused_kernel(S, D, H_pad, n_layers)
    out = pl.pallas_call(
        kernel,
        out_shape=jax.ShapeDtypeStruct((Bp, C_pad), jnp.float32),
        grid=(Bp // BT,),
        in_specs=in_specs,
        out_specs=pl.BlockSpec((BT, C_pad), lambda i: (i, 0)),
        scratch_shapes=[
            pltpu.VMEM((S * BT, D), jnp.bfloat16),          # time-major x tile
            pltpu.VMEM((S * BT, G), jnp.float32),           # hoisted gate proj
            pltpu.VMEM((S * BT, D2), jnp.bfloat16),         # per-layer seq out
            pltpu.VMEM((BT, n_layers * D2), jnp.bfloat16),  # packed final h
        ],
        compiler_params=pltpu.CompilerParams(
            dimension_semantics=("parallel",),   # batch tiles -> both v7x TCs
            vmem_limit_bytes=32 * 1024 * 1024,   # explicit; re-derive at scale
        ),
    )(*args)
    return out[:B, :n_classes]


# ----------------------------------------------------------------------------
# Parameters: PyTorch-layout init + conversion to the fused kernel layout
# ----------------------------------------------------------------------------

def init_torch_style_params(key, bert_hidden, hidden_dim, n_layers, n_classes):
    """Deterministic params with PyTorch shapes (gate order i, f, g, o)."""
    scale = 0.1

    def draw(k, shape):
        return jax.random.normal(k, shape, dtype=jnp.float32) * scale

    params = {"lstm": [], "out": {}}
    for layer in range(n_layers):
        in_dim = bert_hidden if layer == 0 else 2 * hidden_dim
        dirs = []
        for _ in range(2):  # forward, reverse
            key, k1, k2, k3, k4 = jax.random.split(key, 5)
            dirs.append(dict(
                w_ih=draw(k1, (4 * hidden_dim, in_dim)),
                w_hh=draw(k2, (4 * hidden_dim, hidden_dim)),
                b_ih=draw(k3, (4 * hidden_dim,)),
                b_hh=draw(k4, (4 * hidden_dim,)),
            ))
        params["lstm"].append(dirs)

    in_feat = hidden_dim * 2 * n_layers
    key, k1, k2, k3, k4, k5, k6 = jax.random.split(key, 7)
    params["out"] = dict(
        w1=draw(k1, (hidden_dim, in_feat)), b1=draw(k2, (hidden_dim,)),
        w2=draw(k3, (hidden_dim, hidden_dim)), b2=draw(k4, (hidden_dim,)),
        w3=draw(k5, (n_classes, hidden_dim)), b3=draw(k6, (n_classes,)),
    )
    return params


def build_fused_params(pt, hidden_dim, n_layers, n_classes):
    """Pack PyTorch-layout weights into the fused, lane-padded kernel layout.

    Gate column order is [i, f, o, g]; each gate block is D2 = 2*H_pad lanes
    and holds [forward | reverse] columns.  Padding columns/rows are zero,
    which keeps the padded h/c lanes exactly zero through the recurrence and
    the head (so padding never changes the math).
    """
    H = hidden_dim
    H_pad = _round_up(H, 64)               # 2*H_pad is a multiple of 128 lanes
    D2 = 2 * H_pad
    G = 4 * D2
    HD_pad = _round_up(hidden_dim, 128)    # head intermediate width
    C_pad = _round_up(n_classes, 128)      # lane-dense output block
    torch_gate = (0, 1, 3, 2)              # kernel [i,f,o,g] -> torch (i,f,g,o)

    fused = {"W": [], "U": [], "b": [], "H": H, "H_pad": H_pad,
             "n_layers": n_layers, "n_classes": n_classes}
    for l in range(n_layers):
        d_in = pt["lstm"][l][0]["w_ih"].shape[1] if l == 0 else D2
        W = jnp.zeros((d_in, G), jnp.float32)
        U = jnp.zeros((D2, G), jnp.float32)
        b = jnp.zeros((G,), jnp.float32)
        for d in range(2):                 # 0 = forward, 1 = reverse
            p = pt["lstm"][l][d]
            for q in range(4):
                tq = torch_gate[q]
                col = q * D2 + d * H_pad
                w_blk = p["w_ih"][tq * H:(tq + 1) * H, :]   # (H, in_features)
                if l == 0:
                    W = W.at[:, col:col + H].set(w_blk.T)
                else:
                    # layer>=1 input rows: [fwd 0:H | pad | rev H_pad:H_pad+H | pad]
                    W = W.at[0:H, col:col + H].set(w_blk[:, 0:H].T)
                    W = W.at[H_pad:H_pad + H, col:col + H].set(
                        w_blk[:, H:2 * H].T)
                U = U.at[d * H_pad:d * H_pad + H, col:col + H].set(
                    p["w_hh"][tq * H:(tq + 1) * H, :].T)
                b = b.at[col:col + H].set(p["b_ih"][tq * H:(tq + 1) * H]
                                          + p["b_hh"][tq * H:(tq + 1) * H])
        fused["W"].append(W.astype(jnp.bfloat16))
        fused["U"].append(U.astype(jnp.bfloat16))
        fused["b"].append(b.reshape(1, G))                  # biases stay f32

    o = pt["out"]
    W1 = jnp.zeros((n_layers * D2, HD_pad), jnp.float32)
    for l in range(n_layers):
        for d in range(2):
            src = o["w1"][:, l * 2 * H + d * H:l * 2 * H + (d + 1) * H]
            W1 = W1.at[l * D2 + d * H_pad:l * D2 + d * H_pad + H,
                       0:hidden_dim].set(src.T)
    b1 = jnp.zeros((HD_pad,), jnp.float32).at[0:hidden_dim].set(o["b1"])
    W2 = jnp.zeros((HD_pad, HD_pad), jnp.float32).at[
        0:hidden_dim, 0:hidden_dim].set(o["w2"].T)
    b2 = jnp.zeros((HD_pad,), jnp.float32).at[0:hidden_dim].set(o["b2"])
    W3 = jnp.zeros((HD_pad, C_pad), jnp.float32).at[
        0:hidden_dim, 0:n_classes].set(o["w3"].T)
    b3 = jnp.zeros((C_pad,), jnp.float32).at[0:n_classes].set(o["b3"])
    fused["out"] = dict(
        w1=W1.astype(jnp.bfloat16), b1=b1.reshape(1, HD_pad),
        w2=W2.astype(jnp.bfloat16), b2=b2.reshape(1, HD_pad),
        w3=W3.astype(jnp.bfloat16), b3=b3.reshape(1, C_pad),
    )
    return fused


# ----------------------------------------------------------------------------
# Pure-JAX reference (PyTorch semantics, f32) for correctness checking
# ----------------------------------------------------------------------------

def reference_forward(pt, x, hidden_dim, n_layers):
    H = hidden_dim
    B, S, _ = x.shape

    def cell(xt, h, c, p):
        gates = xt @ p["w_ih"].T + h @ p["w_hh"].T + p["b_ih"] + p["b_hh"]
        i = jax.nn.sigmoid(gates[:, 0:H])
        f = jax.nn.sigmoid(gates[:, H:2 * H])
        g = jnp.tanh(gates[:, 2 * H:3 * H])
        o = jax.nn.sigmoid(gates[:, 3 * H:4 * H])
        c = f * c + i * g
        return o * jnp.tanh(c), c

    seq = x
    finals = []
    for l in range(n_layers):
        pf, pr = pt["lstm"][l]
        h = jnp.zeros((B, H)); c = jnp.zeros((B, H)); outs_f = []
        for t in range(S):
            h, c = cell(seq[:, t], h, c, pf)
            outs_f.append(h)
        hf = h
        h = jnp.zeros((B, H)); c = jnp.zeros((B, H)); outs_r = [None] * S
        for t in range(S - 1, -1, -1):
            h, c = cell(seq[:, t], h, c, pr)
            outs_r[t] = h
        hr = h
        seq = jnp.stack([jnp.concatenate([outs_f[t], outs_r[t]], axis=-1)
                         for t in range(S)], axis=1)
        finals += [hf, hr]                       # layer-major, direction-minor
    hidden = jnp.concatenate(finals, axis=-1)
    o = pt["out"]
    h1 = hidden @ o["w1"].T + o["b1"]
    h2 = h1 @ o["w2"].T + o["b2"]
    h2 = jnp.where(h2 > 0, h2, jnp.exp(jnp.minimum(h2, 0.0)) - 1.0)
    return h2 @ o["w3"].T + o["b3"]


# ----------------------------------------------------------------------------

if __name__ == "__main__":
    batch, seq = 2, 8
    bert_hidden = 32        # stands in for bert.config.hidden_size
    hidden_dim = 16
    n_layers = 2
    n_classes = 3

    key = jax.random.PRNGKey(0)
    key, pkey, xkey = jax.random.split(key, 3)
    pt_params = init_torch_style_params(pkey, bert_hidden, hidden_dim,
                                        n_layers, n_classes)
    fused = build_fused_params(pt_params, hidden_dim, n_layers, n_classes)

    # Synthetic BERT last_hidden_state (B, S, D_bert).
    last_hidden_state = jax.random.normal(
        xkey, (batch, seq, bert_hidden), dtype=jnp.float32)

    logits = jax.block_until_ready(sentiment_forward(fused, last_hidden_state))

    assert logits.shape == (batch, n_classes)
    assert logits.dtype == jnp.float32

    ref = jax.block_until_ready(
        reference_forward(pt_params, last_hidden_state, hidden_dim, n_layers))
    # bf16 MXU operands with f32 accumulation -> loosened tolerance vs f32 ref.
    assert jnp.allclose(logits, ref, atol=2e-2, rtol=2e-2), (logits, ref)

    print("KERNEL_OK")
</pallas_src>

<mosaic_0001>
module attributes {stable_mosaic.version = 11 : i64} {
  func.func @kernel(%arg0: i32, %arg1: memref<8x256xf32, #tpu.memory_space<vmem>>, %arg2: memref<32x512xbf16, #tpu.memory_space<vmem>>, %arg3: memref<128x512xbf16, #tpu.memory_space<vmem>>, %arg4: memref<1x512xf32, #tpu.memory_space<vmem>>, %arg5: memref<128x512xbf16, #tpu.memory_space<vmem>>, %arg6: memref<128x512xbf16, #tpu.memory_space<vmem>>, %arg7: memref<1x512xf32, #tpu.memory_space<vmem>>, %arg8: memref<256x128xbf16, #tpu.memory_space<vmem>>, %arg9: memref<1x128xf32, #tpu.memory_space<vmem>>, %arg10: memref<128x128xbf16, #tpu.memory_space<vmem>>, %arg11: memref<1x128xf32, #tpu.memory_space<vmem>>, %arg12: memref<128x128xbf16, #tpu.memory_space<vmem>>, %arg13: memref<1x128xf32, #tpu.memory_space<vmem>>, %arg14: memref<8x128xf32, #tpu.memory_space<vmem>>, %arg15: memref<64x32xbf16, #tpu.memory_space<vmem>>, %arg16: memref<64x512xf32, #tpu.memory_space<vmem>>, %arg17: memref<64x128xbf16, #tpu.memory_space<vmem>>, %arg18: memref<8x256xbf16, #tpu.memory_space<vmem>>) attributes {dimension_semantics = [#tpu.dimension_semantics<parallel>], iteration_bounds = array<i64: 1>, scalar_prefetch = 0 : i64, scratch_operands = 4 : i64, tpu.core_type = #tpu.core_type<tc>, window_params = [{transform_indices = @transform_0, window_bounds = array<i64: 8, 256>}, {pipeline_mode = #tpu.pipeline_mode<synchronous>, transform_indices = @transform_1, window_bounds = array<i64: 32, 512>}, {pipeline_mode = #tpu.pipeline_mode<synchronous>, transform_indices = @transform_2, window_bounds = array<i64: 128, 512>}, {pipeline_mode = #tpu.pipeline_mode<synchronous>, transform_indices = @transform_3, window_bounds = array<i64: 1, 512>}, {pipeline_mode = #tpu.pipeline_mode<synchronous>, transform_indices = @transform_4, window_bounds = array<i64: 128, 512>}, {pipeline_mode = #tpu.pipeline_mode<synchronous>, transform_indices = @transform_5, window_bounds = array<i64: 128, 512>}, {pipeline_mode = #tpu.pipeline_mode<synchronous>, transform_indices = @transform_6, window_bounds = array<i64: 1, 512>}, {pipeline_mode = #tpu.pipeline_mode<synchronous>, transform_indices = @transform_7, window_bounds = array<i64: 256, 128>}, {pipeline_mode = #tpu.pipeline_mode<synchronous>, transform_indices = @transform_8, window_bounds = array<i64: 1, 128>}, {pipeline_mode = #tpu.pipeline_mode<synchronous>, transform_indices = @transform_9, window_bounds = array<i64: 128, 128>}, {pipeline_mode = #tpu.pipeline_mode<synchronous>, transform_indices = @transform_10, window_bounds = array<i64: 1, 128>}, {pipeline_mode = #tpu.pipeline_mode<synchronous>, transform_indices = @transform_11, window_bounds = array<i64: 128, 128>}, {pipeline_mode = #tpu.pipeline_mode<synchronous>, transform_indices = @transform_12, window_bounds = array<i64: 1, 128>}, {transform_indices = @transform_13, window_bounds = array<i64: 8, 128>}]} {
    %0 = tpu.iota {dimensions = array<i32: 1>} : vector<1x512xi32>
    %c128_i32 = arith.constant 128 : i32
    %c0_i32 = arith.constant 0 : i32
    %1 = arith.cmpi eq, %c128_i32, %c0_i32 : i32
    %c1_i32 = arith.constant 1 : i32
    %2 = arith.select %1, %c1_i32, %c128_i32 : i32
    %3 = vector.broadcast %2 : i32 to vector<1x512xi32>
    %4 = arith.remsi %0, %3 : vector<1x512xi32>
    %c0_i32_0 = arith.constant 0 : i32
    %5 = vector.broadcast %c0_i32_0 : i32 to vector<1x512xi32>
    %6 = arith.cmpi ne, %4, %5 : vector<1x512xi32>
    %c0_i32_1 = arith.constant 0 : i32
    %7 = vector.broadcast %c0_i32_1 : i32 to vector<1x512xi32>
    %8 = arith.cmpi slt, %4, %7 : vector<1x512xi32>
    %c0_i32_2 = arith.constant 0 : i32
    %9 = arith.cmpi slt, %2, %c0_i32_2 : i32
    %10 = vector.broadcast %9 : i1 to vector<1x512xi1>
    %11 = vector.broadcast %10 : vector<1x512xi1> to vector<1x512xi1>
    %12 = arith.xori %8, %11 : vector<1x512xi1>
    %13 = arith.andi %12, %6 : vector<1x512xi1>
    %14 = vector.broadcast %2 : i32 to vector<1x512xi32>
    %15 = arith.addi %4, %14 : vector<1x512xi32>
    %16 = arith.select %13, %15, %4 : vector<1x512xi1>, vector<1x512xi32>
    %c64_i32 = arith.constant 64 : i32
    %17 = vector.broadcast %c64_i32 : i32 to vector<1x512xi32>
    %18 = arith.cmpi sge, %16, %17 : vector<1x512xi32>
    %cst = arith.constant 0.000000e+00 : bf16
    %19 = vector.broadcast %cst : bf16 to vector<64x128xbf16>
    %c0 = arith.constant 0 : index
    %c0_3 = arith.constant 0 : index
    %20 = vector.load %arg17[%c0, %c0_3] : memref<64x128xbf16, #tpu.memory_space<vmem>>, vector<64x128xbf16>
    tpu.vector_store %arg17[%c0, %c0_3], %19 {strides = array<i32>} : memref<64x128xbf16, #tpu.memory_space<vmem>>, vector<64x128xbf16>,
    %c0_4 = arith.constant 0 : index
    %c0_5 = arith.constant 0 : index
    %21 = vector.load %arg1[%c0_4, %c0_5] : memref<8x256xf32, #tpu.memory_space<vmem>>, vector<8x32xf32>
    %22 = arith.truncf %21 : vector<8x32xf32> to vector<8x32xbf16>
    %c0_6 = arith.constant 0 : index
    %c0_7 = arith.constant 0 : index
    %23 = vector.load %arg15[%c0_6, %c0_7] : memref<64x32xbf16, #tpu.memory_space<vmem>>, vector<8x32xbf16>
    tpu.vector_store %arg15[%c0_6, %c0_7], %22 {strides = array<i32>} : memref<64x32xbf16, #tpu.memory_space<vmem>>, vector<8x32xbf16>,
    %c0_8 = arith.constant 0 : index
    %c32 = arith.constant 32 : index
    %24 = vector.load %arg1[%c0_8, %c32] : memref<8x256xf32, #tpu.memory_space<vmem>>, vector<8x32xf32>
    %25 = arith.truncf %24 : vector<8x32xf32> to vector<8x32xbf16>
    %c8 = arith.constant 8 : index
    %c0_9 = arith.constant 0 : index
    %26 = vector.load %arg15[%c8, %c0_9] : memref<64x32xbf16, #tpu.memory_space<vmem>>, vector<8x32xbf16>
    tpu.vector_store %arg15[%c8, %c0_9], %25 {strides = array<i32>} : memref<64x32xbf16, #tpu.memory_space<vmem>>, vector<8x32xbf16>,
    %c0_10 = arith.constant 0 : index
    %c64 = arith.constant 64 : index
    %27 = vector.load %arg1[%c0_10, %c64] : memref<8x256xf32, #tpu.memory_space<vmem>>, vector<8x32xf32>
    %28 = arith.truncf %27 : vector<8x32xf32> to vector<8x32xbf16>
    %c16 = arith.constant 16 : index
    %c0_11 = arith.constant 0 : index
    %29 = vector.load %arg15[%c16, %c0_11] : memref<64x32xbf16, #tpu.memory_space<vmem>>, vector<8x32xbf16>
    tpu.vector_store %arg15[%c16, %c0_11], %28 {strides = array<i32>} : memref<64x32xbf16, #tpu.memory_space<vmem>>, vector<8x32xbf16>,
    %c0_12 = arith.constant 0 : index
    %c96 = arith.constant 96 : index
    %30 = vector.load %arg1[%c0_12, %c96] : memref<8x256xf32, #tpu.memory_space<vmem>>, vector<8x32xf32>
    %31 = arith.truncf %30 : vector<8x32xf32> to vector<8x32xbf16>
    %c24 = arith.constant 24 : index
    %c0_13 = arith.constant 0 : index
    %32 = vector.load %arg15[%c24, %c0_13] : memref<64x32xbf16, #tpu.memory_space<vmem>>, vector<8x32xbf16>
    tpu.vector_store %arg15[%c24, %c0_13], %31 {strides = array<i32>} : memref<64x32xbf16, #tpu.memory_space<vmem>>, vector<8x32xbf16>,
    %c0_14 = arith.constant 0 : index
    %c128 = arith.constant 128 : index
    %33 = vector.load %arg1[%c0_14, %c128] : memref<8x256xf32, #tpu.memory_space<vmem>>, vector<8x32xf32>
    %34 = arith.truncf %33 : vector<8x32xf32> to vector<8x32xbf16>
    %c32_15 = arith.constant 32 : index
    %c0_16 = arith.constant 0 : index
    %35 = vector.load %arg15[%c32_15, %c0_16] : memref<64x32xbf16, #tpu.memory_space<vmem>>, vector<8x32xbf16>
    tpu.vector_store %arg15[%c32_15, %c0_16], %34 {strides = array<i32>} : memref<64x32xbf16, #tpu.memory_space<vmem>>, vector<8x32xbf16>,
    %c0_17 = arith.constant 0 : index
    %c160 = arith.constant 160 : index
    %36 = vector.load %arg1[%c0_17, %c160] : memref<8x256xf32, #tpu.memory_space<vmem>>, vector<8x32xf32>
    %37 = arith.truncf %36 : vector<8x32xf32> to vector<8x32xbf16>
    %c40 = arith.constant 40 : index
    %c0_18 = arith.constant 0 : index
    %38 = vector.load %arg15[%c40, %c0_18] : memref<64x32xbf16, #tpu.memory_space<vmem>>, vector<8x32xbf16>
    tpu.vector_store %arg15[%c40, %c0_18], %37 {strides = array<i32>} : memref<64x32xbf16, #tpu.memory_space<vmem>>, vector<8x32xbf16>,
    %c0_19 = arith.constant 0 : index
    %c192 = arith.constant 192 : index
    %39 = vector.load %arg1[%c0_19, %c192] : memref<8x256xf32, #tpu.memory_space<vmem>>, vector<8x32xf32>
    %40 = arith.truncf %39 : vector<8x32xf32> to vector<8x32xbf16>
    %c48 = arith.constant 48 : index
    %c0_20 = arith.constant 0 : index
    %41 = vector.load %arg15[%c48, %c0_20] : memref<64x32xbf16, #tpu.memory_space<vmem>>, vector<8x32xbf16>
    tpu.vector_store %arg15[%c48, %c0_20], %40 {strides = array<i32>} : memref<64x32xbf16, #tpu.memory_space<vmem>>, vector<8x32xbf16>,
    %c0_21 = arith.constant 0 : index
    %c224 = arith.constant 224 : index
    %42 = vector.load %arg1[%c0_21, %c224] : memref<8x256xf32, #tpu.memory_space<vmem>>, vector<8x32xf32>
    %43 = arith.truncf %42 : vector<8x32xf32> to vector<8x32xbf16>
    %c56 = arith.constant 56 : index
    %c0_22 = arith.constant 0 : index
    %44 = vector.load %arg15[%c56, %c0_22] : memref<64x32xbf16, #tpu.memory_space<vmem>>, vector<8x32xbf16>
    tpu.vector_store %arg15[%c56, %c0_22], %43 {strides = array<i32>} : memref<64x32xbf16, #tpu.memory_space<vmem>>, vector<8x32xbf16>,
    %c0_23 = arith.constant 0 : index
    %c0_24 = arith.constant 0 : index
    %45 = vector.load %arg15[%c0_23, %c0_24] : memref<64x32xbf16, #tpu.memory_space<vmem>>, vector<64x32xbf16>
    %c0_25 = arith.constant 0 : index
    %c0_26 = arith.constant 0 : index
    %46 = vector.load %arg2[%c0_25, %c0_26] : memref<32x512xbf16, #tpu.memory_space<vmem>>, vector<32x512xbf16>
    %cst_27 = arith.constant dense<0.000000e+00> : vector<64x512xf32>
    %47 = tpu.matmul %45, %46, %cst_27 {dimension_numbers = #tpu.dot_dimension_numbers<[1], [0], [0], [1], [0, 0, 1, 1], [], []>} : vector<64x32xbf16>, vector<32x512xbf16>, vector<64x512xf32> -> vector<64x512xf32>
    %c0_28 = arith.constant 0 : index
    %c0_29 = arith.constant 0 : index
    %48 = vector.load %arg4[%c0_28, %c0_29] : memref<1x512xf32, #tpu.memory_space<vmem>>, vector<1x512xf32>
    %49 = vector.broadcast %48 : vector<1x512xf32> to vector<64x512xf32>
    %50 = arith.addf %47, %49 : vector<64x512xf32>
    %c0_30 = arith.constant 0 : index
    %c0_31 = arith.constant 0 : index
    %51 = vector.load %arg16[%c0_30, %c0_31] : memref<64x512xf32, #tpu.memory_space<vmem>>, vector<64x512xf32>
    tpu.vector_store %arg16[%c0_30, %c0_31], %50 {strides = array<i32>} : memref<64x512xf32, #tpu.memory_space<vmem>>, vector<64x512xf32>,
    %cst_32 = arith.constant 0.000000e+00 : bf16
    %52 = vector.broadcast %cst_32 : bf16 to vector<8x128xbf16>
    %cst_33 = arith.constant 0.000000e+00 : f32
    %53 = vector.broadcast %cst_33 : f32 to vector<8x128xf32>
    %c0_34 = arith.constant 0 : index
    %c0_35 = arith.constant 0 : index
    %54 = vector.load %arg16[%c0_34, %c0_35] : memref<64x512xf32, #tpu.memory_space<vmem>>, vector<8x512xf32>
    %c56_36 = arith.constant 56 : index
    %c0_37 = arith.constant 0 : index
    %55 = vector.load %arg16[%c56_36, %c0_37] : memref<64x512xf32, #tpu.memory_space<vmem>>, vector<8x512xf32>
    %56 = vector.shape_cast %18 : vector<1x512xi1> to vector<1x512xi1>
    %57 = vector.broadcast %56 : vector<1x512xi1> to vector<8x512xi1>
    %58 = arith.select %57, %55, %54 : vector<8x512xi1>, vector<8x512xf32>
    %c0_38 = arith.constant 0 : index
    %c0_39 = arith.constant 0 : index
    %59 = vector.load %arg3[%c0_38, %c0_39] : memref<128x512xbf16, #tpu.memory_space<vmem>>, vector<128x512xbf16>
    %cst_40 = arith.constant dense<0.000000e+00> : vector<8x512xf32>
    %60 = tpu.matmul %52, %59, %cst_40 {dimension_numbers = #tpu.dot_dimension_numbers<[1], [0], [0], [1], [0, 0, 1, 1], [], []>} : vector<8x128xbf16>, vector<128x512xbf16>, vector<8x512xf32> -> vector<8x512xf32>
    %61 = arith.addf %58, %60 : vector<8x512xf32>
    %62 = vector.extract_strided_slice %61 {offsets = [0, 0], sizes = [8, 384], strides = [1, 1]} : vector<8x512xf32> to vector<8x384xf32>
    %63 = arith.negf %62 : vector<8x384xf32>
    %64 = math.exp %63 : vector<8x384xf32>
    %cst_41 = arith.constant 1.000000e+00 : f32
    %65 = vector.broadcast %cst_41 : f32 to vector<8x384xf32>
    %66 = arith.addf %65, %64 : vector<8x384xf32>
    %67 = arith.divf %65, %66 : vector<8x384xf32>
    %68 = vector.extract_strided_slice %67 {offsets = [0, 0], sizes = [8, 128], strides = [1, 1]} : vector<8x384xf32> to vector<8x128xf32>
    %69 = vector.extract_strided_slice %67 {offsets = [0, 128], sizes = [8, 128], strides = [1, 1]} : vector<8x384xf32> to vector<8x128xf32>
    %70 = vector.extract_strided_slice %67 {offsets = [0, 256], sizes = [8, 128], strides = [1, 1]} : vector<8x384xf32> to vector<8x128xf32>
    %71 = vector.extract_strided_slice %61 {offsets = [0, 384], sizes = [8, 128], strides = [1, 1]} : vector<8x512xf32> to vector<8x128xf32>
    %72 = math.tanh %71 : vector<8x128xf32>
    %73 = arith.mulf %69, %53 : vector<8x128xf32>
    %74 = arith.mulf %68, %72 : vector<8x128xf32>
    %75 = arith.addf %73, %74 : vector<8x128xf32>
    %76 = math.tanh %75 : vector<8x128xf32>
    %77 = arith.mulf %70, %76 : vector<8x128xf32>
    %78 = arith.truncf %77 : vector<8x128xf32> to vector<8x128xbf16>
    %79 = vector.extract_strided_slice %78 {offsets = [0, 0], sizes = [8, 64], strides = [1, 1]} : vector<8x128xbf16> to vector<8x64xbf16>
    %c0_42 = arith.constant 0 : index
    %c0_43 = arith.constant 0 : index
    %80 = vector.load %arg17[%c0_42, %c0_43] : memref<64x128xbf16, #tpu.memory_space<vmem>>, vector<8x64xbf16>
    tpu.vector_store %arg17[%c0_42, %c0_43], %79 {strides = array<i32>} : memref<64x128xbf16, #tpu.memory_space<vmem>>, vector<8x64xbf16>,
    %81 = vector.extract_strided_slice %78 {offsets = [0, 64], sizes = [8, 64], strides = [1, 1]} : vector<8x128xbf16> to vector<8x64xbf16>
    %c56_44 = arith.constant 56 : index
    %c64_45 = arith.constant 64 : index
    %82 = vector.load %arg17[%c56_44, %c64_45] : memref<64x128xbf16, #tpu.memory_space<vmem>>, vector<8x64xbf16>
    tpu.vector_store %arg17[%c56_44, %c64_45], %81 {strides = array<i32>} : memref<64x128xbf16, #tpu.memory_space<vmem>>, vector<8x64xbf16>,
    %c8_46 = arith.constant 8 : index
    %c0_47 = arith.constant 0 : index
    %83 = vector.load %arg16[%c8_46, %c0_47] : memref<64x512xf32, #tpu.memory_space<vmem>>, vector<8x512xf32>
    %c48_48 = arith.constant 48 : index
    %c0_49 = arith.constant 0 : index
    %84 = vector.load %arg16[%c48_48, %c0_49] : memref<64x512xf32, #tpu.memory_space<vmem>>, vector<8x512xf32>
    %85 = vector.shape_cast %18 : vector<1x512xi1> to vector<1x512xi1>
    %86 = vector.broadcast %85 : vector<1x512xi1> to vector<8x512xi1>
    %87 = arith.select %86, %84, %83 : vector<8x512xi1>, vector<8x512xf32>
    %c0_50 = arith.constant 0 : index
    %c0_51 = arith.constant 0 : index
    %88 = vector.load %arg3[%c0_50, %c0_51] : memref<128x512xbf16, #tpu.memory_space<vmem>>, vector<128x512xbf16>
    %cst_52 = arith.constant dense<0.000000e+00> : vector<8x512xf32>
    %89 = tpu.matmul %78, %88, %cst_52 {dimension_numbers = #tpu.dot_dimension_numbers<[1], [0], [0], [1], [0, 0, 1, 1], [], []>} : vector<8x128xbf16>, vector<128x512xbf16>, vector<8x512xf32> -> vector<8x512xf32>
    %90 = arith.addf %87, %89 : vector<8x512xf32>
    %91 = vector.extract_strided_slice %90 {offsets = [0, 0], sizes = [8, 384], strides = [1, 1]} : vector<8x512xf32> to vector<8x384xf32>
    %92 = arith.negf %91 : vector<8x384xf32>
    %93 = math.exp %92 : vector<8x384xf32>
    %cst_53 = arith.constant 1.000000e+00 : f32
    %94 = vector.broadcast %cst_53 : f32 to vector<8x384xf32>
    %95 = arith.addf %94, %93 : vector<8x384xf32>
    %96 = arith.divf %94, %95 : vector<8x384xf32>
    %97 = vector.extract_strided_slice %96 {offsets = [0, 0], sizes = [8, 128], strides = [1, 1]} : vector<8x384xf32> to vector<8x128xf32>
    %98 = vector.extract_strided_slice %96 {offsets = [0, 128], sizes = [8, 128], strides = [1, 1]} : vector<8x384xf32> to vector<8x128xf32>
    %99 = vector.extract_strided_slice %96 {offsets = [0, 256], sizes = [8, 128], strides = [1, 1]} : vector<8x384xf32> to vector<8x128xf32>
    %100 = vector.extract_strided_slice %90 {offsets = [0, 384], sizes = [8, 128], strides = [1, 1]} : vector<8x512xf32> to vector<8x128xf32>
    %101 = math.tanh %100 : vector<8x128xf32>
    %102 = arith.mulf %98, %75 : vector<8x128xf32>
    %103 = arith.mulf %97, %101 : vector<8x128xf32>
    %104 = arith.addf %102, %103 : vector<8x128xf32>
    %105 = math.tanh %104 : vector<8x128xf32>
    %106 = arith.mulf %99, %105 : vector<8x128xf32>
    %107 = arith.truncf %106 : vector<8x128xf32> to vector<8x128xbf16>
    %108 = vector.extract_strided_slice %107 {offsets = [0, 0], sizes = [8, 64], strides = [1, 1]} : vector<8x128xbf16> to vector<8x64xbf16>
    %c8_54 = arith.constant 8 : index
    %c0_55 = arith.constant 0 : index
    %109 = vector.load %arg17[%c8_54, %c0_55] : memref<64x128xbf16, #tpu.memory_space<vmem>>, vector<8x64xbf16>
    tpu.vector_store %arg17[%c8_54, %c0_55], %108 {strides = array<i32>} : memref<64x128xbf16, #tpu.memory_space<vmem>>, vector<8x64xbf16>,
    %110 = vector.extract_strided_slice %107 {offsets = [0, 64], sizes = [8, 64], strides = [1, 1]} : vector<8x128xbf16> to vector<8x64xbf16>
    %c48_56 = arith.constant 48 : index
    %c64_57 = arith.constant 64 : index
    %111 = vector.load %arg17[%c48_56, %c64_57] : memref<64x128xbf16, #tpu.memory_space<vmem>>, vector<8x64xbf16>
    tpu.vector_store %arg17[%c48_56, %c64_57], %110 {strides = array<i32>} : memref<64x128xbf16, #tpu.memory_space<vmem>>, vector<8x64xbf16>,
    %c16_58 = arith.constant 16 : index
    %c0_59 = arith.constant 0 : index
    %112 = vector.load %arg16[%c16_58, %c0_59] : memref<64x512xf32, #tpu.memory_space<vmem>>, vector<8x512xf32>
    %c40_60 = arith.constant 40 : index
    %c0_61 = arith.constant 0 : index
    %113 = vector.load %arg16[%c40_60, %c0_61] : memref<64x512xf32, #tpu.memory_space<vmem>>, vector<8x512xf32>
    %114 = vector.shape_cast %18 : vector<1x512xi1> to vector<1x512xi1>
    %115 = vector.broadcast %114 : vector<1x512xi1> to vector<8x512xi1>
    %116 = arith.select %115, %113, %112 : vector<8x512xi1>, vector<8x512xf32>
    %c0_62 = arith.constant 0 : index
    %c0_63 = arith.constant 0 : index
    %117 = vector.load %arg3[%c0_62, %c0_63] : memref<128x512xbf16, #tpu.memory_space<vmem>>, vector<128x512xbf16>
    %cst_64 = arith.constant dense<0.000000e+00> : vector<8x512xf32>
    %118 = tpu.matmul %107, %117, %cst_64 {dimension_numbers = #tpu.dot_dimension_numbers<[1], [0], [0], [1], [0, 0, 1, 1], [], []>} : vector<8x128xbf16>, vector<128x512xbf16>, vector<8x512xf32> -> vector<8x512xf32>
    %119 = arith.addf %116, %118 : vector<8x512xf32>
    %120 = vector.extract_strided_slice %119 {offsets = [0, 0], sizes = [8, 384], strides = [1, 1]} : vector<8x512xf32> to vector<8x384xf32>
    %121 = arith.negf %120 : vector<8x384xf32>
    %122 = math.exp %121 : vector<8x384xf32>
    %cst_65 = arith.constant 1.000000e+00 : f32
    %123 = vector.broadcast %cst_65 : f32 to vector<8x384xf32>
    %124 = arith.addf %123, %122 : vector<8x384xf32>
    %125 = arith.divf %123, %124 : vector<8x384xf32>
    %126 = vector.extract_strided_slice %125 {offsets = [0, 0], sizes = [8, 128], strides = [1, 1]} : vector<8x384xf32> to vector<8x128xf32>
    %127 = vector.extract_strided_slice %125 {offsets = [0, 128], sizes = [8, 128], strides = [1, 1]} : vector<8x384xf32> to vector<8x128xf32>
    %128 = vector.extract_strided_slice %125 {offsets = [0, 256], sizes = [8, 128], strides = [1, 1]} : vector<8x384xf32> to vector<8x128xf32>
    %129 = vector.extract_strided_slice %119 {offsets = [0, 384], sizes = [8, 128], strides = [1, 1]} : vector<8x512xf32> to vector<8x128xf32>
    %130 = math.tanh %129 : vector<8x128xf32>
    %131 = arith.mulf %127, %104 : vector<8x128xf32>
    %132 = arith.mulf %126, %130 : vector<8x128xf32>
    %133 = arith.addf %131, %132 : vector<8x128xf32>
    %134 = math.tanh %133 : vector<8x128xf32>
    %135 = arith.mulf %128, %134 : vector<8x128xf32>
    %136 = arith.truncf %135 : vector<8x128xf32> to vector<8x128xbf16>
    %137 = vector.extract_strided_slice %136 {offsets = [0, 0], sizes = [8, 64], strides = [1, 1]} : vector<8x128xbf16> to vector<8x64xbf16>
    %c16_66 = arith.constant 16 : index
    %c0_67 = arith.constant 0 : index
    %138 = vector.load %arg17[%c16_66, %c0_67] : memref<64x128xbf16, #tpu.memory_space<vmem>>, vector<8x64xbf16>
    tpu.vector_store %arg17[%c16_66, %c0_67], %137 {strides = array<i32>} : memref<64x128xbf16, #tpu.memory_space<vmem>>, vector<8x64xbf16>,
    %139 = vector.extract_strided_slice %136 {offsets = [0, 64], sizes = [8, 64], strides = [1, 1]} : vector<8x128xbf16> to vector<8x64xbf16>
    %c40_68 = arith.constant 40 : index
    %c64_69 = arith.constant 64 : index
    %140 = vector.load %arg17[%c40_68, %c64_69] : memref<64x128xbf16, #tpu.memory_space<vmem>>, vector<8x64xbf16>
    tpu.vector_store %arg17[%c40_68, %c64_69], %139 {strides = array<i32>} : memref<64x128xbf16, #tpu.memory_space<vmem>>, vector<8x64xbf16>,
    %c24_70 = arith.constant 24 : index
    %c0_71 = arith.constant 0 : index
    %141 = vector.load %arg16[%c24_70, %c0_71] : memref<64x512xf32, #tpu.memory_space<vmem>>, vector<8x512xf32>
    %c32_72 = arith.constant 32 : index
    %c0_73 = arith.constant 0 : index
    %142 = vector.load %arg16[%c32_72, %c0_73] : memref<64x512xf32, #tpu.memory_space<vmem>>, vector<8x512xf32>
    %143 = vector.shape_cast %18 : vector<1x512xi1> to vector<1x512xi1>
    %144 = vector.broadcast %143 : vector<1x512xi1> to vector<8x512xi1>
    %145 = arith.select %144, %142, %141 : vector<8x512xi1>, vector<8x512xf32>
    %c0_74 = arith.constant 0 : index
    %c0_75 = arith.constant 0 : index
    %146 = vector.load %arg3[%c0_74, %c0_75] : memref<128x512xbf16, #tpu.memory_space<vmem>>, vector<128x512xbf16>
    %cst_76 = arith.constant dense<0.000000e+00> : vector<8x512xf32>
    %147 = tpu.matmul %136, %146, %cst_76 {dimension_numbers = #tpu.dot_dimension_numbers<[1], [0], [0], [1], [0, 0, 1, 1], [], []>} : vector<8x128xbf16>, vector<128x512xbf16>, vector<8x512xf32> -> vector<8x512xf32>
    %148 = arith.addf %145, %147 : vector<8x512xf32>
    %149 = vector.extract_strided_slice %148 {offsets = [0, 0], sizes = [8, 384], strides = [1, 1]} : vector<8x512xf32> to vector<8x384xf32>
    %150 = arith.negf %149 : vector<8x384xf32>
    %151 = math.exp %150 : vector<8x384xf32>
    %cst_77 = arith.constant 1.000000e+00 : f32
    %152 = vector.broadcast %cst_77 : f32 to vector<8x384xf32>
    %153 = arith.addf %152, %151 : vector<8x384xf32>
    %154 = arith.divf %152, %153 : vector<8x384xf32>
    %155 = vector.extract_strided_slice %154 {offsets = [0, 0], sizes = [8, 128], strides = [1, 1]} : vector<8x384xf32> to vector<8x128xf32>
    %156 = vector.extract_strided_slice %154 {offsets = [0, 128], sizes = [8, 128], strides = [1, 1]} : vector<8x384xf32> to vector<8x128xf32>
    %157 = vector.extract_strided_slice %154 {offsets = [0, 256], sizes = [8, 128], strides = [1, 1]} : vector<8x384xf32> to vector<8x128xf32>
    %158 = vector.extract_strided_slice %148 {offsets = [0, 384], sizes = [8, 128], strides = [1, 1]} : vector<8x512xf32> to vector<8x128xf32>
    %159 = math.tanh %158 : vector<8x128xf32>
    %160 = arith.mulf %156, %133 : vector<8x128xf32>
    %161 = arith.mulf %155, %159 : vector<8x128xf32>
    %162 = arith.addf %160, %161 : vector<8x128xf32>
    %163 = math.tanh %162 : vector<8x128xf32>
    %164 = arith.mulf %157, %163 : vector<8x128xf32>
    %165 = arith.truncf %164 : vector<8x128xf32> to vector<8x128xbf16>
    %166 = vector.extract_strided_slice %165 {offsets = [0, 0], sizes = [8, 64], strides = [1, 1]} : vector<8x128xbf16> to vector<8x64xbf16>
    %c24_78 = arith.constant 24 : index
    %c0_79 = arith.constant 0 : index
    %167 = vector.load %arg17[%c24_78, %c0_79] : memref<64x128xbf16, #tpu.memory_space<vmem>>, vector<8x64xbf16>
    tpu.vector_store %arg17[%c24_78, %c0_79], %166 {strides = array<i32>} : memref<64x128xbf16, #tpu.memory_space<vmem>>, vector<8x64xbf16>,
    %168 = vector.extract_strided_slice %165 {offsets = [0, 64], sizes = [8, 64], strides = [1, 1]} : vector<8x128xbf16> to vector<8x64xbf16>
    %c32_80 = arith.constant 32 : index
    %c64_81 = arith.constant 64 : index
    %169 = vector.load %arg17[%c32_80, %c64_81] : memref<64x128xbf16, #tpu.memory_space<vmem>>, vector<8x64xbf16>
    tpu.vector_store %arg17[%c32_80, %c64_81], %168 {strides = array<i32>} : memref<64x128xbf16, #tpu.memory_space<vmem>>, vector<8x64xbf16>,
    %c32_82 = arith.constant 32 : index
    %c0_83 = arith.constant 0 : index
    %170 = vector.load %arg16[%c32_82, %c0_83] : memref<64x512xf32, #tpu.memory_space<vmem>>, vector<8x512xf32>
    %c24_84 = arith.constant 24 : index
    %c0_85 = arith.constant 0 : index
    %171 = vector.load %arg16[%c24_84, %c0_85] : memref<64x512xf32, #tpu.memory_space<vmem>>, vector<8x512xf32>
    %172 = vector.shape_cast %18 : vector<1x512xi1> to vector<1x512xi1>
    %173 = vector.broadcast %172 : vector<1x512xi1> to vector<8x512xi1>
    %174 = arith.select %173, %171, %170 : vector<8x512xi1>, vector<8x512xf32>
    %c0_86 = arith.constant 0 : index
    %c0_87 = arith.constant 0 : index
    %175 = vector.load %arg3[%c0_86, %c0_87] : memref<128x512xbf16, #tpu.memory_space<vmem>>, vector<128x512xbf16>
    %cst_88 = arith.constant dense<0.000000e+00> : vector<8x512xf32>
    %176 = tpu.matmul %165, %175, %cst_88 {dimension_numbers = #tpu.dot_dimension_numbers<[1], [0], [0], [1], [0, 0, 1, 1], [], []>} : vector<8x128xbf16>, vector<128x512xbf16>, vector<8x512xf32> -> vector<8x512xf32>
    %177 = arith.addf %174, %176 : vector<8x512xf32>
    %178 = vector.extract_strided_slice %177 {offsets = [0, 0], sizes = [8, 384], strides = [1, 1]} : vector<8x512xf32> to vector<8x384xf32>
    %179 = arith.negf %178 : vector<8x384xf32>
    %180 = math.exp %179 : vector<8x384xf32>
    %cst_89 = arith.constant 1.000000e+00 : f32
    %181 = vector.broadcast %cst_89 : f32 to vector<8x384xf32>
    %182 = arith.addf %181, %180 : vector<8x384xf32>
    %183 = arith.divf %181, %182 : vector<8x384xf32>
    %184 = vector.extract_strided_slice %183 {offsets = [0, 0], sizes = [8, 128], strides = [1, 1]} : vector<8x384xf32> to vector<8x128xf32>
    %185 = vector.extract_strided_slice %183 {offsets = [0, 128], sizes = [8, 128], strides = [1, 1]} : vector<8x384xf32> to vector<8x128xf32>
    %186 = vector.extract_strided_slice %183 {offsets = [0, 256], sizes = [8, 128], strides = [1, 1]} : vector<8x384xf32> to vector<8x128xf32>
    %187 = vector.extract_strided_slice %177 {offsets = [0, 384], sizes = [8, 128], strides = [1, 1]} : vector<8x512xf32> to vector<8x128xf32>
    %188 = math.tanh %187 : vector<8x128xf32>
    %189 = arith.mulf %185, %162 : vector<8x128xf32>
    %190 = arith.mulf %184, %188 : vector<8x128xf32>
    %191 = arith.addf %189, %190 : vector<8x128xf32>
    %192 = math.tanh %191 : vector<8x128xf32>
    %193 = arith.mulf %186, %192 : vector<8x128xf32>
    %194 = arith.truncf %193 : vector<8x128xf32> to vector<8x128xbf16>
    %195 = vector.extract_strided_slice %194 {offsets = [0, 0], sizes = [8, 64], strides = [1, 1]} : vector<8x128xbf16> to vector<8x64xbf16>
    %c32_90 = arith.constant 32 : index
    %c0_91 = arith.constant 0 : index
    %196 = vector.load %arg17[%c32_90, %c0_91] : memref<64x128xbf16, #tpu.memory_space<vmem>>, vector<8x64xbf16>
    tpu.vector_store %arg17[%c32_90, %c0_91], %195 {strides = array<i32>} : memref<64x128xbf16, #tpu.memory_space<vmem>>, vector<8x64xbf16>,
    %197 = vector.extract_strided_slice %194 {offsets = [0, 64], sizes = [8, 64], strides = [1, 1]} : vector<8x128xbf16> to vector<8x64xbf16>
    %c24_92 = arith.constant 24 : index
    %c64_93 = arith.constant 64 : index
    %198 = vector.load %arg17[%c24_92, %c64_93] : memref<64x128xbf16, #tpu.memory_space<vmem>>, vector<8x64xbf16>
    tpu.vector_store %arg17[%c24_92, %c64_93], %197 {strides = array<i32>} : memref<64x128xbf16, #tpu.memory_space<vmem>>, vector<8x64xbf16>,
    %c40_94 = arith.constant 40 : index
    %c0_95 = arith.constant 0 : index
    %199 = vector.load %arg16[%c40_94, %c0_95] : memref<64x512xf32, #tpu.memory_space<vmem>>, vector<8x512xf32>
    %c16_96 = arith.constant 16 : index
    %c0_97 = arith.constant 0 : index
    %200 = vector.load %arg16[%c16_96, %c0_97] : memref<64x512xf32, #tpu.memory_space<vmem>>, vector<8x512xf32>
    %201 = vector.shape_cast %18 : vector<1x512xi1> to vector<1x512xi1>
    %202 = vector.broadcast %201 : vector<1x512xi1> to vector<8x512xi1>
    %203 = arith.select %202, %200, %199 : vector<8x512xi1>, vector<8x512xf32>
    %c0_98 = arith.constant 0 : index
    %c0_99 = arith.constant 0 : index
    %204 = vector.load %arg3[%c0_98, %c0_99] : memref<128x512xbf16, #tpu.memory_space<vmem>>, vector<128x512xbf16>
    %cst_100 = arith.constant dense<0.000000e+00> : vector<8x512xf32>
    %205 = tpu.matmul %194, %204, %cst_100 {dimension_numbers = #tpu.dot_dimension_numbers<[1], [0], [0], [1], [0, 0, 1, 1], [], []>} : vector<8x128xbf16>, vector<128x512xbf16>, vector<8x512xf32> -> vector<8x512xf32>
    %206 = arith.addf %203, %205 : vector<8x512xf32>
    %207 = vector.extract_strided_slice %206 {offsets = [0, 0], sizes = [8, 384], strides = [1, 1]} : vector<8x512xf32> to vector<8x384xf32>
    %208 = arith.negf %207 : vector<8x384xf32>
    %209 = math.exp %208 : vector<8x384xf32>
    %cst_101 = arith.constant 1.000000e+00 : f32
    %210 = vector.broadcast %cst_101 : f32 to vector<8x384xf32>
    %211 = arith.addf %210, %209 : vector<8x384xf32>
    %212 = arith.divf %210, %211 : vector<8x384xf32>
    %213 = vector.extract_strided_slice %212 {offsets = [0, 0], sizes = [8, 128], strides = [1, 1]} : vector<8x384xf32> to vector<8x128xf32>
    %214 = vector.extract_strided_slice %212 {offsets = [0, 128], sizes = [8, 128], strides = [1, 1]} : vector<8x384xf32> to vector<8x128xf32>
    %215 = vector.extract_strided_slice %212 {offsets = [0, 256], sizes = [8, 128], strides = [1, 1]} : vector<8x384xf32> to vector<8x128xf32>
    %216 = vector.extract_strided_slice %206 {offsets = [0, 384], sizes = [8, 128], strides = [1, 1]} : vector<8x512xf32> to vector<8x128xf32>
    %217 = math.tanh %216 : vector<8x128xf32>
    %218 = arith.mulf %214, %191 : vector<8x128xf32>
    %219 = arith.mulf %213, %217 : vector<8x128xf32>
    %220 = arith.addf %218, %219 : vector<8x128xf32>
    %221 = math.tanh %220 : vector<8x128xf32>
    %222 = arith.mulf %215, %221 : vector<8x128xf32>
    %223 = arith.truncf %222 : vector<8x128xf32> to vector<8x128xbf16>
    %224 = vector.extract_strided_slice %223 {offsets = [0, 0], sizes = [8, 64], strides = [1, 1]} : vector<8x128xbf16> to vector<8x64xbf16>
    %c40_102 = arith.constant 40 : index
    %c0_103 = arith.constant 0 : index
    %225 = vector.load %arg17[%c40_102, %c0_103] : memref<64x128xbf16, #tpu.memory_space<vmem>>, vector<8x64xbf16>
    tpu.vector_store %arg17[%c40_102, %c0_103], %224 {strides = array<i32>} : memref<64x128xbf16, #tpu.memory_space<vmem>>, vector<8x64xbf16>,
    %226 = vector.extract_strided_slice %223 {offsets = [0, 64], sizes = [8, 64], strides = [1, 1]} : vector<8x128xbf16> to vector<8x64xbf16>
    %c16_104 = arith.constant 16 : index
    %c64_105 = arith.constant 64 : index
    %227 = vector.load %arg17[%c16_104, %c64_105] : memref<64x128xbf16, #tpu.memory_space<vmem>>, vector<8x64xbf16>
    tpu.vector_store %arg17[%c16_104, %c64_105], %226 {strides = array<i32>} : memref<64x128xbf16, #tpu.memory_space<vmem>>, vector<8x64xbf16>,
    %c48_106 = arith.constant 48 : index
    %c0_107 = arith.constant 0 : index
    %228 = vector.load %arg16[%c48_106, %c0_107] : memref<64x512xf32, #tpu.memory_space<vmem>>, vector<8x512xf32>
    %c8_108 = arith.constant 8 : index
    %c0_109 = arith.constant 0 : index
    %229 = vector.load %arg16[%c8_108, %c0_109] : memref<64x512xf32, #tpu.memory_space<vmem>>, vector<8x512xf32>
    %230 = vector.shape_cast %18 : vector<1x512xi1> to vector<1x512xi1>
    %231 = vector.broadcast %230 : vector<1x512xi1> to vector<8x512xi1>
    %232 = arith.select %231, %229, %228 : vector<8x512xi1>, vector<8x512xf32>
    %c0_110 = arith.constant 0 : index
    %c0_111 = arith.constant 0 : index
    %233 = vector.load %arg3[%c0_110, %c0_111] : memref<128x512xbf16, #tpu.memory_space<vmem>>, vector<128x512xbf16>
    %cst_112 = arith.constant dense<0.000000e+00> : vector<8x512xf32>
    %234 = tpu.matmul %223, %233, %cst_112 {dimension_numbers = #tpu.dot_dimension_numbers<[1], [0], [0], [1], [0, 0, 1, 1], [], []>} : vector<8x128xbf16>, vector<128x512xbf16>, vector<8x512xf32> -> vector<8x512xf32>
    %235 = arith.addf %232, %234 : vector<8x512xf32>
    %236 = vector.extract_strided_slice %235 {offsets = [0, 0], sizes = [8, 384], strides = [1, 1]} : vector<8x512xf32> to vector<8x384xf32>
    %237 = arith.negf %236 : vector<8x384xf32>
    %238 = math.exp %237 : vector<8x384xf32>
    %cst_113 = arith.constant 1.000000e+00 : f32
    %239 = vector.broadcast %cst_113 : f32 to vector<8x384xf32>
    %240 = arith.addf %239, %238 : vector<8x384xf32>
    %241 = arith.divf %239, %240 : vector<8x384xf32>
    %242 = vector.extract_strided_slice %241 {offsets = [0, 0], sizes = [8, 128], strides = [1, 1]} : vector<8x384xf32> to vector<8x128xf32>
    %243 = vector.extract_strided_slice %241 {offsets = [0, 128], sizes = [8, 128], strides = [1, 1]} : vector<8x384xf32> to vector<8x128xf32>
    %244 = vector.extract_strided_slice %241 {offsets = [0, 256], sizes = [8, 128], strides = [1, 1]} : vector<8x384xf32> to vector<8x128xf32>
    %245 = vector.extract_strided_slice %235 {offsets = [0, 384], sizes = [8, 128], strides = [1, 1]} : vector<8x512xf32> to vector<8x128xf32>
    %246 = math.tanh %245 : vector<8x128xf32>
    %247 = arith.mulf %243, %220 : vector<8x128xf32>
    %248 = arith.mulf %242, %246 : vector<8x128xf32>
    %249 = arith.addf %247, %248 : vector<8x128xf32>
    %250 = math.tanh %249 : vector<8x128xf32>
    %251 = arith.mulf %244, %250 : vector<8x128xf32>
    %252 = arith.truncf %251 : vector<8x128xf32> to vector<8x128xbf16>
    %253 = vector.extract_strided_slice %252 {offsets = [0, 0], sizes = [8, 64], strides = [1, 1]} : vector<8x128xbf16> to vector<8x64xbf16>
    %c48_114 = arith.constant 48 : index
    %c0_115 = arith.constant 0 : index
    %254 = vector.load %arg17[%c48_114, %c0_115] : memref<64x128xbf16, #tpu.memory_space<vmem>>, vector<8x64xbf16>
    tpu.vector_store %arg17[%c48_114, %c0_115], %253 {strides = array<i32>} : memref<64x128xbf16, #tpu.memory_space<vmem>>, vector<8x64xbf16>,
    %255 = vector.extract_strided_slice %252 {offsets = [0, 64], sizes = [8, 64], strides = [1, 1]} : vector<8x128xbf16> to vector<8x64xbf16>
    %c8_116 = arith.constant 8 : index
    %c64_117 = arith.constant 64 : index
    %256 = vector.load %arg17[%c8_116, %c64_117] : memref<64x128xbf16, #tpu.memory_space<vmem>>, vector<8x64xbf16>
    tpu.vector_store %arg17[%c8_116, %c64_117], %255 {strides = array<i32>} : memref<64x128xbf16, #tpu.memory_space<vmem>>, vector<8x64xbf16>,
    %c56_118 = arith.constant 56 : index
    %c0_119 = arith.constant 0 : index
    %257 = vector.load %arg16[%c56_118, %c0_119] : memref<64x512xf32, #tpu.memory_space<vmem>>, vector<8x512xf32>
    %c0_120 = arith.constant 0 : index
    %c0_121 = arith.constant 0 : index
    %258 = vector.load %arg16[%c0_120, %c0_121] : memref<64x512xf32, #tpu.memory_space<vmem>>, vector<8x512xf32>
    %259 = vector.shape_cast %18 : vector<1x512xi1> to vector<1x512xi1>
    %260 = vector.broadcast %259 : vector<1x512xi1> to vector<8x512xi1>
    %261 = arith.select %260, %258, %257 : vector<8x512xi1>, vector<8x512xf32>
    %c0_122 = arith.constant 0 : index
    %c0_123 = arith.constant 0 : index
    %262 = vector.load %arg3[%c0_122, %c0_123] : memref<128x512xbf16, #tpu.memory_space<vmem>>, vector<128x512xbf16>
    %cst_124 = arith.constant dense<0.000000e+00> : vector<8x512xf32>
    %263 = tpu.matmul %252, %262, %cst_124 {dimension_numbers = #tpu.dot_dimension_numbers<[1], [0], [0], [1], [0, 0, 1, 1], [], []>} : vector<8x128xbf16>, vector<128x512xbf16>, vector<8x512xf32> -> vector<8x512xf32>
    %264 = arith.addf %261, %263 : vector<8x512xf32>
    %265 = vector.extract_strided_slice %264 {offsets = [0, 0], sizes = [8, 384], strides = [1, 1]} : vector<8x512xf32> to vector<8x384xf32>
    %266 = arith.negf %265 : vector<8x384xf32>
    %267 = math.exp %266 : vector<8x384xf32>
    %cst_125 = arith.constant 1.000000e+00 : f32
    %268 = vector.broadcast %cst_125 : f32 to vector<8x384xf32>
    %269 = arith.addf %268, %267 : vector<8x384xf32>
    %270 = arith.divf %268, %269 : vector<8x384xf32>
    %271 = vector.extract_strided_slice %270 {offsets = [0, 0], sizes = [8, 128], strides = [1, 1]} : vector<8x384xf32> to vector<8x128xf32>
    %272 = vector.extract_strided_slice %270 {offsets = [0, 128], sizes = [8, 128], strides = [1, 1]} : vector<8x384xf32> to vector<8x128xf32>
    %273 = vector.extract_strided_slice %270 {offsets = [0, 256], sizes = [8, 128], strides = [1, 1]} : vector<8x384xf32> to vector<8x128xf32>
    %274 = vector.extract_strided_slice %264 {offsets = [0, 384], sizes = [8, 128], strides = [1, 1]} : vector<8x512xf32> to vector<8x128xf32>
    %275 = math.tanh %274 : vector<8x128xf32>
    %276 = arith.mulf %272, %249 : vector<8x128xf32>
    %277 = arith.mulf %271, %275 : vector<8x128xf32>
    %278 = arith.addf %276, %277 : vector<8x128xf32>
    %279 = math.tanh %278 : vector<8x128xf32>
    %280 = arith.mulf %273, %279 : vector<8x128xf32>
    %281 = arith.truncf %280 : vector<8x128xf32> to vector<8x128xbf16>
    %282 = vector.extract_strided_slice %281 {offsets = [0, 0], sizes = [8, 64], strides = [1, 1]} : vector<8x128xbf16> to vector<8x64xbf16>
    %c56_126 = arith.constant 56 : index
    %c0_127 = arith.constant 0 : index
    %283 = vector.load %arg17[%c56_126, %c0_127] : memref<64x128xbf16, #tpu.memory_space<vmem>>, vector<8x64xbf16>
    tpu.vector_store %arg17[%c56_126, %c0_127], %282 {strides = array<i32>} : memref<64x128xbf16, #tpu.memory_space<vmem>>, vector<8x64xbf16>,
    %284 = vector.extract_strided_slice %281 {offsets = [0, 64], sizes = [8, 64], strides = [1, 1]} : vector<8x128xbf16> to vector<8x64xbf16>
    %c0_128 = arith.constant 0 : index
    %c64_129 = arith.constant 64 : index
    %285 = vector.load %arg17[%c0_128, %c64_129] : memref<64x128xbf16, #tpu.memory_space<vmem>>, vector<8x64xbf16>
    tpu.vector_store %arg17[%c0_128, %c64_129], %284 {strides = array<i32>} : memref<64x128xbf16, #tpu.memory_space<vmem>>, vector<8x64xbf16>,
    %c0_130 = arith.constant 0 : index
    %c0_131 = arith.constant 0 : index
    %286 = vector.load %arg18[%c0_130, %c0_131] : memref<8x256xbf16, #tpu.memory_space<vmem>>, vector<8x128xbf16>
    tpu.vector_store %arg18[%c0_130, %c0_131], %281 {strides = array<i32>} : memref<8x256xbf16, #tpu.memory_space<vmem>>, vector<8x128xbf16>,
    %c0_132 = arith.constant 0 : index
    %c0_133 = arith.constant 0 : index
    %287 = vector.load %arg17[%c0_132, %c0_133] : memref<64x128xbf16, #tpu.memory_space<vmem>>, vector<64x128xbf16>
    %c0_134 = arith.constant 0 : index
    %c0_135 = arith.constant 0 : index
    %288 = vector.load %arg5[%c0_134, %c0_135] : memref<128x512xbf16, #tpu.memory_space<vmem>>, vector<128x512xbf16>
    %cst_136 = arith.constant dense<0.000000e+00> : vector<64x512xf32>
    %289 = tpu.matmul %287, %288, %cst_136 {dimension_numbers = #tpu.dot_dimension_numbers<[1], [0], [0], [1], [0, 0, 1, 1], [], []>} : vector<64x128xbf16>, vector<128x512xbf16>, vector<64x512xf32> -> vector<64x512xf32>
    %c0_137 = arith.constant 0 : index
    %c0_138 = arith.constant 0 : index
    %290 = vector.load %arg7[%c0_137, %c0_138] : memref<1x512xf32, #tpu.memory_space<vmem>>, vector<1x512xf32>
    %291 = vector.broadcast %290 : vector<1x512xf32> to vector<64x512xf32>
    %292 = arith.addf %289, %291 : vector<64x512xf32>
    %c0_139 = arith.constant 0 : index
    %c0_140 = arith.constant 0 : index
    %293 = vector.load %arg16[%c0_139, %c0_140] : memref<64x512xf32, #tpu.memory_space<vmem>>, vector<64x512xf32>
    tpu.vector_store %arg16[%c0_139, %c0_140], %292 {strides = array<i32>} : memref<64x512xf32, #tpu.memory_space<vmem>>, vector<64x512xf32>,
    %cst_141 = arith.constant 0.000000e+00 : bf16
    %294 = vector.broadcast %cst_141 : bf16 to vector<8x128xbf16>
    %cst_142 = arith.constant 0.000000e+00 : f32
    %295 = vector.broadcast %cst_142 : f32 to vector<8x128xf32>
    %c0_143 = arith.constant 0 : index
    %c0_144 = arith.constant 0 : index
    %296 = vector.load %arg16[%c0_143, %c0_144] : memref<64x512xf32, #tpu.memory_space<vmem>>, vector<8x512xf32>
    %c56_145 = arith.constant 56 : index
    %c0_146 = arith.constant 0 : index
    %297 = vector.load %arg16[%c56_145, %c0_146] : memref<64x512xf32, #tpu.memory_space<vmem>>, vector<8x512xf32>
    %298 = vector.shape_cast %18 : vector<1x512xi1> to vector<1x512xi1>
    %299 = vector.broadcast %298 : vector<1x512xi1> to vector<8x512xi1>
    %300 = arith.select %299, %297, %296 : vector<8x512xi1>, vector<8x512xf32>
    %c0_147 = arith.constant 0 : index
    %c0_148 = arith.constant 0 : index
    %301 = vector.load %arg6[%c0_147, %c0_148] : memref<128x512xbf16, #tpu.memory_space<vmem>>, vector<128x512xbf16>
    %cst_149 = arith.constant dense<0.000000e+00> : vector<8x512xf32>
    %302 = tpu.matmul %294, %301, %cst_149 {dimension_numbers = #tpu.dot_dimension_numbers<[1], [0], [0], [1], [0, 0, 1, 1], [], []>} : vector<8x128xbf16>, vector<128x512xbf16>, vector<8x512xf32> -> vector<8x512xf32>
    %303 = arith.addf %300, %302 : vector<8x512xf32>
    %304 = vector.extract_strided_slice %303 {offsets = [0, 0], sizes = [8, 384], strides = [1, 1]} : vector<8x512xf32> to vector<8x384xf32>
    %305 = arith.negf %304 : vector<8x384xf32>
    %306 = math.exp %305 : vector<8x384xf32>
    %cst_150 = arith.constant 1.000000e+00 : f32
    %307 = vector.broadcast %cst_150 : f32 to vector<8x384xf32>
    %308 = arith.addf %307, %306 : vector<8x384xf32>
    %309 = arith.divf %307, %308 : vector<8x384xf32>
    %310 = vector.extract_strided_slice %309 {offsets = [0, 0], sizes = [8, 128], strides = [1, 1]} : vector<8x384xf32> to vector<8x128xf32>
    %311 = vector.extract_strided_slice %309 {offsets = [0, 128], sizes = [8, 128], strides = [1, 1]} : vector<8x384xf32> to vector<8x128xf32>
    %312 = vector.extract_strided_slice %309 {offsets = [0, 256], sizes = [8, 128], strides = [1, 1]} : vector<8x384xf32> to vector<8x128xf32>
    %313 = vector.extract_strided_slice %303 {offsets = [0, 384], sizes = [8, 128], strides = [1, 1]} : vector<8x512xf32> to vector<8x128xf32>
    %314 = math.tanh %313 : vector<8x128xf32>
    %315 = arith.mulf %311, %295 : vector<8x128xf32>
    %316 = arith.mulf %310, %314 : vector<8x128xf32>
    %317 = arith.addf %315, %316 : vector<8x128xf32>
    %318 = math.tanh %317 : vector<8x128xf32>
    %319 = arith.mulf %312, %318 : vector<8x128xf32>
    %320 = arith.truncf %319 : vector<8x128xf32> to vector<8x128xbf16>
    %c8_151 = arith.constant 8 : index
    %c0_152 = arith.constant 0 : index
    %321 = vector.load %arg16[%c8_151, %c0_152] : memref<64x512xf32, #tpu.memory_space<vmem>>, vector<8x512xf32>
    %c48_153 = arith.constant 48 : index
    %c0_154 = arith.constant 0 : index
    %322 = vector.load %arg16[%c48_153, %c0_154] : memref<64x512xf32, #tpu.memory_space<vmem>>, vector<8x512xf32>
    %323 = vector.shape_cast %18 : vector<1x512xi1> to vector<1x512xi1>
    %324 = vector.broadcast %323 : vector<1x512xi1> to vector<8x512xi1>
    %325 = arith.select %324, %322, %321 : vector<8x512xi1>, vector<8x512xf32>
    %c0_155 = arith.constant 0 : index
    %c0_156 = arith.constant 0 : index
    %326 = vector.load %arg6[%c0_155, %c0_156] : memref<128x512xbf16, #tpu.memory_space<vmem>>, vector<128x512xbf16>
    %cst_157 = arith.constant dense<0.000000e+00> : vector<8x512xf32>
    %327 = tpu.matmul %320, %326, %cst_157 {dimension_numbers = #tpu.dot_dimension_numbers<[1], [0], [0], [1], [0, 0, 1, 1], [], []>} : vector<8x128xbf16>, vector<128x512xbf16>, vector<8x512xf32> -> vector<8x512xf32>
    %328 = arith.addf %325, %327 : vector<8x512xf32>
    %329 = vector.extract_strided_slice %328 {offsets = [0, 0], sizes = [8, 384], strides = [1, 1]} : vector<8x512xf32> to vector<8x384xf32>
    %330 = arith.negf %329 : vector<8x384xf32>
    %331 = math.exp %330 : vector<8x384xf32>
    %cst_158 = arith.constant 1.000000e+00 : f32
    %332 = vector.broadcast %cst_158 : f32 to vector<8x384xf32>
    %333 = arith.addf %332, %331 : vector<8x384xf32>
    %334 = arith.divf %332, %333 : vector<8x384xf32>
    %335 = vector.extract_strided_slice %334 {offsets = [0, 0], sizes = [8, 128], strides = [1, 1]} : vector<8x384xf32> to vector<8x128xf32>
    %336 = vector.extract_strided_slice %334 {offsets = [0, 128], sizes = [8, 128], strides = [1, 1]} : vector<8x384xf32> to vector<8x128xf32>
    %337 = vector.extract_strided_slice %334 {offsets = [0, 256], sizes = [8, 128], strides = [1, 1]} : vector<8x384xf32> to vector<8x128xf32>
    %338 = vector.extract_strided_slice %328 {offsets = [0, 384], sizes = [8, 128], strides = [1, 1]} : vector<8x512xf32> to vector<8x128xf32>
    %339 = math.tanh %338 : vector<8x128xf32>
    %340 = arith.mulf %336, %317 : vector<8x128xf32>
    %341 = arith.mulf %335, %339 : vector<8x128xf32>
    %342 = arith.addf %340, %341 : vector<8x128xf32>
    %343 = math.tanh %342 : vector<8x128xf32>
    %344 = arith.mulf %337, %343 : vector<8x128xf32>
    %345 = arith.truncf %344 : vector<8x128xf32> to vector<8x128xbf16>
    %c16_159 = arith.constant 16 : index
    %c0_160 = arith.constant 0 : index
    %346 = vector.load %arg16[%c16_159, %c0_160] : memref<64x512xf32, #tpu.memory_space<vmem>>, vector<8x512xf32>
    %c40_161 = arith.constant 40 : index
    %c0_162 = arith.constant 0 : index
    %347 = vector.load %arg16[%c40_161, %c0_162] : memref<64x512xf32, #tpu.memory_space<vmem>>, vector<8x512xf32>
    %348 = vector.shape_cast %18 : vector<1x512xi1> to vector<1x512xi1>
    %349 = vector.broadcast %348 : vector<1x512xi1> to vector<8x512xi1>
    %350 = arith.select %349, %347, %346 : vector<8x512xi1>, vector<8x512xf32>
    %c0_163 = arith.constant 0 : index
    %c0_164 = arith.constant 0 : index
    %351 = vector.load %arg6[%c0_163, %c0_164] : memref<128x512xbf16, #tpu.memory_space<vmem>>, vector<128x512xbf16>
    %cst_165 = arith.constant dense<0.000000e+00> : vector<8x512xf32>
    %352 = tpu.matmul %345, %351, %cst_165 {dimension_numbers = #tpu.dot_dimension_numbers<[1], [0], [0], [1], [0, 0, 1, 1], [], []>} : vector<8x128xbf16>, vector<128x512xbf16>, vector<8x512xf32> -> vector<8x512xf32>
    %353 = arith.addf %350, %352 : vector<8x512xf32>
    %354 = vector.extract_strided_slice %353 {offsets = [0, 0], sizes = [8, 384], strides = [1, 1]} : vector<8x512xf32> to vector<8x384xf32>
    %355 = arith.negf %354 : vector<8x384xf32>
    %356 = math.exp %355 : vector<8x384xf32>
    %cst_166 = arith.constant 1.000000e+00 : f32
    %357 = vector.broadcast %cst_166 : f32 to vector<8x384xf32>
    %358 = arith.addf %357, %356 : vector<8x384xf32>
    %359 = arith.divf %357, %358 : vector<8x384xf32>
    %360 = vector.extract_strided_slice %359 {offsets = [0, 0], sizes = [8, 128], strides = [1, 1]} : vector<8x384xf32> to vector<8x128xf32>
    %361 = vector.extract_strided_slice %359 {offsets = [0, 128], sizes = [8, 128], strides = [1, 1]} : vector<8x384xf32> to vector<8x128xf32>
    %362 = vector.extract_strided_slice %359 {offsets = [0, 256], sizes = [8, 128], strides = [1, 1]} : vector<8x384xf32> to vector<8x128xf32>
    %363 = vector.extract_strided_slice %353 {offsets = [0, 384], sizes = [8, 128], strides = [1, 1]} : vector<8x512xf32> to vector<8x128xf32>
    %364 = math.tanh %363 : vector<8x128xf32>
    %365 = arith.mulf %361, %342 : vector<8x128xf32>
    %366 = arith.mulf %360, %364 : vector<8x128xf32>
    %367 = arith.addf %365, %366 : vector<8x128xf32>
    %368 = math.tanh %367 : vector<8x128xf32>
    %369 = arith.mulf %362, %368 : vector<8x128xf32>
    %370 = arith.truncf %369 : vector<8x128xf32> to vector<8x128xbf16>
    %c24_167 = arith.constant 24 : index
    %c0_168 = arith.constant 0 : index
    %371 = vector.load %arg16[%c24_167, %c0_168] : memref<64x512xf32, #tpu.memory_space<vmem>>, vector<8x512xf32>
    %c32_169 = arith.constant 32 : index
    %c0_170 = arith.constant 0 : index
    %372 = vector.load %arg16[%c32_169, %c0_170] : memref<64x512xf32, #tpu.memory_space<vmem>>, vector<8x512xf32>
    %373 = vector.shape_cast %18 : vector<1x512xi1> to vector<1x512xi1>
    %374 = vector.broadcast %373 : vector<1x512xi1> to vector<8x512xi1>
    %375 = arith.select %374, %372, %371 : vector<8x512xi1>, vector<8x512xf32>
    %c0_171 = arith.constant 0 : index
    %c0_172 = arith.constant 0 : index
    %376 = vector.load %arg6[%c0_171, %c0_172] : memref<128x512xbf16, #tpu.memory_space<vmem>>, vector<128x512xbf16>
    %cst_173 = arith.constant dense<0.000000e+00> : vector<8x512xf32>
    %377 = tpu.matmul %370, %376, %cst_173 {dimension_numbers = #tpu.dot_dimension_numbers<[1], [0], [0], [1], [0, 0, 1, 1], [], []>} : vector<8x128xbf16>, vector<128x512xbf16>, vector<8x512xf32> -> vector<8x512xf32>
    %378 = arith.addf %375, %377 : vector<8x512xf32>
    %379 = vector.extract_strided_slice %378 {offsets = [0, 0], sizes = [8, 384], strides = [1, 1]} : vector<8x512xf32> to vector<8x384xf32>
    %380 = arith.negf %379 : vector<8x384xf32>
    %381 = math.exp %380 : vector<8x384xf32>
    %cst_174 = arith.constant 1.000000e+00 : f32
    %382 = vector.broadcast %cst_174 : f32 to vector<8x384xf32>
    %383 = arith.addf %382, %381 : vector<8x384xf32>
    %384 = arith.divf %382, %383 : vector<8x384xf32>
    %385 = vector.extract_strided_slice %384 {offsets = [0, 0], sizes = [8, 128], strides = [1, 1]} : vector<8x384xf32> to vector<8x128xf32>
    %386 = vector.extract_strided_slice %384 {offsets = [0, 128], sizes = [8, 128], strides = [1, 1]} : vector<8x384xf32> to vector<8x128xf32>
    %387 = vector.extract_strided_slice %384 {offsets = [0, 256], sizes = [8, 128], strides = [1, 1]} : vector<8x384xf32> to vector<8x128xf32>
    %388 = vector.extract_strided_slice %378 {offsets = [0, 384], sizes = [8, 128], strides = [1, 1]} : vector<8x512xf32> to vector<8x128xf32>
    %389 = math.tanh %388 : vector<8x128xf32>
    %390 = arith.mulf %386, %367 : vector<8x128xf32>
    %391 = arith.mulf %385, %389 : vector<8x128xf32>
    %392 = arith.addf %390, %391 : vector<8x128xf32>
    %393 = math.tanh %392 : vector<8x128xf32>
    %394 = arith.mulf %387, %393 : vector<8x128xf32>
    %395 = arith.truncf %394 : vector<8x128xf32> to vector<8x128xbf16>
    %c32_175 = arith.constant 32 : index
    %c0_176 = arith.constant 0 : index
    %396 = vector.load %arg16[%c32_175, %c0_176] : memref<64x512xf32, #tpu.memory_space<vmem>>, vector<8x512xf32>
    %c24_177 = arith.constant 24 : index
    %c0_178 = arith.constant 0 : index
    %397 = vector.load %arg16[%c24_177, %c0_178] : memref<64x512xf32, #tpu.memory_space<vmem>>, vector<8x512xf32>
    %398 = vector.shape_cast %18 : vector<1x512xi1> to vector<1x512xi1>
    %399 = vector.broadcast %398 : vector<1x512xi1> to vector<8x512xi1>
    %400 = arith.select %399, %397, %396 : vector<8x512xi1>, vector<8x512xf32>
    %c0_179 = arith.constant 0 : index
    %c0_180 = arith.constant 0 : index
    %401 = vector.load %arg6[%c0_179, %c0_180] : memref<128x512xbf16, #tpu.memory_space<vmem>>, vector<128x512xbf16>
    %cst_181 = arith.constant dense<0.000000e+00> : vector<8x512xf32>
    %402 = tpu.matmul %395, %401, %cst_181 {dimension_numbers = #tpu.dot_dimension_numbers<[1], [0], [0], [1], [0, 0, 1, 1], [], []>} : vector<8x128xbf16>, vector<128x512xbf16>, vector<8x512xf32> -> vector<8x512xf32>
    %403 = arith.addf %400, %402 : vector<8x512xf32>
    %404 = vector.extract_strided_slice %403 {offsets = [0, 0], sizes = [8, 384], strides = [1, 1]} : vector<8x512xf32> to vector<8x384xf32>
    %405 = arith.negf %404 : vector<8x384xf32>
    %406 = math.exp %405 : vector<8x384xf32>
    %cst_182 = arith.constant 1.000000e+00 : f32
    %407 = vector.broadcast %cst_182 : f32 to vector<8x384xf32>
    %408 = arith.addf %407, %406 : vector<8x384xf32>
    %409 = arith.divf %407, %408 : vector<8x384xf32>
    %410 = vector.extract_strided_slice %409 {offsets = [0, 0], sizes = [8, 128], strides = [1, 1]} : vector<8x384xf32> to vector<8x128xf32>
    %411 = vector.extract_strided_slice %409 {offsets = [0, 128], sizes = [8, 128], strides = [1, 1]} : vector<8x384xf32> to vector<8x128xf32>
    %412 = vector.extract_strided_slice %409 {offsets = [0, 256], sizes = [8, 128], strides = [1, 1]} : vector<8x384xf32> to vector<8x128xf32>
    %413 = vector.extract_strided_slice %403 {offsets = [0, 384], sizes = [8, 128], strides = [1, 1]} : vector<8x512xf32> to vector<8x128xf32>
    %414 = math.tanh %413 : vector<8x128xf32>
    %415 = arith.mulf %411, %392 : vector<8x128xf32>
    %416 = arith.mulf %410, %414 : vector<8x128xf32>
    %417 = arith.addf %415, %416 : vector<8x128xf32>
    %418 = math.tanh %417 : vector<8x128xf32>
    %419 = arith.mulf %412, %418 : vector<8x128xf32>
    %420 = arith.truncf %419 : vector<8x128xf32> to vector<8x128xbf16>
    %c40_183 = arith.constant 40 : index
    %c0_184 = arith.constant 0 : index
    %421 = vector.load %arg16[%c40_183, %c0_184] : memref<64x512xf32, #tpu.memory_space<vmem>>, vector<8x512xf32>
    %c16_185 = arith.constant 16 : index
    %c0_186 = arith.constant 0 : index
    %422 = vector.load %arg16[%c16_185, %c0_186] : memref<64x512xf32, #tpu.memory_space<vmem>>, vector<8x512xf32>
    %423 = vector.shape_cast %18 : vector<1x512xi1> to vector<1x512xi1>
    %424 = vector.broadcast %423 : vector<1x512xi1> to vector<8x512xi1>
    %425 = arith.select %424, %422, %421 : vector<8x512xi1>, vector<8x512xf32>
    %c0_187 = arith.constant 0 : index
    %c0_188 = arith.constant 0 : index
    %426 = vector.load %arg6[%c0_187, %c0_188] : memref<128x512xbf16, #tpu.memory_space<vmem>>, vector<128x512xbf16>
    %cst_189 = arith.constant dense<0.000000e+00> : vector<8x512xf32>
    %427 = tpu.matmul %420, %426, %cst_189 {dimension_numbers = #tpu.dot_dimension_numbers<[1], [0], [0], [1], [0, 0, 1, 1], [], []>} : vector<8x128xbf16>, vector<128x512xbf16>, vector<8x512xf32> -> vector<8x512xf32>
    %428 = arith.addf %425, %427 : vector<8x512xf32>
    %429 = vector.extract_strided_slice %428 {offsets = [0, 0], sizes = [8, 384], strides = [1, 1]} : vector<8x512xf32> to vector<8x384xf32>
    %430 = arith.negf %429 : vector<8x384xf32>
    %431 = math.exp %430 : vector<8x384xf32>
    %cst_190 = arith.constant 1.000000e+00 : f32
    %432 = vector.broadcast %cst_190 : f32 to vector<8x384xf32>
    %433 = arith.addf %432, %431 : vector<8x384xf32>
    %434 = arith.divf %432, %433 : vector<8x384xf32>
    %435 = vector.extract_strided_slice %434 {offsets = [0, 0], sizes = [8, 128], strides = [1, 1]} : vector<8x384xf32> to vector<8x128xf32>
    %436 = vector.extract_strided_slice %434 {offsets = [0, 128], sizes = [8, 128], strides = [1, 1]} : vector<8x384xf32> to vector<8x128xf32>
    %437 = vector.extract_strided_slice %434 {offsets = [0, 256], sizes = [8, 128], strides = [1, 1]} : vector<8x384xf32> to vector<8x128xf32>
    %438 = vector.extract_strided_slice %428 {offsets = [0, 384], sizes = [8, 128], strides = [1, 1]} : vector<8x512xf32> to vector<8x128xf32>
    %439 = math.tanh %438 : vector<8x128xf32>
    %440 = arith.mulf %436, %417 : vector<8x128xf32>
    %441 = arith.mulf %435, %439 : vector<8x128xf32>
    %442 = arith.addf %440, %441 : vector<8x128xf32>
    %443 = math.tanh %442 : vector<8x128xf32>
    %444 = arith.mulf %437, %443 : vector<8x128xf32>
    %445 = arith.truncf %444 : vector<8x128xf32> to vector<8x128xbf16>
    %c48_191 = arith.constant 48 : index
    %c0_192 = arith.constant 0 : index
    %446 = vector.load %arg16[%c48_191, %c0_192] : memref<64x512xf32, #tpu.memory_space<vmem>>, vector<8x512xf32>
    %c8_193 = arith.constant 8 : index
    %c0_194 = arith.constant 0 : index
    %447 = vector.load %arg16[%c8_193, %c0_194] : memref<64x512xf32, #tpu.memory_space<vmem>>, vector<8x512xf32>
    %448 = vector.shape_cast %18 : vector<1x512xi1> to vector<1x512xi1>
    %449 = vector.broadcast %448 : vector<1x512xi1> to vector<8x512xi1>
    %450 = arith.select %449, %447, %446 : vector<8x512xi1>, vector<8x512xf32>
    %c0_195 = arith.constant 0 : index
    %c0_196 = arith.constant 0 : index
    %451 = vector.load %arg6[%c0_195, %c0_196] : memref<128x512xbf16, #tpu.memory_space<vmem>>, vector<128x512xbf16>
    %cst_197 = arith.constant dense<0.000000e+00> : vector<8x512xf32>
    %452 = tpu.matmul %445, %451, %cst_197 {dimension_numbers = #tpu.dot_dimension_numbers<[1], [0], [0], [1], [0, 0, 1, 1], [], []>} : vector<8x128xbf16>, vector<128x512xbf16>, vector<8x512xf32> -> vector<8x512xf32>
    %453 = arith.addf %450, %452 : vector<8x512xf32>
    %454 = vector.extract_strided_slice %453 {offsets = [0, 0], sizes = [8, 384], strides = [1, 1]} : vector<8x512xf32> to vector<8x384xf32>
    %455 = arith.negf %454 : vector<8x384xf32>
    %456 = math.exp %455 : vector<8x384xf32>
    %cst_198 = arith.constant 1.000000e+00 : f32
    %457 = vector.broadcast %cst_198 : f32 to vector<8x384xf32>
    %458 = arith.addf %457, %456 : vector<8x384xf32>
    %459 = arith.divf %457, %458 : vector<8x384xf32>
    %460 = vector.extract_strided_slice %459 {offsets = [0, 0], sizes = [8, 128], strides = [1, 1]} : vector<8x384xf32> to vector<8x128xf32>
    %461 = vector.extract_strided_slice %459 {offsets = [0, 128], sizes = [8, 128], strides = [1, 1]} : vector<8x384xf32> to vector<8x128xf32>
    %462 = vector.extract_strided_slice %459 {offsets = [0, 256], sizes = [8, 128], strides = [1, 1]} : vector<8x384xf32> to vector<8x128xf32>
    %463 = vector.extract_strided_slice %453 {offsets = [0, 384], sizes = [8, 128], strides = [1, 1]} : vector<8x512xf32> to vector<8x128xf32>
    %464 = math.tanh %463 : vector<8x128xf32>
    %465 = arith.mulf %461, %442 : vector<8x128xf32>
    %466 = arith.mulf %460, %464 : vector<8x128xf32>
    %467 = arith.addf %465, %466 : vector<8x128xf32>
    %468 = math.tanh %467 : vector<8x128xf32>
    %469 = arith.mulf %462, %468 : vector<8x128xf32>
    %470 = arith.truncf %469 : vector<8x128xf32> to vector<8x128xbf16>
    %c56_199 = arith.constant 56 : index
    %c0_200 = arith.constant 0 : index
    %471 = vector.load %arg16[%c56_199, %c0_200] : memref<64x512xf32, #tpu.memory_space<vmem>>, vector<8x512xf32>
    %c0_201 = arith.constant 0 : index
    %c0_202 = arith.constant 0 : index
    %472 = vector.load %arg16[%c0_201, %c0_202] : memref<64x512xf32, #tpu.memory_space<vmem>>, vector<8x512xf32>
    %473 = vector.shape_cast %18 : vector<1x512xi1> to vector<1x512xi1>
    %474 = vector.broadcast %473 : vector<1x512xi1> to vector<8x512xi1>
    %475 = arith.select %474, %472, %471 : vector<8x512xi1>, vector<8x512xf32>
    %c0_203 = arith.constant 0 : index
    %c0_204 = arith.constant 0 : index
    %476 = vector.load %arg6[%c0_203, %c0_204] : memref<128x512xbf16, #tpu.memory_space<vmem>>, vector<128x512xbf16>
    %cst_205 = arith.constant dense<0.000000e+00> : vector<8x512xf32>
    %477 = tpu.matmul %470, %476, %cst_205 {dimension_numbers = #tpu.dot_dimension_numbers<[1], [0], [0], [1], [0, 0, 1, 1], [], []>} : vector<8x128xbf16>, vector<128x512xbf16>, vector<8x512xf32> -> vector<8x512xf32>
    %478 = arith.addf %475, %477 : vector<8x512xf32>
    %479 = vector.extract_strided_slice %478 {offsets = [0, 0], sizes = [8, 384], strides = [1, 1]} : vector<8x512xf32> to vector<8x384xf32>
    %480 = arith.negf %479 : vector<8x384xf32>
    %481 = math.exp %480 : vector<8x384xf32>
    %cst_206 = arith.constant 1.000000e+00 : f32
    %482 = vector.broadcast %cst_206 : f32 to vector<8x384xf32>
    %483 = arith.addf %482, %481 : vector<8x384xf32>
    %484 = arith.divf %482, %483 : vector<8x384xf32>
    %485 = vector.extract_strided_slice %484 {offsets = [0, 0], sizes = [8, 128], strides = [1, 1]} : vector<8x384xf32> to vector<8x128xf32>
    %486 = vector.extract_strided_slice %484 {offsets = [0, 128], sizes = [8, 128], strides = [1, 1]} : vector<8x384xf32> to vector<8x128xf32>
    %487 = vector.extract_strided_slice %484 {offsets = [0, 256], sizes = [8, 128], strides = [1, 1]} : vector<8x384xf32> to vector<8x128xf32>
    %488 = vector.extract_strided_slice %478 {offsets = [0, 384], sizes = [8, 128], strides = [1, 1]} : vector<8x512xf32> to vector<8x128xf32>
    %489 = math.tanh %488 : vector<8x128xf32>
    %490 = arith.mulf %486, %467 : vector<8x128xf32>
    %491 = arith.mulf %485, %489 : vector<8x128xf32>
    %492 = arith.addf %490, %491 : vector<8x128xf32>
    %493 = math.tanh %492 : vector<8x128xf32>
    %494 = arith.mulf %487, %493 : vector<8x128xf32>
    %495 = arith.truncf %494 : vector<8x128xf32> to vector<8x128xbf16>
    %c0_207 = arith.constant 0 : index
    %c128_208 = arith.constant 128 : index
    %496 = vector.load %arg18[%c0_207, %c128_208] : memref<8x256xbf16, #tpu.memory_space<vmem>>, vector<8x128xbf16>
    tpu.vector_store %arg18[%c0_207, %c128_208], %495 {strides = array<i32>} : memref<8x256xbf16, #tpu.memory_space<vmem>>, vector<8x128xbf16>,
    %c0_209 = arith.constant 0 : index
    %c0_210 = arith.constant 0 : index
    %497 = vector.load %arg18[%c0_209, %c0_210] : memref<8x256xbf16, #tpu.memory_space<vmem>>, vector<8x256xbf16>
    %c0_211 = arith.constant 0 : index
    %c0_212 = arith.constant 0 : index
    %498 = vector.load %arg8[%c0_211, %c0_212] : memref<256x128xbf16, #tpu.memory_space<vmem>>, vector<256x128xbf16>
    %cst_213 = arith.constant dense<0.000000e+00> : vector<8x128xf32>
    %499 = tpu.matmul %497, %498, %cst_213 {dimension_numbers = #tpu.dot_dimension_numbers<[1], [0], [0], [1], [0, 0, 1, 1], [], []>} : vector<8x256xbf16>, vector<256x128xbf16>, vector<8x128xf32> -> vector<8x128xf32>
    %c0_214 = arith.constant 0 : index
    %c0_215 = arith.constant 0 : index
    %500 = vector.load %arg9[%c0_214, %c0_215] : memref<1x128xf32, #tpu.memory_space<vmem>>, vector<1x128xf32>
    %501 = vector.broadcast %500 : vector<1x128xf32> to vector<8x128xf32>
    %502 = arith.addf %499, %501 : vector<8x128xf32>
    %503 = arith.truncf %502 : vector<8x128xf32> to vector<8x128xbf16>
    %c0_216 = arith.constant 0 : index
    %c0_217 = arith.constant 0 : index
    %504 = vector.load %arg10[%c0_216, %c0_217] : memref<128x128xbf16, #tpu.memory_space<vmem>>, vector<128x128xbf16>
    %cst_218 = arith.constant dense<0.000000e+00> : vector<8x128xf32>
    %505 = tpu.matmul %503, %504, %cst_218 {dimension_numbers = #tpu.dot_dimension_numbers<[1], [0], [0], [1], [0, 0, 1, 1], [], []>} : vector<8x128xbf16>, vector<128x128xbf16>, vector<8x128xf32> -> vector<8x128xf32>
    %c0_219 = arith.constant 0 : index
    %c0_220 = arith.constant 0 : index
    %506 = vector.load %arg11[%c0_219, %c0_220] : memref<1x128xf32, #tpu.memory_space<vmem>>, vector<1x128xf32>
    %507 = vector.broadcast %506 : vector<1x128xf32> to vector<8x128xf32>
    %508 = arith.addf %505, %507 : vector<8x128xf32>
    %cst_221 = arith.constant 0.000000e+00 : f32
    %509 = vector.broadcast %cst_221 : f32 to vector<8x128xf32>
    %510 = arith.cmpf ogt, %508, %509 : vector<8x128xf32>
    %cst_222 = arith.constant 0.000000e+00 : f32
    %511 = vector.broadcast %cst_222 : f32 to vector<8x128xf32>
    %512 = arith.minimumf %508, %511 : vector<8x128xf32>
    %513 = math.exp %512 : vector<8x128xf32>
    %cst_223 = arith.constant 1.000000e+00 : f32
    %514 = vector.broadcast %cst_223 : f32 to vector<8x128xf32>
    %515 = arith.subf %513, %514 : vector<8x128xf32>
    %516 = arith.select %510, %508, %515 : vector<8x128xi1>, vector<8x128xf32>
    %517 = arith.truncf %516 : vector<8x128xf32> to vector<8x128xbf16>
    %c0_224 = arith.constant 0 : index
    %c0_225 = arith.constant 0 : index
    %518 = vector.load %arg12[%c0_224, %c0_225] : memref<128x128xbf16, #tpu.memory_space<vmem>>, vector<128x128xbf16>
    %cst_226 = arith.constant dense<0.000000e+00> : vector<8x128xf32>
    %519 = tpu.matmul %517, %518, %cst_226 {dimension_numbers = #tpu.dot_dimension_numbers<[1], [0], [0], [1], [0, 0, 1, 1], [], []>} : vector<8x128xbf16>, vector<128x128xbf16>, vector<8x128xf32> -> vector<8x128xf32>
    %c0_227 = arith.constant 0 : index
    %c0_228 = arith.constant 0 : index
    %520 = vector.load %arg13[%c0_227, %c0_228] : memref<1x128xf32, #tpu.memory_space<vmem>>, vector<1x128xf32>
    %521 = vector.broadcast %520 : vector<1x128xf32> to vector<8x128xf32>
    %522 = arith.addf %519, %521 : vector<8x128xf32>
    %c0_229 = arith.constant 0 : index
    %c0_230 = arith.constant 0 : index
    %523 = vector.load %arg14[%c0_229, %c0_230] : memref<8x128xf32, #tpu.memory_space<vmem>>, vector<8x128xf32>
    tpu.vector_store %arg14[%c0_229, %c0_230], %522 {strides = array<i32>} : memref<8x128xf32, #tpu.memory_space<vmem>>, vector<8x128xf32>,
    return
  }
  func.func @transform_0(%arg0: i32) -> (i32, i32) {
    %c0_i32 = arith.constant 0 : i32
    %c0_i32_0 = arith.constant 0 : i32
    return %arg0, %c0_i32 : i32, i32
  }
  func.func @transform_1(%arg0: i32) -> (i32, i32) {
    %c0_i32 = arith.constant 0 : i32
    %c0_i32_0 = arith.constant 0 : i32
    %c0_i32_1 = arith.constant 0 : i32
    return %c0_i32, %c0_i32_0 : i32, i32
  }
  func.func @transform_2(%arg0: i32) -> (i32, i32) {
    %c0_i32 = arith.constant 0 : i32
    %c0_i32_0 = arith.constant 0 : i32
    %c0_i32_1 = arith.constant 0 : i32
    return %c0_i32, %c0_i32_0 : i32, i32
  }
  func.func @transform_3(%arg0: i32) -> (i32, i32) {
    %c0_i32 = arith.constant 0 : i32
    %c0_i32_0 = arith.constant 0 : i32
    %c0_i32_1 = arith.constant 0 : i32
    return %c0_i32, %c0_i32_0 : i32, i32
  }
  func.func @transform_4(%arg0: i32) -> (i32, i32) {
    %c0_i32 = arith.constant 0 : i32
    %c0_i32_0 = arith.constant 0 : i32
    %c0_i32_1 = arith.constant 0 : i32
    return %c0_i32, %c0_i32_0 : i32, i32
  }
  func.func @transform_5(%arg0: i32) -> (i32, i32) {
    %c0_i32 = arith.constant 0 : i32
    %c0_i32_0 = arith.constant 0 : i32
    %c0_i32_1 = arith.constant 0 : i32
    return %c0_i32, %c0_i32_0 : i32, i32
  }
  func.func @transform_6(%arg0: i32) -> (i32, i32) {
    %c0_i32 = arith.constant 0 : i32
    %c0_i32_0 = arith.constant 0 : i32
    %c0_i32_1 = arith.constant 0 : i32
    return %c0_i32, %c0_i32_0 : i32, i32
  }
  func.func @transform_7(%arg0: i32) -> (i32, i32) {
    %c0_i32 = arith.constant 0 : i32
    %c0_i32_0 = arith.constant 0 : i32
    %c0_i32_1 = arith.constant 0 : i32
    return %c0_i32, %c0_i32_0 : i32, i32
  }
  func.func @transform_8(%arg0: i32) -> (i32, i32) {
    %c0_i32 = arith.constant 0 : i32
    %c0_i32_0 = arith.constant 0 : i32
    %c0_i32_1 = arith.constant 0 : i32
    return %c0_i32, %c0_i32_0 : i32, i32
  }
  func.func @transform_9(%arg0: i32) -> (i32, i32) {
    %c0_i32 = arith.constant 0 : i32
    %c0_i32_0 = arith.constant 0 : i32
    %c0_i32_1 = arith.constant 0 : i32
    return %c0_i32, %c0_i32_0 : i32, i32
  }
  func.func @transform_10(%arg0: i32) -> (i32, i32) {
    %c0_i32 = arith.constant 0 : i32
    %c0_i32_0 = arith.constant 0 : i32
    %c0_i32_1 = arith.constant 0 : i32
    return %c0_i32, %c0_i32_0 : i32, i32
  }
  func.func @transform_11(%arg0: i32) -> (i32, i32) {
    %c0_i32 = arith.constant 0 : i32
    %c0_i32_0 = arith.constant 0 : i32
    %c0_i32_1 = arith.constant 0 : i32
    return %c0_i32, %c0_i32_0 : i32, i32
  }
  func.func @transform_12(%arg0: i32) -> (i32, i32) {
    %c0_i32 = arith.constant 0 : i32
    %c0_i32_0 = arith.constant 0 : i32
    %c0_i32_1 = arith.constant 0 : i32
    return %c0_i32, %c0_i32_0 : i32, i32
  }
  func.func @transform_13(%arg0: i32) -> (i32, i32) {
    %c0_i32 = arith.constant 0 : i32
    %c0_i32_0 = arith.constant 0 : i32
    return %arg0, %c0_i32 : i32, i32
  }
}

</mosaic_0001>

<bundles_post_ra>
// kernel: tpu_custom_call.1
= control target key start
LH: loop header
LB: loop body
LE: loop exit
PB: predicated region body
PF: predicated region fallthrough
CT: control target
= control target key end

     0   :  { %18 = vsyncpa [#allocation7], 0  ;;  %s8202_s0 = inlined_call_operand.hbm [shape: f32[8,256], index: 0, kind: input, shape index: {}]   ;;  %s8203_s1 = inlined_call_operand.hbm [shape: bf16[32,512], index: 1, kind: input, shape index: {}]   ;;  %s8204_s2 = inlined_call_operand.hbm [shape: bf16[128,512], index: 2, kind: input, shape index: {}]   ;;  %s8205_s3 = inlined_call_operand.vmem [shape: f32[1,512], index: 3, kind: input, shape index: {}]   ;;  %s8206_s4 = inlined_call_operand.hbm [shape: bf16[128,512], index: 4, kind: input, shape index: {}]   ;;  %s8207_s5 = inlined_call_operand.hbm [shape: bf16[128,512], index: 5, kind: input, shape index: {}]   ;;  %s8208_s6 = inlined_call_operand.vmem [shape: f32[1,512], index: 6, kind: input, shape index: {}]   ;;  %s8209_s7 = inlined_call_operand.hbm [shape: bf16[256,128], index: 7, kind: input, shape index: {}]   ;;  %s8210_s8 = inlined_call_operand.vmem [shape: f32[1,128], index: 8, kind: input, shape index: {}]   ;;  %s8211_s9 = inlined_call_operand.hbm [shape: bf16[128,128], index: 9, kind: input, shape index: {}]   ;;  %s8212_s10 = inlined_call_operand.vmem [shape: f32[1,128], index: 10, kind: input, shape index: {}]   ;;  %s8213_s11 = inlined_call_operand.hbm [shape: bf16[128,128], index: 11, kind: input, shape index: {}]   ;;  %s8214_s12 = inlined_call_operand.vmem [shape: f32[1,128], index: 12, kind: input, shape index: {}]   ;;  %s8215_s13 = inlined_call_operand.hbm [shape: f32[8,128], index: 13, kind: output, shape index: {}]  }
   0x1   :  { %19 = vsyncpa [#allocation10], 0 }
   0x2   :  { %20 = vsyncpa [#allocation13], 0 }
   0x3   :  { %21 = vsyncpa [#allocation16], 0 }
   0x4   :  { %22 = vsyncpa [#allocation19], 0 }
   0x5   :  { %23 = vsyncpa [#allocation8], 0  ;;  %s6403_s25 = smov [#allocation9]  }
   0x6   :  { %s39_s26 = sshll.u32 %s6403_s25, 4  ;;  %s40_s26 = int_to_ptr.vmem [resolvable:$true] %s39_s26 }
   0x7   :  { %s6219_s27 = scalar_lea.vmem %s40_s26, 1024  ;;  %p6224_p1 = scmp.lt.s32.totalorder %s40_s26, %s40_s26 }
   0x8   :  { %p6220_p0 = scmp.ne.s32.totalorder %s40_s26, %s6219_s27  ;;  %p6225_p2 = scmp.lt.s32.totalorder %s6219_s27, %s6219_s27 }
   0xa   :  { %p6226_p3 = por %p6225_p2, %p6224_p1 }
   0xc   :  { %p6227_p4 = pnand %p6226_p3, %p6220_p0 }
   0xe   :  { %6230 = shalt.err (!%p6227_p4)
}
   0xf   :  { %s6404_s28 = smov 256   ;;  %s6405_s29 = smov 16  }
  0x10   :  { %45 = dma.hbm_to_vmem [thread:$0]  %s8203_s1, 1024, %s40_s26, [#allocation10], %s6404_s28, %s6404_s28, %s6405_s29  }
  0x11   :  { %s6406_s15 = smov [#allocation12]   ;;  %s6407_s17 = smov [#allocation15]  }
  0x12   :  { %s65_s16 = sshll.u32 %s6406_s15, 4  ;;  %s91_s18 = sshll.u32 %s6407_s17, 4  ;;  %s66_s16 = int_to_ptr.vmem [resolvable:$true] %s65_s16  ;;  %s92_s18 = int_to_ptr.vmem [resolvable:$true] %s91_s18 }
  0x13   :  { %s6239_s19 = scalar_lea.vmem %s66_s16, 4096  ;;  %p6244_p6 = scmp.lt.s32.totalorder %s66_s16, %s66_s16 }
  0x14   :  { %p6240_p5 = scmp.ne.s32.totalorder %s66_s16, %s6239_s19  ;;  %p6245_p7 = scmp.lt.s32.totalorder %s6239_s19, %s6239_s19 }
  0x16   :  { %p6246_p8 = por %p6245_p7, %p6244_p6 }
  0x18   :  { %p6247_p9 = pnand %p6246_p8, %p6240_p5 }
  0x1a   :  { %6250 = shalt.err (!%p6247_p9)
}
  0x1b   :  { %71 = dma.hbm_to_vmem [thread:$0]  %s8206_s4, 4096, %s66_s16, [#allocation13], %s6404_s28, %s6404_s28, %s6405_s29  }
  0x1c   :  { %s6259_s1 = scalar_lea.vmem %s92_s18, 2048  ;;  %p6264_p11 = scmp.lt.s32.totalorder %s92_s18, %s92_s18 }
  0x1d   :  { %p6260_p10 = scmp.ne.s32.totalorder %s92_s18, %s6259_s1  ;;  %p6265_p12 = scmp.lt.s32.totalorder %s6259_s1, %s6259_s1 }
  0x1f   :  { %p6266_p13 = por %p6265_p12, %p6264_p11 }
  0x21   :  { %p6267_p0 = pnand %p6266_p13, %p6260_p10 }
  0x23   :  { %6270 = shalt.err (!%p6267_p0)
}
  0x24   :  { %s6408_s22 = smov 64   ;;  %s6409_s23 = smov 4  }
  0x25   :  { %97 = dma.hbm_to_vmem [thread:$0]  %s8209_s7, 2048, %s92_s18, [#allocation16], %s6408_s22, %s6408_s22, %s6409_s23  }
  0x26   :  { %s6410_s26 = smov [#allocation6]   ;;  %s6411_s4 = smov [#allocation11]  }
  0x27   :  { %s30_s27 = sshll.u32 %s6410_s26, 4  ;;  %s51_s30 = sshll.u32 %s6411_s4, 4  ;;  %s31_s27 = int_to_ptr.vmem [resolvable:$true] %s30_s27  ;;  %s52_s30 = int_to_ptr.vmem [resolvable:$true] %s51_s30 }
  0x28   :  { %s6279_s14 = scalar_lea.vmem %s31_s27, 256  ;;  %p6284_p2 = scmp.lt.s32.totalorder %s31_s27, %s31_s27 }
  0x29   :  { %p6280_p1 = scmp.ne.s32.totalorder %s31_s27, %s6279_s14  ;;  %p6285_p3 = scmp.lt.s32.totalorder %s6279_s14, %s6279_s14 }
  0x2b   :  { %p6286_p4 = por %p6285_p3, %p6284_p2 }
  0x2d   :  { %p6287_p5 = pnand %p6286_p4, %p6280_p1 }
  0x2f   :  { %6290 = shalt.err (!%p6287_p5)
}
  0x30   :  { %33 = dma.hbm_to_vmem [thread:$0]  %s8202_s0, 256, %s31_s27, [#allocation7]  }
  0x31   :  { %s6299_s17 = scalar_lea.vmem %s52_s30, 4096  ;;  %p6304_p7 = scmp.lt.s32.totalorder %s52_s30, %s52_s30 }
  0x32   :  { %p6300_p6 = scmp.ne.s32.totalorder %s52_s30, %s6299_s17  ;;  %p6305_p8 = scmp.lt.s32.totalorder %s6299_s17, %s6299_s17 }
  0x34   :  { %p6306_p9 = por %p6305_p8, %p6304_p7 }
  0x36   :  { %p6307_p10 = pnand %p6306_p9, %p6300_p6 }
  0x38   :  { %6310 = shalt.err (!%p6307_p10)
}
  0x39   :  { %57 = dma.hbm_to_vmem [thread:$0]  %s8204_s2, 4096, %s52_s30, [#allocation10], %s6404_s28, %s6404_s28, %s6405_s29  }
  0x3a   :  { %s6412_s19 = smov [#allocation14]   ;;  %s6413_s21 = smov [#allocation17]  }
  0x3b   :  { %s77_s20 = sshll.u32 %s6412_s19, 4  ;;  %s105_s0 = sshll.u32 %s6413_s21, 4  ;;  %s78_s20 = int_to_ptr.vmem [resolvable:$true] %s77_s20  ;;  %s106_s0 = int_to_ptr.vmem [resolvable:$true] %s105_s0 }
  0x3c   :  { %s6319_s1 = scalar_lea.vmem %s78_s20, 4096  ;;  %p6324_p12 = scmp.lt.s32.totalorder %s78_s20, %s78_s20 }
  0x3d   :  { %p6320_p11 = scmp.ne.s32.totalorder %s78_s20, %s6319_s1  ;;  %p6325_p13 = scmp.lt.s32.totalorder %s6319_s1, %s6319_s1 }
  0x3f   :  { %p6326_p0 = por %p6325_p13, %p6324_p12 }
  0x41   :  { %p6327_p1 = pnand %p6326_p0, %p6320_p11 }
  0x43   :  { %6330 = shalt.err (!%p6327_p1)
}
  0x44   :  { %83 = dma.hbm_to_vmem [thread:$0]  %s8207_s5, 4096, %s78_s20, [#allocation13], %s6404_s28, %s6404_s28, %s6405_s29  }
  0x45   :  { %s6339_s2 = scalar_lea.vmem %s106_s0, 1024  ;;  %p6344_p3 = scmp.lt.s32.totalorder %s106_s0, %s106_s0 }
  0x46   :  { %p6340_p2 = scmp.ne.s32.totalorder %s106_s0, %s6339_s2  ;;  %p6345_p4 = scmp.lt.s32.totalorder %s6339_s2, %s6339_s2 }
  0x48   :  { %p6346_p5 = por %p6345_p4, %p6344_p3 }
  0x4a   :  { %p6347_p6 = pnand %p6346_p5, %p6340_p2 }
  0x4c   :  { %6350 = shalt.err (!%p6347_p6)
}
  0x4d   :  { %111 = dma.hbm_to_vmem [thread:$0]  %s8211_s9, 1024, %s106_s0, [#allocation16], %s6408_s22, %s6408_s22, %s6409_s23  }
  0x4e   :  { %s6414_s4 = smov [#allocation18]  }
  0x4f   :  { %s119_s30 = sshll.u32 %s6414_s4, 4  ;;  %s120_s30 = int_to_ptr.vmem [resolvable:$true] %s119_s30 }
  0x50   :  { %s6359_s14 = scalar_lea.vmem %s120_s30, 1024  ;;  %p6364_p8 = scmp.lt.s32.totalorder %s120_s30, %s120_s30 }
  0x51   :  { %p6360_p7 = scmp.ne.s32.totalorder %s120_s30, %s6359_s14  ;;  %p6365_p9 = scmp.lt.s32.totalorder %s6359_s14, %s6359_s14 }
  0x53   :  { %p6366_p10 = por %p6365_p9, %p6364_p8 }
  0x55   :  { %p6367_p11 = pnand %p6366_p10, %p6360_p7 }
  0x57   :  { %6370 = shalt.err (!%p6367_p11)
}
  0x58   :  { %125 = dma.hbm_to_vmem [thread:$0]  %s8213_s11, 1024, %s120_s30, [#allocation19], %s6408_s22, %s6408_s22, %s6409_s23  }
  0x59   :  { %6391 = dma.done.wait [#allocation7], 256  }
  0x5a   :  { %6392 = vsyncadd [#allocation7], 4294967040 }
  0x5b   :  { %6393 = dma.done.wait [#allocation10], 5120  }
  0x5c   :  { %6394 = vsyncadd [#allocation10], 4294962176 }
  0x5d   :  { %6395 = dma.done.wait [#allocation13], 8192  }
  0x5e   :  { %6396 = vsyncadd [#allocation13], 4294959104 }
  0x5f   :  { %6397 = dma.done.wait [#allocation16], 3072  }
  0x60   :  { %6398 = vsyncadd [#allocation16], 4294964224 }
  0x61   :  { %6399 = dma.done.wait [#allocation19], 1024  }
  0x62   :  { %6400 = vsyncadd [#allocation19], 4294966272  ;;  %v8220_v0 = vmov 0   ;;  %v222_v1 = vld [vmem:[#allocation6] sm:$0xff]  ;;  %v252_v2 = vld [vmem:[#allocation6 + $0x8] sm:$0xff]  ;;  %vm220_vm0 = vcmask 257024   ;;  %v153_v55 = vlaneseq }
  0x63   :  { %422 = vmatprep.mubr.bf16.mxu0 %v8220_v0  ;;  %210 = vst [vmem:[#allocation4] sm:$0xf] %v8220_v0  ;;  %211 = vst [vmem:[#allocation4 + $0x4] sm:$0xf] %v8220_v0  ;;  %495 = vmatprep.mubr.bf16.mxu1 %v8220_v0  ;;  %v5553_v3 = vpack.c.bf16 %v222_v1, %v222_v1  ;;  %v5556_v4 = vpack.c.bf16 %v252_v2, %v252_v2  ;;  %v5657_v5 = vld [vmem:[#allocation9 + $0x24] ss:$16 sps:$4 sm:$0xff]  }
  0x64   :  { %212 = vst [vmem:[#allocation4 + $0x8] sm:$0xf] %v8220_v0  ;;  %213 = vst [vmem:[#allocation4 + $0xc] sm:$0xf] %v8220_v0  ;;  %v5659_v6 = vld [vmem:[#allocation9 + $0x20] ss:$16 sps:$4 sm:$0xff]   ;;  %402 = vmatprep.subr.bf16.mxu0 %v5657_v5 }
  0x65   :  { %214 = vst [vmem:[#allocation4 + $0x10] sm:$0xf] %v8220_v0  ;;  %215 = vst [vmem:[#allocation4 + $0x14] sm:$0xf] %v8220_v0  ;;  %v5660_v7 = vld [vmem:[#allocation9 + $0x2c] ss:$16 sps:$4 sm:$0xff]   ;;  %403 = vmatpush1.bf16.msra.mxu0 %v5659_v6 }
  0x66   :  { %216 = vst [vmem:[#allocation4 + $0x18] sm:$0xf] %v8220_v0  ;;  %217 = vst [vmem:[#allocation4 + $0x1c] sm:$0xf] %v8220_v0  ;;  %s6416_s9 = smov 96   ;;  %s6417_s11 = smov 32   ;;  %475 = vmatprep.subr.bf16.mxu1 %v5660_v7 }
  0x67   :  { %227 = vrot.lane.b32.xlu0 %v5553_v3, %s6416_s9  ;;  %245 = vrot.lane.b32.xlu1 %v5553_v3, %s6417_s11  ;;  %251 = vst.msk [vmem:[#allocation2 + $0x10] sm:$0xf] %vm220_vm0, %v5556_v4  ;;  %221 = vst.msk [vmem:[#allocation2] sm:$0xf] %vm220_vm0, %v5553_v3  ;;  %v5662_v8 = vld [vmem:[#allocation9 + $0x28] ss:$16 sps:$4 sm:$0xff]  }
  0x68   :  { %v5663_v9 = vld [vmem:[#allocation9 + $0x4] ss:$16 sps:$4 sm:$0xff]   ;;  %v5665_v10 = vld [vmem:[#allocation9] ss:$16 sps:$4 sm:$0xff]   ;;  %476 = vmatpush1.bf16.msra.mxu1 %v5662_v8  ;;  %v5666_v11 = vld [vmem:[#allocation9 + $0xc] ss:$16 sps:$4 sm:$0xff]  }
  0x69   :  { %v5668_v12 = vld [vmem:[#allocation9 + $0x8] ss:$16 sps:$4 sm:$0xff]   ;;  %404 = vmatprep.subr.bf16.mxu0 %v5663_v9  ;;  %v6549_v13 = vld [vmem:[#allocation11 + $0xe4] ss:$16 sps:$4 sm:$0xff]   ;;  %477 = vmatprep.subr.bf16.mxu1 %v5666_v11  ;;  %v6551_v14 = vld [vmem:[#allocation11 + $0xec] ss:$16 sps:$4 sm:$0xff]  }
  0x6a   :  { %405 = vmatpush1.bf16.msra.mxu0 %v5665_v10  ;;  %v6560_v19 = vld [vmem:[#allocation11 + $0xe0] ss:$16 sps:$4 sm:$0xff]   ;;  %vm377_vm1 = vcmask 261120   ;;  %v6562_v20 = vld [vmem:[#allocation11 + $0xe8] ss:$16 sps:$4 sm:$0xff]   ;;  %v6706_v56 = vshrl.u32 %v153_v55, 7 }
  0x6b   :  { %236 = vrot.lane.b32.xlu0 %v5553_v3, %s6408_s22  ;;  %257 = vrot.lane.b32.xlu1 %v5556_v4, %s6416_s9  ;;  %v6564_v21 = vld [vmem:[#allocation11 + $0xc4] ss:$16 sps:$4 sm:$0xff]   ;;  %v6566_v22 = vld [vmem:[#allocation11 + $0xcc] ss:$16 sps:$4 sm:$0xff]   ;;  %v6574_v26 = vld [vmem:[#allocation11 + $0xc0] ss:$16 sps:$4 sm:$0xff]  }
  0x6c   :  { %478 = vmatpush1.bf16.msra.mxu1 %v5668_v12  ;;  %780 = vmatprep.subr.bf16.mxu0 %v6549_v13  ;;  %v6576_v27 = vld [vmem:[#allocation11 + $0xc8] ss:$16 sps:$4 sm:$0xff]   ;;  %v6578_v28 = vld [vmem:[#allocation11 + $0xa4] ss:$16 sps:$4 sm:$0xff]   ;;  %v6582_v29 = vld [vmem:[#allocation11 + $0xac] ss:$16 sps:$4 sm:$0xff]  }
  0x6d   :  { %821 = vmatprep.subr.bf16.mxu1 %v6551_v14  ;;  %v6588_v31 = vld [vmem:[#allocation11 + $0xa0] ss:$16 sps:$4 sm:$0xff]   ;;  %v6590_v32 = vld [vmem:[#allocation11 + $0xa8] ss:$16 sps:$4 sm:$0xff]   ;;  %v6592_v33 = vld [vmem:[#allocation11 + $0x84] ss:$16 sps:$4 sm:$0xff]  }
  0x6e   :  { %v6596_v34 = vld [vmem:[#allocation11 + $0x8c] ss:$16 sps:$4 sm:$0xff]   ;;  %v6602_v35 = vld [vmem:[#allocation11 + $0x80] ss:$16 sps:$4 sm:$0xff]   ;;  %v6604_v36 = vld [vmem:[#allocation11 + $0x88] ss:$16 sps:$4 sm:$0xff]  }
  0x6f   :  { %275 = vrot.lane.b32.xlu1 %v5556_v4, %s6417_s11  ;;  %266 = vrot.lane.b32.xlu0 %v5556_v4, %s6408_s22  ;;  %v6608_v37 = vld [vmem:[#allocation11 + $0x64] ss:$16 sps:$4 sm:$0xff]   ;;  %v6610_v38 = vld [vmem:[#allocation11 + $0x6c] ss:$16 sps:$4 sm:$0xff]   ;;  %v6616_v40 = vld [vmem:[#allocation11 + $0x60] ss:$16 sps:$4 sm:$0xff]  }
  0x70   :  { %v6618_v41 = vld [vmem:[#allocation11 + $0x68] ss:$16 sps:$4 sm:$0xff]   ;;  %v6622_v42 = vld [vmem:[#allocation11 + $0x44] ss:$16 sps:$4 sm:$0xff]   ;;  %v6624_v43 = vld [vmem:[#allocation11 + $0x4c] ss:$16 sps:$4 sm:$0xff]  }
  0x71   :  { %v6630_v44 = vld [vmem:[#allocation11 + $0x40] ss:$16 sps:$4 sm:$0xff]   ;;  %v6632_v45 = vld [vmem:[#allocation11 + $0x48] ss:$16 sps:$4 sm:$0xff]   ;;  %v6636_v46 = vld [vmem:[#allocation11 + $0x24] ss:$16 sps:$4 sm:$0xff]  }
  0x72   :  { %v6638_v47 = vld [vmem:[#allocation11 + $0x2c] ss:$16 sps:$4 sm:$0xff]   ;;  %v6644_v49 = vld [vmem:[#allocation11 + $0x20] ss:$16 sps:$4 sm:$0xff]   ;;  %v6646_v50 = vld [vmem:[#allocation11 + $0x28] ss:$16 sps:$4 sm:$0xff]  }
  0x73   :  { %v6650_v51 = vld [vmem:[#allocation11 + $0x4] ss:$16 sps:$4 sm:$0xff]   ;;  %v6652_v52 = vld [vmem:[#allocation11 + $0xc] ss:$16 sps:$4 sm:$0xff]   ;;  %v6658_v53 = vld [vmem:[#allocation11] ss:$16 sps:$4 sm:$0xff]  }
  0x74   :  { %v6660_v54 = vld [vmem:[#allocation11 + $0x8] ss:$16 sps:$4 sm:$0xff]   ;;  %8296 = vst [vmem:[#allocation28_spill] sm:$0xff] %v6706_v56  ;;  %v8219_v57 = vsub.s32 0, %v6706_v56  ;;  %v8218_v58 = vsub.s32 2, %v6706_v56  ;;  %v8217_v62 = vsub.s32 1, %v6706_v56 }
  0x75   :  { %8295 = vst [vmem:[#allocation27_spill] sm:$0xff] %v6660_v54  ;;  %v295_v59 = vld [vmem:[%s8205_s3] sm:$0xf]  ;;  %v8216_v63 = vsub.s32 3, %v6706_v56  ;;  %v6731_v5 = vand.u32 127, %v153_v55  ;;  %vm891_vm6 = vcmask 519168  }
  0x76   :  { %v6725_v3 = vrot.slane %v295_v59, %v8219_v57  ;;  %v6729_v4 = vrot.slane %v295_v59, %v8218_v58  ;;  %v6735_v8 = vrot.slane %v295_v59, %v8217_v62  ;;  %vm893_vm7 = vcmask 1043968   ;;  %s6420_s18 = smov [#allocation20]  }
  0x77   :  { %8297 = vst [vmem:[#allocation29_spill] sm:$0xff] %v6731_v5  ;;  %v6739_v9 = vrot.slane %v295_v59, %v8216_v63  ;;  %vm206_vm2 = vcmp.ge.s32.totalorder %v6731_v5, 64  ;;  %vm6419_vm8 = vmmov 0  }
  0xd9   :  { %v228_v15 = vpop.permute.xlu0 %227  ;;  %v246_v16 = vpop.permute.xlu1 %245 }
  0xda   :  { %230 = vst.msk [vmem:[#allocation2 + $0x4] sm:$0xf] %vm220_vm0, %v228_v15  ;;  %248 = vst.msk [vmem:[#allocation2 + $0xc] sm:$0xf] %vm220_vm0, %v246_v16  ;;  %v156_v16 = vadd.s32 256, %v6731_v5 }
  0xdd   :  { %v237_v17 = vpop.permute.xlu0 %236  ;;  %v258_v18 = vpop.permute.xlu1 %257 }
  0xde   :  { %239 = vst.msk [vmem:[#allocation2 + $0x8] sm:$0xf] %vm220_vm0, %v237_v17  ;;  %260 = vst.msk [vmem:[#allocation2 + $0x14] sm:$0xf] %vm220_vm0, %v258_v18 }
  0xe1   :  { %v5672_v23 = vld [vmem:[#allocation2] sm:$0xff]   ;;  %v276_v24 = vpop.permute.xlu1 %275  ;;  %v267_v25 = vpop.permute.xlu0 %266 }
  0xe2   :  { %278 = vst.msk [vmem:[#allocation2 + $0x1c] sm:$0xf] %vm220_vm0, %v276_v24  ;;  %269 = vst.msk [vmem:[#allocation2 + $0x18] sm:$0xf] %vm220_vm0, %v267_v25  ;;  %5135 = vmatmul.mubr.msk.bf16.vlgmr.msra.gmra.mxu0 %vm377_vm1, %v5672_v23  ;;  %5139 = vmatmul.mubr.msk.bf16.vlgmr.msra.gmra.mxu1 %vm377_vm1, %v5672_v23  ;;  %v155_v25 = vadd.s32 128, %v6731_v5 }
  0xe3   :  { %781 = vmatpush1.bf16.msra.mxu0 %v6560_v19  ;;  %822 = vmatpush1.bf16.msra.mxu1 %v6562_v20 }
  0xe4   :  { %782 = vmatprep.subr.bf16.mxu0 %v6564_v21  ;;  %823 = vmatprep.subr.bf16.mxu1 %v6566_v22 }
  0xe5   :  { %432 = vmatprep.mubr.bf16.mxu0 %v8220_v0  ;;  %505 = vmatprep.mubr.bf16.mxu1 %v8220_v0  ;;  %v5685_v30 = vld [vmem:[#allocation2 + $0x8] sm:$0xff]   ;;  %v5698_v39 = vld [vmem:[#allocation2 + $0x10] sm:$0xff]  }
  0xe7   :  { %783 = vmatpush1.bf16.msra.mxu0 %v6574_v26  ;;  %824 = vmatpush1.bf16.msra.mxu1 %v6576_v27 }
  0xe8   :  { %784 = vmatprep.subr.bf16.mxu0 %v6578_v28  ;;  %825 = vmatprep.subr.bf16.mxu1 %v6582_v29 }
  0xe9   :  { %v5711_v48 = vld [vmem:[#allocation2 + $0x18] sm:$0xff]  }
  0xea   :  { %5136 = vmatmul.mubr.msk.bf16.gmra.mxu0 %vm377_vm1, %v5685_v30  ;;  %5140 = vmatmul.mubr.msk.bf16.gmra.mxu1 %vm377_vm1, %v5685_v30  ;;  %v157_v30 = vadd.s32 384, %v6731_v5 }
  0xeb   :  { %785 = vmatpush1.bf16.msra.mxu0 %v6588_v31  ;;  %826 = vmatpush1.bf16.msra.mxu1 %v6590_v32 }
  0xec   :  { %786 = vmatprep.subr.bf16.mxu0 %v6592_v33  ;;  %827 = vmatprep.subr.bf16.mxu1 %v6596_v34  ;;  %v183_v63 = vand.u32 127, %v157_v30 }
  0xed   :  { %442 = vmatprep.mubr.bf16.mxu0 %v8220_v0  ;;  %515 = vmatprep.mubr.bf16.mxu1 %v8220_v0 }
  0xee   :  { %vm6789_vm5 = vcmp.ge.s32.totalorder %v183_v63, 64 }
  0xef   :  { %787 = vmatpush1.bf16.msra.mxu0 %v6602_v35  ;;  %828 = vmatpush1.bf16.msra.mxu1 %v6604_v36 }
  0xf0   :  { %788 = vmatprep.subr.bf16.mxu0 %v6608_v37  ;;  %829 = vmatprep.subr.bf16.mxu1 %v6610_v38 }
  0xf2   :  { %5137 = vmatmul.mubr.msk.bf16.gmra.mxu0 %vm377_vm1, %v5698_v39  ;;  %5141 = vmatmul.mubr.msk.bf16.gmra.mxu1 %vm377_vm1, %v5698_v39 }
  0xf3   :  { %789 = vmatpush1.bf16.msra.mxu0 %v6616_v40  ;;  %830 = vmatpush1.bf16.msra.mxu1 %v6618_v41 }
  0xf4   :  { %790 = vmatprep.subr.bf16.mxu0 %v6622_v42  ;;  %831 = vmatprep.subr.bf16.mxu1 %v6624_v43 }
  0xf5   :  { %452 = vmatprep.mubr.bf16.mxu0 %v8220_v0  ;;  %525 = vmatprep.mubr.bf16.mxu1 %v8220_v0 }
  0xf7   :  { %791 = vmatpush1.bf16.msra.mxu0 %v6630_v44  ;;  %832 = vmatpush1.bf16.msra.mxu1 %v6632_v45 }
  0xf8   :  { %792 = vmatprep.subr.bf16.mxu0 %v6636_v46  ;;  %833 = vmatprep.subr.bf16.mxu1 %v6638_v47 }
  0xfa   :  { %5138 = vmatmul.mubr.msk.bf16.gmra.mxu0 %vm377_vm1, %v5711_v48  ;;  %5142 = vmatmul.mubr.msk.bf16.gmra.mxu1 %vm377_vm1, %v5711_v48 }
  0xfb   :  { %793 = vmatpush1.bf16.msra.mxu0 %v6644_v49  ;;  %834 = vmatpush1.bf16.msra.mxu1 %v6646_v50 }
  0xfc   :  { %794 = vmatprep.subr.bf16.mxu0 %v6650_v51  ;;  %835 = vmatprep.subr.bf16.mxu1 %v6652_v52 }
  0xfd   :  { %812 = vmatprep.mubr.bf16.mxu0 %v8220_v0  ;;  %853 = vmatprep.mubr.bf16.mxu1 %v8220_v0 }
  0xff   :  { %795 = vmatpush1.bf16.msra.mxu0 %v6658_v53  ;;  %836 = vmatpush1.bf16.msra.mxu1 %v6660_v54 }
 0x100   :  { %1099 = vmatprep.subr.bf16.mxu0 %v6549_v13  ;;  %1140 = vmatprep.subr.bf16.mxu1 %v6551_v14 }
 0x102   :  { %813 = vmatmul.mubr.bf16.vlgmr.msra.gmra.mxu0 %v8220_v0  ;;  %854 = vmatmul.mubr.bf16.vlgmr.msra.gmra.mxu1 %v8220_v0 }
 0x103   :  { %1100 = vmatpush1.bf16.msra.mxu0 %v6560_v19  ;;  %1141 = vmatpush1.bf16.msra.mxu1 %v6562_v20 }
 0x104   :  { %1101 = vmatprep.subr.bf16.mxu0 %v6564_v21  ;;  %1142 = vmatprep.subr.bf16.mxu1 %v6566_v22 }
 0x105   :  { %1131 = vmatprep.mubr.bf16.mxu0 %v8220_v0  ;;  %1172 = vmatprep.mubr.bf16.mxu1 %v8220_v0 }
 0x107   :  { %1102 = vmatpush1.bf16.msra.mxu0 %v6574_v26  ;;  %1143 = vmatpush1.bf16.msra.mxu1 %v6576_v27 }
 0x108   :  { %1103 = vmatprep.subr.bf16.mxu0 %v6578_v28  ;;  %1144 = vmatprep.subr.bf16.mxu1 %v6582_v29 }
 0x10b   :  { %1104 = vmatpush1.bf16.msra.mxu0 %v6588_v31  ;;  %1145 = vmatpush1.bf16.msra.mxu1 %v6590_v32 }
 0x10c   :  { %1105 = vmatprep.subr.bf16.mxu0 %v6592_v33  ;;  %1146 = vmatprep.subr.bf16.mxu1 %v6596_v34 }
 0x10f   :  { %1106 = vmatpush1.bf16.msra.mxu0 %v6602_v35  ;;  %1147 = vmatpush1.bf16.msra.mxu1 %v6604_v36 }
 0x110   :  { %1107 = vmatprep.subr.bf16.mxu0 %v6608_v37  ;;  %1148 = vmatprep.subr.bf16.mxu1 %v6610_v38 }
 0x113   :  { %1108 = vmatpush1.bf16.msra.mxu0 %v6616_v40  ;;  %1149 = vmatpush1.bf16.msra.mxu1 %v6618_v41 }
 0x114   :  { %1109 = vmatprep.subr.bf16.mxu0 %v6622_v42  ;;  %1150 = vmatprep.subr.bf16.mxu1 %v6624_v43 }
 0x117   :  { %1110 = vmatpush1.bf16.msra.mxu0 %v6630_v44  ;;  %1151 = vmatpush1.bf16.msra.mxu1 %v6632_v45 }
 0x118   :  { %1111 = vmatprep.subr.bf16.mxu0 %v6636_v46  ;;  %1152 = vmatprep.subr.bf16.mxu1 %v6638_v47 }
 0x11b   :  { %1112 = vmatpush1.bf16.msra.mxu0 %v6644_v49  ;;  %1153 = vmatpush1.bf16.msra.mxu1 %v6646_v50 }
 0x11c   :  { %1113 = vmatprep.subr.bf16.mxu0 %v6650_v51  ;;  %1154 = vmatprep.subr.bf16.mxu1 %v6652_v52 }
 0x11f   :  { %1114 = vmatpush1.bf16.msra.mxu0 %v6658_v53  ;;  %1155 = vmatpush1.bf16.msra.mxu1 %v6660_v54 }
 0x120   :  { %1416 = vmatprep.subr.bf16.mxu0 %v6549_v13  ;;  %1457 = vmatprep.subr.bf16.mxu1 %v6551_v14 }
 0x1a2   :  { %v6713_v60 = vpop.f32.mrf.mxu0  ;;  %v6715_v61 = vpop.f32.mrf.mxu1 }
 0x1a4   :  { %v6719_v1 = vpop.f32.mrf.mxu0  ;;  %v6721_v2 = vpop.f32.mrf.mxu1 }
 0x1a6   :  { %v428_v6 = vpop.f32.mrf.mxu0  ;;  %v501_v7 = vpop.f32.mrf.mxu1 }
 0x1a7   :  { %v6742_v10 = vadd.f32 %v428_v6, %v6725_v3  ;;  %v6745_v11 = vadd.f32 %v501_v7, %v6729_v4  ;;  %v176_v6 = vand.u32 127, %v156_v16 }
 0x1a8   :  { %v430_v12 = vpop.f32.mrf.mxu0  ;;  %v503_v13 = vpop.f32.mrf.mxu1 }
 0x1a9   :  { %8298 = vst [vmem:[#allocation30_spill] sm:$0xff] %v6745_v11  ;;  %v6748_v14 = vadd.f32 %v430_v12, %v6735_v8  ;;  %v6751_v15 = vadd.f32 %v503_v13, %v6739_v9  ;;  %vm6777_vm3 = vcmp.ge.s32.totalorder %v176_v6, 64 }
 0x1aa   :  { %v434_v17 = vpop.f32.mrf.mxu0  ;;  %v507_v18 = vpop.f32.mrf.mxu1 }
 0x1ab   :  { %8299 = vst [vmem:[#allocation31_spill] sm:$0xff] %v6748_v14  ;;  %8300 = vst [vmem:[#allocation32_spill] sm:$0xff] %v6751_v15  ;;  %v435_v23 = vadd.f32 %v434_v17, %v6725_v3  ;;  %v6756_v24 = vadd.f32 %v507_v18, %v6729_v4  ;;  %v169_v18 = vand.u32 127, %v155_v25 }
 0x1ac   :  { %v436_v39 = vpop.f32.mrf.mxu0  ;;  %v509_v48 = vpop.f32.mrf.mxu1 }
 0x1ad   :  { %8301 = vst [vmem:[#allocation33_spill] sm:$0xff] %v6756_v24  ;;  %v6761_v55 = vadd.f32 %v436_v39, %v6735_v8  ;;  %v6764_v59 = vadd.f32 %v509_v48, %v6739_v9  ;;  %vm6785_vm4 = vcmp.ge.s32.totalorder %v169_v18, 64 }
 0x1ae   :  { %v438_v7 = vpop.f32.mrf.mxu0  ;;  %v511_v12 = vpop.f32.mrf.mxu1 }
 0x1af   :  { %8302 = vst [vmem:[#allocation34_spill] sm:$0xff] %v6764_v59  ;;  %v439_v13 = vadd.f32 %v438_v7, %v6725_v3  ;;  %v6768_v17 = vadd.f32 %v511_v12, %v6729_v4 }
 0x1b0   :  { %v440_v62 = vpop.f32.mrf.mxu0  ;;  %v513_v58 = vpop.f32.mrf.mxu1 }
 0x1b1   :  { %8303 = vst [vmem:[#allocation35_spill] sm:$0xff] %v6768_v17  ;;  %v6771_v57 = vadd.f32 %v440_v62, %v6735_v8  ;;  %v6774_v39 = vadd.f32 %v513_v58, %v6739_v9 }
 0x1b2   :  { %v444_v48 = vpop.f32.mrf.mxu0  ;;  %v517_v7 = vpop.f32.mrf.mxu1 }
 0x1b3   :  { %8304 = vst [vmem:[#allocation36_spill] sm:$0xff] %v6771_v57  ;;  %8305 = vst [vmem:[#allocation37_spill] sm:$0xff] %v6774_v39  ;;  %v445_v12 = vadd.f32 %v444_v48, %v6725_v3  ;;  %v6783_v25 = vadd.f32 %v517_v7, %v6729_v4 }
 0x1b4   :  { %v446_v62 = vpop.f32.mrf.mxu0  ;;  %v519_v6 = vpop.f32.mrf.mxu1 }
 0x1b5   :  { %8308 = vst [vmem:[#allocation38_spill] sm:$0xff] %v6783_v25  ;;  %v6794_v0 = vadd.f32 %v446_v62, %v6735_v8  ;;  %v6797_v56 = vadd.f32 %v519_v6, %v6739_v9  ;;  %v6801_v48 = vsel %vm206_vm2, %v445_v12, %v439_v13  ;;  %v6809_v54 = vsel %vm206_vm2, %v439_v13, %v445_v12 }
 0x1b6   :  { %8315 = vst [vmem:[#allocation41_spill] sm:$0xff] %v6801_v48  ;;  %v448_v18 = vpop.f32.mrf.mxu0  ;;  %v521_v7 = vpop.f32.mrf.mxu1  ;;  %8316 = vst [vmem:[#allocation42_spill] sm:$0xff] %v6809_v54 }
 0x1b7   :  { %8313 = vst [vmem:[#allocation39_spill] sm:$0xff] %v6794_v0  ;;  %8314 = vst [vmem:[#allocation40_spill] sm:$0xff] %v6797_v56  ;;  %v449_v6 = vadd.f32 %v448_v18, %v6725_v3  ;;  %v6817_v48 = vadd.f32 %v521_v7, %v6729_v4  ;;  %v425_v56 = vadd.f32 %v6713_v60, %v6725_v3 }
 0x1b8   :  { %v450_v12 = vpop.f32.mrf.mxu0  ;;  %v523_v54 = vpop.f32.mrf.mxu1 }
 0x1b9   :  { %v6836_v62 = vadd.f32 %v450_v12, %v6735_v8  ;;  %v6839_v63 = vadd.f32 %v523_v54, %v6739_v9  ;;  %v6843_v13 = vsel %vm206_vm2, %v449_v6, %v435_v23  ;;  %v6851_v7 = vsel %vm206_vm2, %v435_v23, %v449_v6 }
 0x1ba   :  { %v454_v17 = vpop.f32.mrf.mxu0  ;;  %v527_v25 = vpop.f32.mrf.mxu1  ;;  %8318 = vst [vmem:[#allocation44_spill] sm:$0xff] %v6851_v7 }
 0x1bb   :  { %8317 = vst [vmem:[#allocation43_spill] sm:$0xff] %v6839_v63  ;;  %v455_v12 = vadd.f32 %v454_v17, %v6725_v3  ;;  %v6859_v39 = vadd.f32 %v527_v25, %v6729_v4 }
 0x1bc   :  { %v456_v6 = vpop.f32.mrf.mxu0  ;;  %v529_v7 = vpop.f32.mrf.mxu1 }
 0x1bd   :  { %8319 = vst [vmem:[#allocation45_spill] sm:$0xff] %v6859_v39  ;;  %v6878_v54 = vadd.f32 %v456_v6, %v6735_v8  ;;  %v6881_v18 = vadd.f32 %v529_v7, %v6739_v9  ;;  %v6886_v23 = vsel %vm206_vm2, %v455_v12, %v6742_v10  ;;  %v6897_v7 = vsel %vm206_vm2, %v6742_v10, %v455_v12 }
 0x1be   :  { %v458_v25 = vpop.f32.mrf.mxu0  ;;  %v531_v57 = vpop.f32.mrf.mxu1  ;;  %8322 = vst [vmem:[#allocation48_spill] sm:$0xff] %v6897_v7  ;;  %v6917_v12 = vadd.f32 %v6715_v61, %v6729_v4 }
 0x1bf   :  { %8320 = vst [vmem:[#allocation46_spill] sm:$0xff] %v6878_v54  ;;  %8321 = vst [vmem:[#allocation47_spill] sm:$0xff] %v6881_v18  ;;  %v459_v0 = vadd.f32 %v458_v25, %v6725_v3  ;;  %v6905_v59 = vadd.f32 %v531_v57, %v6729_v4  ;;  %v6929_v25 = vadd.f32 %v6719_v1, %v6735_v8 }
 0x1c0   :  { %8324 = vst [vmem:[#allocation50_spill] sm:$0xff] %v6917_v12  ;;  %v460_v6 = vpop.f32.mrf.mxu0  ;;  %v533_v17 = vpop.f32.mrf.mxu1  ;;  %v6941_v57 = vadd.f32 %v6721_v2, %v6739_v9 }
 0x1c1   :  { %8323 = vst [vmem:[#allocation49_spill] sm:$0xff] %v6905_v59  ;;  %8325 = vst [vmem:[#allocation51_spill] sm:$0xff] %v6929_v25  ;;  %v6932_v10 = vadd.f32 %v460_v6, %v6735_v8  ;;  %v6935_v61 = vadd.f32 %v533_v17, %v6739_v9  ;;  %v584_v4 = vsel %vm206_vm2, %v459_v0, %v425_v56 }
 0x1c2   :  { %8328 = vst [vmem:[#allocation54_spill] sm:$0xff] %v6941_v57  ;;  %v814_v60 = vpop.f32.mrf.mxu0  ;;  %v855_v7 = vpop.f32.mrf.mxu1  ;;  %v6945_v3 = vsel %vm206_vm2, %v425_v56, %v459_v0  ;;  %v586_v24 = vsel %vm6777_vm3, %v6905_v59, %v6917_v12 }
 0x1c3   :  { %8326 = vst [vmem:[#allocation52_spill] sm:$0xff] %v6932_v10  ;;  %8327 = vst [vmem:[#allocation53_spill] sm:$0xff] %v6935_v61  ;;  %v862_v8 = vadd.f32 %v814_v60, %v584_v4  ;;  %v585_v17 = vsel %vm6785_vm4, %v6932_v10, %v6929_v25  ;;  %v864_v9 = vadd.f32 %v855_v7, %v586_v24 }
 0x1c4   :  { %8329 = vst [vmem:[#allocation55_spill] sm:$0xff] %v6945_v3  ;;  %v816_v6 = vpop.f32.mrf.mxu0  ;;  %v857_v2 = vpop.f32.mrf.mxu1  ;;  %v587_v0 = vsel %vm6789_vm5, %v6935_v61, %v6941_v57 }
 0x1c5   :  { %v5175_v56 = vmul.f32 -1.442695, %v862_v8  ;;  %v863_v1 = vadd.f32 %v816_v6, %v585_v17  ;;  %v5177_v8 = vmul.f32 -1.442695, %v864_v9  ;;  %v865_v6 = vadd.f32 %v857_v2, %v587_v0 }
 0x1c6   :  { %v818_v60 = vpop.f32.mrf.mxu0  ;;  %v859_v4 = vpop.f32.mrf.mxu1 }
 0x1c7   :  { %5921 = vpow2.f32 %v5175_v56  ;;  %v5176_v5 = vmul.f32 -1.442695, %v863_v1 }
 0x1c8   :  { %v819_v3 = vpop.f32.mrf.mxu0  ;;  %v860_v63 = vpop.f32.mrf.mxu1 }
 0x1c9   :  { %5923 = vpow2.f32 %v5176_v5 }
 0x1ca   :  { %5925 = vpow2.f32 %v5177_v8 }
 0x1d4   :  { %v5922_v17 = vpop.eup %5921 }
 0x1d5   :  { %v875_v60 = vadd.f32 1.0, %v5922_v17 }
 0x1d6   :  { %v5924_v56 = vpop.eup %5923 }
 0x1d7   :  { %5927 = vrcp.f32 %v875_v60  ;;  %v876_v63 = vadd.f32 1.0, %v5924_v56  ;;  %v5926_v5 = vpop.eup %5925 }
 0x1d8   :  { %5929 = vtanh.f32 %v865_v6  ;;  %v877_v24 = vadd.f32 1.0, %v5926_v5 }
 0x1d9   :  { %5931 = vrcp.f32 %v876_v63 }
 0x1da   :  { %5933 = vrcp.f32 %v877_v24 }
 0x1e4   :  { %v5928_v3 = vpop.eup %5927 }
 0x1e5   :  { %v5930_v1 = vpop.eup %5929 }
 0x1e6   :  { %v5932_v4 = vpop.eup %5931  ;;  %v886_v59 = vmul.f32 %v5930_v1, %v5928_v3  ;;  %v8334_v3 = vsel %vm6789_vm5, %v6881_v18, %v6751_v15  ;;  %v8345_v15 = vld [vmem:[#allocation38_spill] sm:$0xff] }
 0x1e7   :  { %v885_v7 = vmul.f32 0.0, %v5932_v4  ;;  %v5934_v2 = vpop.eup %5933 }
 0x1e9   :  { %v6971_v12 = vadd.f32 %v886_v59, %v885_v7  ;;  %v8330_v59 = vmov 0  }
 0x1eb   :  { %5935 = vtanh.f32 %v6971_v12 }
 0x1f8   :  { %v5936_v9 = vpop.eup %5935 }
 0x1f9   :  { %v889_v0 = vmul.f32 %v5936_v9, %v5934_v2 }
 0x1fb   :  { %v890_v8 = vpack.c.bf16 %v889_v0, %v889_v0 }
 0x1fd   :  { %892 = vst.msk [vmem:[#allocation4] sm:$0xf] %vm891_vm6, %v890_v8  ;;  %1132 = vmatmul.mubr.bf16.vlgmr.msra.gmra.mxu0 %v890_v8  ;;  %1173 = vmatmul.mubr.bf16.vlgmr.msra.gmra.mxu1 %v890_v8 }
 0x1fe   :  { %894 = vst.msk [vmem:[#allocation4 + $0x1c] sm:$0xf] %vm893_vm7, %v890_v8  ;;  %1417 = vmatpush1.bf16.msra.mxu0 %v6560_v19  ;;  %1458 = vmatpush1.bf16.msra.mxu1 %v6562_v20  ;;  %v8331_v19 = vld [vmem:[#allocation27_spill] sm:$0xff] }
 0x1ff   :  { %1418 = vmatprep.subr.bf16.mxu0 %v6564_v21  ;;  %1459 = vmatprep.subr.bf16.mxu1 %v6566_v22 }
 0x200   :  { %1448 = vmatprep.mubr.bf16.mxu0 %v8330_v59  ;;  %1489 = vmatprep.mubr.bf16.mxu1 %v8330_v59 }
 0x202   :  { %1419 = vmatpush1.bf16.msra.mxu0 %v6574_v26  ;;  %1460 = vmatpush1.bf16.msra.mxu1 %v6576_v27 }
 0x203   :  { %1420 = vmatprep.subr.bf16.mxu0 %v6578_v28  ;;  %1461 = vmatprep.subr.bf16.mxu1 %v6582_v29 }
 0x206   :  { %1421 = vmatpush1.bf16.msra.mxu0 %v6588_v31  ;;  %1462 = vmatpush1.bf16.msra.mxu1 %v6590_v32  ;;  %v8332_v31 = vsel %vm6785_vm4, %v6878_v54, %v6748_v14  ;;  %v8349_v54 = vld [vmem:[#allocation37_spill] sm:$0xff] }
 0x207   :  { %1422 = vmatprep.subr.bf16.mxu0 %v6592_v33  ;;  %1463 = vmatprep.subr.bf16.mxu1 %v6596_v34 }
 0x20a   :  { %1423 = vmatpush1.bf16.msra.mxu0 %v6602_v35  ;;  %1464 = vmatpush1.bf16.msra.mxu1 %v6604_v36 }
 0x20b   :  { %1424 = vmatprep.subr.bf16.mxu0 %v6608_v37  ;;  %1465 = vmatprep.subr.bf16.mxu1 %v6610_v38 }
 0x20e   :  { %1425 = vmatpush1.bf16.msra.mxu0 %v6616_v40  ;;  %1466 = vmatpush1.bf16.msra.mxu1 %v6618_v41 }
 0x20f   :  { %1426 = vmatprep.subr.bf16.mxu0 %v6622_v42  ;;  %1467 = vmatprep.subr.bf16.mxu1 %v6624_v43 }
 0x212   :  { %1427 = vmatpush1.bf16.msra.mxu0 %v6630_v44  ;;  %1468 = vmatpush1.bf16.msra.mxu1 %v6632_v45 }
 0x213   :  { %1428 = vmatprep.subr.bf16.mxu0 %v6636_v46  ;;  %1469 = vmatprep.subr.bf16.mxu1 %v6638_v47 }
 0x216   :  { %1429 = vmatpush1.bf16.msra.mxu0 %v6644_v49  ;;  %1470 = vmatpush1.bf16.msra.mxu1 %v6646_v50 }
 0x217   :  { %1430 = vmatprep.subr.bf16.mxu0 %v6650_v51  ;;  %1471 = vmatprep.subr.bf16.mxu1 %v6652_v52 }
 0x21a   :  { %1431 = vmatpush1.bf16.msra.mxu0 %v6658_v53  ;;  %1472 = vmatpush1.bf16.msra.mxu1 %v8331_v19 }
 0x2bd   :  { %v1133_v20 = vpop.f32.mrf.mxu0  ;;  %v1174_v21 = vpop.f32.mrf.mxu1 }
 0x2be   :  { %v1181_v22 = vadd.f32 %v1133_v20, %v6886_v23  ;;  %v8333_v23 = vsel %vm6777_vm3, %v6859_v39, %v6745_v11  ;;  %v8348_v11 = vld [vmem:[#allocation40_spill] sm:$0xff] }
 0x2bf   :  { %v1135_v26 = vpop.f32.mrf.mxu0  ;;  %v1176_v27 = vpop.f32.mrf.mxu1  ;;  %v1183_v63 = vadd.f32 %v1174_v21, %v8333_v23  ;;  %v7046_v23 = vld [vmem:[#allocation11 + $0xcc] ss:$16 sps:$4 sm:$0xff]   ;;  %v8350_v14 = vsel %vm6789_vm5, %v8348_v11, %v8349_v54 }
 0x2c0   :  { %v5210_v28 = vmul.f32 -1.442695, %v1181_v22  ;;  %v1182_v33 = vadd.f32 %v1135_v26, %v8332_v31  ;;  %v1184_v1 = vadd.f32 %v1176_v27, %v8334_v3  ;;  %v7056_v3 = vld [vmem:[#allocation11 + $0xa4] ss:$16 sps:$4 sm:$0xff]  }
 0x2c1   :  { %v1137_v35 = vpop.f32.mrf.mxu0  ;;  %v1178_v17 = vpop.f32.mrf.mxu1  ;;  %v5212_v5 = vmul.f32 -1.442695, %v1183_v63  ;;  %v7048_v63 = vld [vmem:[#allocation11 + $0xc0] ss:$16 sps:$4 sm:$0xff]  }
 0x2c2   :  { %5937 = vpow2.f32 %v5210_v28  ;;  %v5211_v6 = vmul.f32 -1.442695, %v1182_v33  ;;  %v7034_v17 = vld [vmem:[#allocation11 + $0xec] ss:$16 sps:$4 sm:$0xff]  }
 0x2c3   :  { %v1138_v60 = vpop.f32.mrf.mxu0  ;;  %v1179_v56 = vpop.f32.mrf.mxu1  ;;  %1774 = vmatprep.subr.bf16.mxu1 %v7034_v17 }
 0x2c4   :  { %5939 = vpow2.f32 %v5211_v6  ;;  %v7036_v6 = vld [vmem:[#allocation11 + $0xe0] ss:$16 sps:$4 sm:$0xff]   ;;  %v7038_v60 = vld [vmem:[#allocation11 + $0xe8] ss:$16 sps:$4 sm:$0xff]   ;;  %v7044_v56 = vld [vmem:[#allocation11 + $0xc4] ss:$16 sps:$4 sm:$0xff]  }
 0x2c5   :  { %5941 = vpow2.f32 %v5212_v5  ;;  %v7050_v5 = vld [vmem:[#allocation11 + $0xc8] ss:$16 sps:$4 sm:$0xff]  }
 0x2c6   :  { %5943 = vtanh.f32 %v1184_v1  ;;  %v7059_v1 = vld [vmem:[#allocation11 + $0xa0] ss:$16 sps:$4 sm:$0xff]  }
 0x2cf   :  { %v5938_v4 = vpop.eup %5937 }
 0x2d0   :  { %v1194_v24 = vadd.f32 1.0, %v5938_v4  ;;  %v7064_v4 = vld [vmem:[#allocation11 + $0x84] ss:$16 sps:$4 sm:$0xff]  }
 0x2d1   :  { %v5940_v7 = vpop.eup %5939 }
 0x2d2   :  { %5945 = vrcp.f32 %v1194_v24  ;;  %v1195_v2 = vadd.f32 1.0, %v5940_v7  ;;  %v5942_v9 = vpop.eup %5941  ;;  %v7067_v24 = vld [vmem:[#allocation11 + $0x80] ss:$16 sps:$4 sm:$0xff]  }
 0x2d3   :  { %v5944_v0 = vpop.eup %5943  ;;  %v1196_v22 = vadd.f32 1.0, %v5942_v9 }
 0x2d4   :  { %5947 = vrcp.f32 %v1195_v2 }
 0x2d5   :  { %5949 = vrcp.f32 %v1196_v22 }
 0x2df   :  { %v5946_v8 = vpop.eup %5945 }
 0x2e0   :  { %v1205_v20 = vmul.f32 %v5946_v8, %v5944_v0 }
 0x2e1   :  { %v5948_v21 = vpop.eup %5947 }
 0x2e2   :  { %v1204_v26 = vmul.f32 %v5948_v21, %v6971_v12  ;;  %v5950_v27 = vpop.eup %5949  ;;  %v7032_v12 = vld [vmem:[#allocation11 + $0xe4] ss:$16 sps:$4 sm:$0xff]  }
 0x2e3   :  { %1733 = vmatprep.subr.bf16.mxu0 %v7032_v12 }
 0x2e4   :  { %v7025_v28 = vadd.f32 %v1205_v20, %v1204_v26 }
 0x2e6   :  { %5951 = vtanh.f32 %v7025_v28 }
 0x2f3   :  { %v5952_v31 = vpop.eup %5951 }
 0x2f4   :  { %v1208_v33 = vmul.f32 %v5952_v31, %v5950_v27 }
 0x2f6   :  { %v1209_v35 = vpack.c.bf16 %v1208_v33, %v1208_v33 }
 0x2f8   :  { %1210 = vst.msk [vmem:[#allocation4 + $0x4] sm:$0xf] %vm891_vm6, %v1209_v35  ;;  %1449 = vmatmul.mubr.bf16.vlgmr.msra.gmra.mxu0 %v1209_v35  ;;  %1490 = vmatmul.mubr.bf16.vlgmr.msra.gmra.mxu1 %v1209_v35 }
 0x2f9   :  { %1211 = vst.msk [vmem:[#allocation4 + $0x18] sm:$0xf] %vm893_vm7, %v1209_v35  ;;  %1765 = vmatprep.mubr.bf16.mxu0 %v8330_v59  ;;  %1806 = vmatprep.mubr.bf16.mxu1 %v8330_v59 }
 0x2fa   :  { %1734 = vmatpush1.bf16.msra.mxu0 %v7036_v6  ;;  %1775 = vmatpush1.bf16.msra.mxu1 %v7038_v60 }
 0x2fb   :  { %1735 = vmatprep.subr.bf16.mxu0 %v7044_v56  ;;  %1776 = vmatprep.subr.bf16.mxu1 %v7046_v23 }
 0x2fe   :  { %1736 = vmatpush1.bf16.msra.mxu0 %v7048_v63  ;;  %1777 = vmatpush1.bf16.msra.mxu1 %v7050_v5 }
 0x2ff   :  { %1778 = vmatprep.subr.bf16.mxu1 %v6582_v29  ;;  %1737 = vmatprep.subr.bf16.mxu0 %v7056_v3 }
 0x302   :  { %1738 = vmatpush1.bf16.msra.mxu0 %v7059_v1  ;;  %1779 = vmatpush1.bf16.msra.mxu1 %v6590_v32 }
 0x303   :  { %1780 = vmatprep.subr.bf16.mxu1 %v6596_v34  ;;  %1739 = vmatprep.subr.bf16.mxu0 %v7064_v4 }
 0x306   :  { %1740 = vmatpush1.bf16.msra.mxu0 %v7067_v24  ;;  %1781 = vmatpush1.bf16.msra.mxu1 %v6604_v36 }
 0x307   :  { %1741 = vmatprep.subr.bf16.mxu0 %v6608_v37  ;;  %1782 = vmatprep.subr.bf16.mxu1 %v6610_v38 }
 0x30a   :  { %1742 = vmatpush1.bf16.msra.mxu0 %v6616_v40  ;;  %1783 = vmatpush1.bf16.msra.mxu1 %v6618_v41  ;;  %v8335_v40 = vsel %vm6785_vm4, %v6836_v62, %v6761_v55 }
 0x30b   :  { %1743 = vmatprep.subr.bf16.mxu0 %v6622_v42  ;;  %1784 = vmatprep.subr.bf16.mxu1 %v6624_v43 }
 0x30e   :  { %1744 = vmatpush1.bf16.msra.mxu0 %v6630_v44  ;;  %1785 = vmatpush1.bf16.msra.mxu1 %v6632_v45 }
 0x30f   :  { %1745 = vmatprep.subr.bf16.mxu0 %v6636_v46  ;;  %1786 = vmatprep.subr.bf16.mxu1 %v6638_v47  ;;  %v8336_v47 = vld [vmem:[#allocation33_spill] sm:$0xff] }
 0x312   :  { %1746 = vmatpush1.bf16.msra.mxu0 %v6644_v49  ;;  %1787 = vmatpush1.bf16.msra.mxu1 %v6646_v50  ;;  %v8337_v49 = vsel %vm6777_vm3, %v6817_v48, %v8336_v47 }
 0x313   :  { %1747 = vmatprep.subr.bf16.mxu0 %v6650_v51  ;;  %1788 = vmatprep.subr.bf16.mxu1 %v6652_v52  ;;  %v8338_v52 = vld [vmem:[#allocation43_spill] sm:$0xff] }
 0x316   :  { %1748 = vmatpush1.bf16.msra.mxu0 %v6658_v53  ;;  %1789 = vmatpush1.bf16.msra.mxu1 %v8331_v19  ;;  %v8339_v53 = vld [vmem:[#allocation34_spill] sm:$0xff] }
 0x317   :  { %2050 = vmatprep.subr.bf16.mxu0 %v7032_v12  ;;  %2091 = vmatprep.subr.bf16.mxu1 %v7034_v17 }
 0x3b8   :  { %v1450_v29 = vpop.f32.mrf.mxu0  ;;  %v1491_v32 = vpop.f32.mrf.mxu1 }
 0x3b9   :  { %v1498_v34 = vadd.f32 %v1450_v29, %v6843_v13  ;;  %v1500_v50 = vadd.f32 %v1491_v32, %v8337_v49  ;;  %v8340_v13 = vsel %vm6789_vm5, %v8338_v52, %v8339_v53  ;;  %v7154_v49 = vld [vmem:[#allocation11 + $0x24] ss:$16 sps:$4 sm:$0xff]  }
 0x3ba   :  { %v1452_v36 = vpop.f32.mrf.mxu0  ;;  %v1493_v37 = vpop.f32.mrf.mxu1 }
 0x3bb   :  { %v5245_v38 = vmul.f32 -1.442695, %v1498_v34  ;;  %v1499_v41 = vadd.f32 %v1452_v36, %v8335_v40  ;;  %v5247_v51 = vmul.f32 -1.442695, %v1500_v50  ;;  %v1501_v19 = vadd.f32 %v1493_v37, %v8340_v13  ;;  %v7126_v36 = vld [vmem:[#allocation11 + $0xa8] ss:$16 sps:$4 sm:$0xff]  }
 0x3bc   :  { %v1454_v42 = vpop.f32.mrf.mxu0  ;;  %v1495_v43 = vpop.f32.mrf.mxu1  ;;  %v7130_v37 = vld [vmem:[#allocation11 + $0x8c] ss:$16 sps:$4 sm:$0xff]   ;;  %v7134_v40 = vld [vmem:[#allocation11 + $0x60] ss:$16 sps:$4 sm:$0xff]   ;;  %v7157_v50 = vld [vmem:[#allocation11 + $0x48] ss:$16 sps:$4 sm:$0xff]  }
 0x3bd   :  { %5953 = vpow2.f32 %v5245_v38  ;;  %v5246_v44 = vmul.f32 -1.442695, %v1499_v41  ;;  %v7132_v38 = vld [vmem:[#allocation11 + $0x88] ss:$16 sps:$4 sm:$0xff]   ;;  %v7136_v41 = vld [vmem:[#allocation11 + $0x64] ss:$16 sps:$4 sm:$0xff]  }
 0x3be   :  { %v1455_v45 = vpop.f32.mrf.mxu0  ;;  %v1496_v46 = vpop.f32.mrf.mxu1  ;;  %v7139_v42 = vld [vmem:[#allocation11 + $0x6c] ss:$16 sps:$4 sm:$0xff]   ;;  %v7143_v43 = vld [vmem:[#allocation11 + $0x68] ss:$16 sps:$4 sm:$0xff]  }
 0x3bf   :  { %5955 = vpow2.f32 %v5246_v44  ;;  %v7145_v44 = vld [vmem:[#allocation11 + $0x44] ss:$16 sps:$4 sm:$0xff]   ;;  %v7149_v45 = vld [vmem:[#allocation11 + $0x40] ss:$16 sps:$4 sm:$0xff]   ;;  %v7151_v46 = vld [vmem:[#allocation11 + $0x4c] ss:$16 sps:$4 sm:$0xff]  }
 0x3c0   :  { %5957 = vpow2.f32 %v5247_v51  ;;  %v7161_v51 = vld [vmem:[#allocation11 + $0x20] ss:$16 sps:$4 sm:$0xff]   ;;  %v7163_v13 = vld [vmem:[#allocation11 + $0x2c] ss:$16 sps:$4 sm:$0xff]  }
 0x3c1   :  { %5959 = vtanh.f32 %v1501_v19  ;;  %v7166_v19 = vld [vmem:[#allocation11 + $0x4] ss:$16 sps:$4 sm:$0xff]  }
 0x3ca   :  { %v5954_v7 = vpop.eup %5953 }
 0x3cb   :  { %v1511_v2 = vadd.f32 1.0, %v5954_v7  ;;  %v7169_v7 = vld [vmem:[#allocation11 + $0x28] ss:$16 sps:$4 sm:$0xff]  }
 0x3cc   :  { %v5956_v9 = vpop.eup %5955 }
 0x3cd   :  { %5961 = vrcp.f32 %v1511_v2  ;;  %v1512_v0 = vadd.f32 1.0, %v5956_v9  ;;  %v5958_v8 = vpop.eup %5957  ;;  %v7173_v2 = vld [vmem:[#allocation11] ss:$16 sps:$4 sm:$0xff]   ;;  %v7175_v9 = vld [vmem:[#allocation11 + $0xc] ss:$16 sps:$4 sm:$0xff]  }
 0x3ce   :  { %v5960_v20 = vpop.eup %5959  ;;  %v1513_v27 = vadd.f32 1.0, %v5958_v8 }
 0x3cf   :  { %5963 = vrcp.f32 %v1512_v0  ;;  %v7179_v0 = vld [vmem:[#allocation11 + $0x8] ss:$16 sps:$4 sm:$0xff]  }
 0x3d0   :  { %5965 = vrcp.f32 %v1513_v27 }
 0x3da   :  { %v5962_v21 = vpop.eup %5961 }
 0x3db   :  { %v1522_v22 = vmul.f32 %v5962_v21, %v5960_v20  ;;  %v8341_v21 = vld [vmem:[#allocation41_spill] sm:$0xff] }
 0x3dc   :  { %v5964_v26 = vpop.eup %5963 }
 0x3dd   :  { %v1521_v31 = vmul.f32 %v5964_v26, %v7025_v28  ;;  %v5966_v35 = vpop.eup %5965  ;;  %v7124_v28 = vld [vmem:[#allocation11 + $0xac] ss:$16 sps:$4 sm:$0xff]  }
 0x3df   :  { %v7107_v33 = vadd.f32 %v1522_v22, %v1521_v31 }
 0x3e1   :  { %5967 = vtanh.f32 %v7107_v33 }
 0x3ee   :  { %v5968_v29 = vpop.eup %5967 }
 0x3ef   :  { %v1525_v32 = vmul.f32 %v5968_v29, %v5966_v35  ;;  %v8342_v35 = vld [vmem:[#allocation39_spill] sm:$0xff]  ;;  %v8343_v29 = vld [vmem:[#allocation36_spill] sm:$0xff] }
 0x3f1   :  { %v1526_v34 = vpack.c.bf16 %v1525_v32, %v1525_v32  ;;  %v8344_v32 = vsel %vm6785_vm4, %v8342_v35, %v8343_v29 }
 0x3f3   :  { %1527 = vst.msk [vmem:[#allocation4 + $0x8] sm:$0xf] %vm891_vm6, %v1526_v34  ;;  %1766 = vmatmul.mubr.bf16.vlgmr.msra.gmra.mxu0 %v1526_v34  ;;  %1807 = vmatmul.mubr.bf16.vlgmr.msra.gmra.mxu1 %v1526_v34 }
 0x3f4   :  { %1528 = vst.msk [vmem:[#allocation4 + $0x14] sm:$0xf] %vm893_vm7, %v1526_v34  ;;  %2051 = vmatpush1.bf16.msra.mxu0 %v7036_v6  ;;  %2092 = vmatpush1.bf16.msra.mxu1 %v7038_v60 }
 0x3f5   :  { %2052 = vmatprep.subr.bf16.mxu0 %v7044_v56  ;;  %2093 = vmatprep.subr.bf16.mxu1 %v7046_v23 }
 0x3f6   :  { %2082 = vmatprep.mubr.bf16.mxu0 %v8330_v59  ;;  %2123 = vmatprep.mubr.bf16.mxu1 %v8330_v59 }
 0x3f8   :  { %2053 = vmatpush1.bf16.msra.mxu0 %v7048_v63  ;;  %2094 = vmatpush1.bf16.msra.mxu1 %v7050_v5 }
 0x3f9   :  { %2054 = vmatprep.subr.bf16.mxu0 %v7056_v3  ;;  %2095 = vmatprep.subr.bf16.mxu1 %v7124_v28 }
 0x3fc   :  { %2055 = vmatpush1.bf16.msra.mxu0 %v7059_v1  ;;  %2096 = vmatpush1.bf16.msra.mxu1 %v7126_v36 }
 0x3fd   :  { %2056 = vmatprep.subr.bf16.mxu0 %v7064_v4  ;;  %2097 = vmatprep.subr.bf16.mxu1 %v7130_v37 }
 0x400   :  { %2057 = vmatpush1.bf16.msra.mxu0 %v7067_v24  ;;  %2098 = vmatpush1.bf16.msra.mxu1 %v7132_v38 }
 0x401   :  { %2058 = vmatprep.subr.bf16.mxu0 %v7136_v41  ;;  %2099 = vmatprep.subr.bf16.mxu1 %v7139_v42 }
 0x404   :  { %2059 = vmatpush1.bf16.msra.mxu0 %v7134_v40  ;;  %2100 = vmatpush1.bf16.msra.mxu1 %v7143_v43 }
 0x405   :  { %2060 = vmatprep.subr.bf16.mxu0 %v7145_v44  ;;  %2101 = vmatprep.subr.bf16.mxu1 %v7151_v46 }
 0x408   :  { %2061 = vmatpush1.bf16.msra.mxu0 %v7149_v45  ;;  %2102 = vmatpush1.bf16.msra.mxu1 %v7157_v50 }
 0x409   :  { %2062 = vmatprep.subr.bf16.mxu0 %v7154_v49  ;;  %2103 = vmatprep.subr.bf16.mxu1 %v7163_v13 }
 0x40c   :  { %2063 = vmatpush1.bf16.msra.mxu0 %v7161_v51  ;;  %2104 = vmatpush1.bf16.msra.mxu1 %v7169_v7 }
 0x40d   :  { %2064 = vmatprep.subr.bf16.mxu0 %v7166_v19  ;;  %2105 = vmatprep.subr.bf16.mxu1 %v7175_v9 }
 0x410   :  { %2065 = vmatpush1.bf16.msra.mxu0 %v7173_v2  ;;  %2106 = vmatpush1.bf16.msra.mxu1 %v7179_v0 }
 0x411   :  { %2367 = vmatprep.subr.bf16.mxu0 %v7032_v12  ;;  %2408 = vmatprep.subr.bf16.mxu1 %v7034_v17 }
 0x4b3   :  { %v1767_v8 = vpop.f32.mrf.mxu0  ;;  %v1808_v20 = vpop.f32.mrf.mxu1 }
 0x4b4   :  { %v1815_v22 = vadd.f32 %v1767_v8, %v8341_v21  ;;  %v8346_v8 = vld [vmem:[#allocation35_spill] sm:$0xff] }
 0x4b5   :  { %v1769_v26 = vpop.f32.mrf.mxu0  ;;  %v1810_v27 = vpop.f32.mrf.mxu1  ;;  %v8347_v21 = vsel %vm6777_vm3, %v8345_v15, %v8346_v8 }
 0x4b6   :  { %v5280_v31 = vmul.f32 -1.442695, %v1815_v22  ;;  %v1816_v34 = vadd.f32 %v1769_v26, %v8344_v32  ;;  %v1817_v39 = vadd.f32 %v1808_v20, %v8347_v21  ;;  %v1818_v26 = vadd.f32 %v1810_v27, %v8350_v14 }
 0x4b7   :  { %v1771_v61 = vpop.f32.mrf.mxu0  ;;  %v1812_v57 = vpop.f32.mrf.mxu1 }
 0x4b8   :  { %5969 = vpow2.f32 %v5280_v31  ;;  %v5281_v10 = vmul.f32 -1.442695, %v1816_v34  ;;  %v5282_v22 = vmul.f32 -1.442695, %v1817_v39 }
 0x4b9   :  { %v1772_v25 = vpop.f32.mrf.mxu0  ;;  %v1813_v18 = vpop.f32.mrf.mxu1 }
 0x4ba   :  { %5971 = vpow2.f32 %v5281_v10 }
 0x4bb   :  { %5973 = vpow2.f32 %v5282_v22 }
 0x4bc   :  { %5975 = vtanh.f32 %v1818_v26 }
 0x4c5   :  { %v5970_v61 = vpop.eup %5969 }
 0x4c6   :  { %v1828_v57 = vadd.f32 1.0, %v5970_v61 }
 0x4c7   :  { %v5972_v31 = vpop.eup %5971 }
 0x4c8   :  { %5977 = vrcp.f32 %v1828_v57  ;;  %v1829_v18 = vadd.f32 1.0, %v5972_v31  ;;  %v5974_v10 = vpop.eup %5973  ;;  %v8351_v57 = vld [vmem:[#allocation42_spill] sm:$0xff] }
 0x4c9   :  { %v5976_v25 = vpop.eup %5975  ;;  %v1830_v39 = vadd.f32 1.0, %v5974_v10 }
 0x4ca   :  { %5979 = vrcp.f32 %v1829_v18 }
 0x4cb   :  { %5981 = vrcp.f32 %v1830_v39 }
 0x4d5   :  { %v5978_v32 = vpop.eup %5977 }
 0x4d6   :  { %v1839_v34 = vmul.f32 %v5978_v32, %v5976_v25  ;;  %v8352_v32 = vsel %vm6785_vm4, %v8343_v29, %v8342_v35  ;;  %v8354_v35 = vsel %vm6789_vm5, %v8349_v54, %v8348_v11 }
 0x4d7   :  { %v5980_v20 = vpop.eup %5979 }
 0x4d8   :  { %v1838_v21 = vmul.f32 %v5980_v20, %v7107_v33  ;;  %v5982_v14 = vpop.eup %5981 }
 0x4da   :  { %v7203_v52 = vadd.f32 %v1839_v34, %v1838_v21 }
 0x4dc   :  { %5983 = vtanh.f32 %v7203_v52 }
 0x4e9   :  { %v5984_v27 = vpop.eup %5983 }
 0x4ea   :  { %v1842_v22 = vmul.f32 %v5984_v27, %v5982_v14 }
 0x4ec   :  { %v1843_v26 = vpack.c.bf16 %v1842_v22, %v1842_v22 }
 0x4ee   :  { %1844 = vst.msk [vmem:[#allocation4 + $0xc] sm:$0xf] %vm891_vm6, %v1843_v26  ;;  %2083 = vmatmul.mubr.bf16.vlgmr.msra.gmra.mxu0 %v1843_v26  ;;  %2124 = vmatmul.mubr.bf16.vlgmr.msra.gmra.mxu1 %v1843_v26 }
 0x4ef   :  { %1845 = vst.msk [vmem:[#allocation4 + $0x10] sm:$0xf] %vm893_vm7, %v1843_v26  ;;  %2368 = vmatpush1.bf16.msra.mxu0 %v7036_v6  ;;  %2409 = vmatpush1.bf16.msra.mxu1 %v7038_v60 }
 0x4f0   :  { %2369 = vmatprep.subr.bf16.mxu0 %v7044_v56  ;;  %2410 = vmatprep.subr.bf16.mxu1 %v7046_v23 }
 0x4f1   :  { %2399 = vmatprep.mubr.bf16.mxu0 %v8330_v59  ;;  %2440 = vmatprep.mubr.bf16.mxu1 %v8330_v59 }
 0x4f3   :  { %2370 = vmatpush1.bf16.msra.mxu0 %v7048_v63  ;;  %2411 = vmatpush1.bf16.msra.mxu1 %v7050_v5 }
 0x4f4   :  { %2371 = vmatprep.subr.bf16.mxu0 %v7056_v3  ;;  %2412 = vmatprep.subr.bf16.mxu1 %v7124_v28 }
 0x4f7   :  { %2372 = vmatpush1.bf16.msra.mxu0 %v7059_v1  ;;  %2413 = vmatpush1.bf16.msra.mxu1 %v7126_v36 }
 0x4f8   :  { %2373 = vmatprep.subr.bf16.mxu0 %v7064_v4  ;;  %2414 = vmatprep.subr.bf16.mxu1 %v7130_v37 }
 0x4fb   :  { %2374 = vmatpush1.bf16.msra.mxu0 %v7067_v24  ;;  %2415 = vmatpush1.bf16.msra.mxu1 %v7132_v38 }
 0x4fc   :  { %2375 = vmatprep.subr.bf16.mxu0 %v7136_v41  ;;  %2416 = vmatprep.subr.bf16.mxu1 %v7139_v42 }
 0x4ff   :  { %2376 = vmatpush1.bf16.msra.mxu0 %v7134_v40  ;;  %2417 = vmatpush1.bf16.msra.mxu1 %v7143_v43 }
 0x500   :  { %2377 = vmatprep.subr.bf16.mxu0 %v7145_v44  ;;  %2418 = vmatprep.subr.bf16.mxu1 %v7151_v46 }
 0x503   :  { %2378 = vmatpush1.bf16.msra.mxu0 %v7149_v45  ;;  %2419 = vmatpush1.bf16.msra.mxu1 %v7157_v50 }
 0x504   :  { %2379 = vmatprep.subr.bf16.mxu0 %v7154_v49  ;;  %2420 = vmatprep.subr.bf16.mxu1 %v7163_v13 }
 0x507   :  { %2380 = vmatpush1.bf16.msra.mxu0 %v7161_v51  ;;  %2421 = vmatpush1.bf16.msra.mxu1 %v7169_v7 }
 0x508   :  { %2381 = vmatprep.subr.bf16.mxu0 %v7166_v19  ;;  %2422 = vmatprep.subr.bf16.mxu1 %v7175_v9 }
 0x50b   :  { %2382 = vmatpush1.bf16.msra.mxu0 %v7173_v2  ;;  %2423 = vmatpush1.bf16.msra.mxu1 %v7179_v0 }
 0x50c   :  { %2684 = vmatprep.subr.bf16.mxu0 %v7032_v12  ;;  %2725 = vmatprep.subr.bf16.mxu1 %v7034_v17  ;;  %v8353_v17 = vsel %vm6777_vm3, %v8346_v8, %v8345_v15 }
 0x5ae   :  { %v2084_v33 = vpop.f32.mrf.mxu0  ;;  %v2125_v61 = vpop.f32.mrf.mxu1 }
 0x5af   :  { %v2132_v31 = vadd.f32 %v2084_v33, %v8351_v57  ;;  %v2134_v27 = vadd.f32 %v2125_v61, %v8353_v17  ;;  %v8357_v17 = vsel %vm6777_vm3, %v8336_v47, %v6817_v48 }
 0x5b0   :  { %v2086_v18 = vpop.f32.mrf.mxu0  ;;  %v2127_v10 = vpop.f32.mrf.mxu1 }
 0x5b1   :  { %v5315_v25 = vmul.f32 -1.442695, %v2132_v31  ;;  %v2133_v34 = vadd.f32 %v2086_v18, %v8352_v32  ;;  %v5317_v22 = vmul.f32 -1.442695, %v2134_v27  ;;  %v2135_v29 = vadd.f32 %v2127_v10, %v8354_v35  ;;  %v8358_v35 = vld [vmem:[#allocation43_spill] sm:$0xff] }
 0x5b2   :  { %v2088_v20 = vpop.f32.mrf.mxu0  ;;  %v2129_v39 = vpop.f32.mrf.mxu1 }
 0x5b3   :  { %5985 = vpow2.f32 %v5315_v25  ;;  %v5316_v21 = vmul.f32 -1.442695, %v2133_v34 }
 0x5b4   :  { %v2089_v12 = vpop.f32.mrf.mxu0  ;;  %v2130_v14 = vpop.f32.mrf.mxu1 }
 0x5b5   :  { %5987 = vpow2.f32 %v5316_v21 }
 0x5b6   :  { %5989 = vpow2.f32 %v5317_v22 }
 0x5b7   :  { %5991 = vtanh.f32 %v2135_v29 }
 0x5c0   :  { %v5986_v26 = vpop.eup %5985 }
 0x5c1   :  { %v2145_v33 = vadd.f32 1.0, %v5986_v26 }
 0x5c2   :  { %v5988_v57 = vpop.eup %5987 }
 0x5c3   :  { %5993 = vrcp.f32 %v2145_v33  ;;  %v2146_v31 = vadd.f32 1.0, %v5988_v57  ;;  %v5990_v18 = vpop.eup %5989 }
 0x5c4   :  { %v5992_v25 = vpop.eup %5991  ;;  %v2147_v61 = vadd.f32 1.0, %v5990_v18 }
 0x5c5   :  { %5995 = vrcp.f32 %v2146_v31 }
 0x5c6   :  { %5997 = vrcp.f32 %v2147_v61 }
 0x5d0   :  { %v5994_v32 = vpop.eup %5993 }
 0x5d1   :  { %v2156_v15 = vmul.f32 %v5994_v32, %v5992_v25 }
 0x5d2   :  { %v5996_v8 = vpop.eup %5995 }
 0x5d3   :  { %v2155_v34 = vmul.f32 %v5996_v8, %v7203_v52  ;;  %v5998_v11 = vpop.eup %5997 }
 0x5d5   :  { %v7259_v20 = vadd.f32 %v2156_v15, %v2155_v34 }
 0x5d7   :  { %5999 = vtanh.f32 %v7259_v20 }
 0x5e4   :  { %v6000_v54 = vpop.eup %5999 }
 0x5e5   :  { %v2159_v10 = vmul.f32 %v6000_v54, %v5998_v11  ;;  %v5774_v54 = vld [vmem:[#allocation11 + $0xec] ss:$16 sps:$4 sm:$0xff]  }
 0x5e7   :  { %v2160_v39 = vpack.c.bf16 %v2159_v10, %v2159_v10  ;;  %v5769_v10 = vld [vmem:[#allocation11 + $0xe0] ss:$16 sps:$4 sm:$0xff]  }
 0x5e9   :  { %2161 = vst.msk [vmem:[#allocation4 + $0x10] sm:$0xf] %vm891_vm6, %v2160_v39  ;;  %2400 = vmatmul.mubr.bf16.vlgmr.msra.gmra.mxu0 %v2160_v39  ;;  %2441 = vmatmul.mubr.bf16.vlgmr.msra.gmra.mxu1 %v2160_v39 }
 0x5ea   :  { %2162 = vst.msk [vmem:[#allocation4 + $0xc] sm:$0xf] %vm893_vm7, %v2160_v39  ;;  %2685 = vmatpush1.bf16.msra.mxu0 %v7036_v6  ;;  %2726 = vmatpush1.bf16.msra.mxu1 %v7038_v60  ;;  %v5772_v39 = vld [vmem:[#allocation11 + $0xe8] ss:$16 sps:$4 sm:$0xff]  }
 0x5eb   :  { %2686 = vmatprep.subr.bf16.mxu0 %v7044_v56  ;;  %2727 = vmatprep.subr.bf16.mxu1 %v7046_v23  ;;  %v8355_v56 = vld [vmem:[#allocation44_spill] sm:$0xff] }
 0x5ec   :  { %2716 = vmatprep.mubr.bf16.mxu0 %v8330_v59  ;;  %2757 = vmatprep.mubr.bf16.mxu1 %v8330_v59 }
 0x5ee   :  { %2687 = vmatpush1.bf16.msra.mxu0 %v7048_v63  ;;  %2728 = vmatpush1.bf16.msra.mxu1 %v7050_v5 }
 0x5ef   :  { %2688 = vmatprep.subr.bf16.mxu0 %v7056_v3  ;;  %2729 = vmatprep.subr.bf16.mxu1 %v7124_v28 }
 0x5f2   :  { %2689 = vmatpush1.bf16.msra.mxu0 %v7059_v1  ;;  %2730 = vmatpush1.bf16.msra.mxu1 %v7126_v36  ;;  %v8356_v1 = vsel %vm6785_vm4, %v6761_v55, %v6836_v62  ;;  %v8359_v55 = vsel %vm6789_vm5, %v8339_v53, %v8358_v35 }
 0x5f3   :  { %2690 = vmatprep.subr.bf16.mxu0 %v7064_v4  ;;  %2731 = vmatprep.subr.bf16.mxu1 %v7130_v37 }
 0x5f6   :  { %2691 = vmatpush1.bf16.msra.mxu0 %v7067_v24  ;;  %2732 = vmatpush1.bf16.msra.mxu1 %v7132_v38 }
 0x5f7   :  { %2692 = vmatprep.subr.bf16.mxu0 %v7136_v41  ;;  %2733 = vmatprep.subr.bf16.mxu1 %v7139_v42 }
 0x5fa   :  { %2693 = vmatpush1.bf16.msra.mxu0 %v7134_v40  ;;  %2734 = vmatpush1.bf16.msra.mxu1 %v7143_v43 }
 0x5fb   :  { %2694 = vmatprep.subr.bf16.mxu0 %v7145_v44  ;;  %2735 = vmatprep.subr.bf16.mxu1 %v7151_v46 }
 0x5fe   :  { %2695 = vmatpush1.bf16.msra.mxu0 %v7149_v45  ;;  %2736 = vmatpush1.bf16.msra.mxu1 %v7157_v50 }
 0x5ff   :  { %2696 = vmatprep.subr.bf16.mxu0 %v7154_v49  ;;  %2737 = vmatprep.subr.bf16.mxu1 %v7163_v13 }
 0x602   :  { %2697 = vmatpush1.bf16.msra.mxu0 %v7161_v51  ;;  %2738 = vmatpush1.bf16.msra.mxu1 %v7169_v7 }
 0x603   :  { %2698 = vmatprep.subr.bf16.mxu0 %v7166_v19  ;;  %2739 = vmatprep.subr.bf16.mxu1 %v7175_v9 }
 0x606   :  { %2699 = vmatpush1.bf16.msra.mxu0 %v7173_v2  ;;  %2740 = vmatpush1.bf16.msra.mxu1 %v7179_v0 }
 0x607   :  { %3042 = vmatprep.subr.bf16.mxu1 %v5774_v54  ;;  %v5801_v54 = vld [vmem:[#allocation12 + $0xa4] ss:$16 sps:$4 sm:$0xff]  }
 0x6a9   :  { %v2401_v6 = vpop.f32.mrf.mxu0  ;;  %v2442_v60 = vpop.f32.mrf.mxu1 }
 0x6aa   :  { %v2449_v23 = vadd.f32 %v2401_v6, %v8355_v56  ;;  %v2451_v27 = vadd.f32 %v2442_v60, %v8357_v17  ;;  %v5777_v6 = vld [vmem:[#allocation11 + $0xc4] ss:$16 sps:$4 sm:$0xff]   ;;  %v5780_v60 = vld [vmem:[#allocation11 + $0xcc] ss:$16 sps:$4 sm:$0xff]   ;;  %v5775_v56 = vld [vmem:[#allocation11 + $0xc0] ss:$16 sps:$4 sm:$0xff]  }
 0x6ab   :  { %v2403_v63 = vpop.f32.mrf.mxu0  ;;  %v2444_v5 = vpop.f32.mrf.mxu1 }
 0x6ac   :  { %v5350_v3 = vmul.f32 -1.442695, %v2449_v23  ;;  %v2450_v4 = vadd.f32 %v2403_v63, %v8356_v1  ;;  %v5352_v22 = vmul.f32 -1.442695, %v2451_v27  ;;  %v2452_v62 = vadd.f32 %v2444_v5, %v8359_v55  ;;  %v5778_v23 = vld [vmem:[#allocation11 + $0xc8] ss:$16 sps:$4 sm:$0xff]  }
 0x6ad   :  { %v2405_v24 = vpop.f32.mrf.mxu0  ;;  %v2446_v52 = vpop.f32.mrf.mxu1  ;;  %v5783_v63 = vld [vmem:[#allocation11 + $0xa4] ss:$16 sps:$4 sm:$0xff]   ;;  %v5781_v5 = vld [vmem:[#allocation11 + $0xa0] ss:$16 sps:$4 sm:$0xff]  }
 0x6ae   :  { %6001 = vpow2.f32 %v5350_v3  ;;  %v5351_v21 = vmul.f32 -1.442695, %v2450_v4  ;;  %v5786_v3 = vld [vmem:[#allocation11 + $0x84] ss:$16 sps:$4 sm:$0xff]   ;;  %v5784_v1 = vld [vmem:[#allocation11 + $0x80] ss:$16 sps:$4 sm:$0xff]  }
 0x6af   :  { %v2406_v12 = vpop.f32.mrf.mxu0  ;;  %v2447_v14 = vpop.f32.mrf.mxu1  ;;  %v8367_v24 = vld [vmem:[#allocation32_spill] sm:$0xff]  ;;  %v8368_v52 = vld [vmem:[#allocation47_spill] sm:$0xff] }
 0x6b0   :  { %6003 = vpow2.f32 %v5351_v21  ;;  %v8369_v21 = vsel %vm6789_vm5, %v8367_v24, %v8368_v52  ;;  %v8373_v52 = vld [vmem:[#allocation51_spill] sm:$0xff] }
 0x6b1   :  { %6005 = vpow2.f32 %v5352_v22 }
 0x6b2   :  { %6007 = vtanh.f32 %v2452_v62 }
 0x6bb   :  { %v6002_v29 = vpop.eup %6001 }
 0x6bc   :  { %v2462_v26 = vadd.f32 1.0, %v6002_v29 }
 0x6bd   :  { %v6004_v33 = vpop.eup %6003 }
 0x6be   :  { %6009 = vrcp.f32 %v2462_v26  ;;  %v2463_v57 = vadd.f32 1.0, %v6004_v33  ;;  %v6006_v31 = vpop.eup %6005 }
 0x6bf   :  { %v6008_v18 = vpop.eup %6007  ;;  %v2464_v32 = vadd.f32 1.0, %v6006_v31 }
 0x6c0   :  { %6011 = vrcp.f32 %v2463_v57 }
 0x6c1   :  { %6013 = vrcp.f32 %v2464_v32  ;;  %v5789_v32 = vld [vmem:[#allocation12 + $0xe4] ss:$16 sps:$4 sm:$0xff]  }
 0x6cb   :  { %v6010_v25 = vpop.eup %6009 }
 0x6cc   :  { %v2473_v48 = vmul.f32 %v6010_v25, %v6008_v18 }
 0x6cd   :  { %v6012_v47 = vpop.eup %6011 }
 0x6ce   :  { %v2472_v15 = vmul.f32 %v6012_v47, %v7259_v20  ;;  %v6014_v53 = vpop.eup %6013  ;;  %v5771_v20 = vld [vmem:[#allocation11 + $0xe4] ss:$16 sps:$4 sm:$0xff]  }
 0x6cf   :  { %3001 = vmatprep.subr.bf16.mxu0 %v5771_v20  ;;  %v5796_v20 = vld [vmem:[#allocation12 + $0xc8] ss:$16 sps:$4 sm:$0xff]  }
 0x6d0   :  { %v7313_v8 = vadd.f32 %v2473_v48, %v2472_v15  ;;  %v5792_v15 = vld [vmem:[#allocation12 + $0xec] ss:$16 sps:$4 sm:$0xff]  }
 0x6d2   :  { %6015 = vtanh.f32 %v7313_v8 }
 0x6df   :  { %v6016_v61 = vpop.eup %6015 }
 0x6e0   :  { %v2476_v34 = vmul.f32 %v6016_v61, %v6014_v53  ;;  %v5790_v53 = vld [vmem:[#allocation12 + $0xe8] ss:$16 sps:$4 sm:$0xff]   ;;  %v5795_v61 = vld [vmem:[#allocation12 + $0xc4] ss:$16 sps:$4 sm:$0xff]  }
 0x6e2   :  { %v2477_v11 = vpack.c.bf16 %v2476_v34, %v2476_v34  ;;  %v5798_v34 = vld [vmem:[#allocation12 + $0xcc] ss:$16 sps:$4 sm:$0xff]  }
 0x6e4   :  { %2478 = vst.msk [vmem:[#allocation4 + $0x14] sm:$0xf] %vm891_vm6, %v2477_v11  ;;  %2717 = vmatmul.mubr.bf16.vlgmr.msra.gmra.mxu0 %v2477_v11  ;;  %2758 = vmatmul.mubr.bf16.vlgmr.msra.gmra.mxu1 %v2477_v11 }
 0x6e5   :  { %2479 = vst.msk [vmem:[#allocation4 + $0x8] sm:$0xf] %vm893_vm7, %v2477_v11  ;;  %3033 = vmatprep.mubr.bf16.mxu0 %v8330_v59  ;;  %3074 = vmatprep.mubr.bf16.mxu1 %v8330_v59  ;;  %v5793_v11 = vld [vmem:[#allocation12 + $0xc0] ss:$16 sps:$4 sm:$0xff]  }
 0x6e6   :  { %3002 = vmatpush1.bf16.msra.mxu0 %v5769_v10  ;;  %3043 = vmatpush1.bf16.msra.mxu1 %v5772_v39  ;;  %v5804_v10 = vld [vmem:[#allocation12 + $0xac] ss:$16 sps:$4 sm:$0xff]   ;;  %v5799_v39 = vld [vmem:[#allocation12 + $0xa0] ss:$16 sps:$4 sm:$0xff]  }
 0x6e7   :  { %3003 = vmatprep.subr.bf16.mxu0 %v5777_v6  ;;  %3044 = vmatprep.subr.bf16.mxu1 %v5780_v60  ;;  %v5802_v6 = vld [vmem:[#allocation12 + $0xa8] ss:$16 sps:$4 sm:$0xff]   ;;  %v5807_v60 = vld [vmem:[#allocation12 + $0x84] ss:$16 sps:$4 sm:$0xff]  }
 0x6ea   :  { %3004 = vmatpush1.bf16.msra.mxu0 %v5775_v56  ;;  %3045 = vmatpush1.bf16.msra.mxu1 %v5778_v23  ;;  %v5810_v56 = vld [vmem:[#allocation12 + $0x8c] ss:$16 sps:$4 sm:$0xff]   ;;  %v5805_v23 = vld [vmem:[#allocation12 + $0x80] ss:$16 sps:$4 sm:$0xff]  }
 0x6eb   :  { %3046 = vmatprep.subr.bf16.mxu1 %v7124_v28  ;;  %3005 = vmatprep.subr.bf16.mxu0 %v5783_v63  ;;  %v5808_v63 = vld [vmem:[#allocation12 + $0x88] ss:$16 sps:$4 sm:$0xff]  }
 0x6ee   :  { %3006 = vmatpush1.bf16.msra.mxu0 %v5781_v5  ;;  %3047 = vmatpush1.bf16.msra.mxu1 %v7126_v36  ;;  %v5813_v5 = vld [vmem:[#allocation12 + $0x64] ss:$16 sps:$4 sm:$0xff]  }
 0x6ef   :  { %3048 = vmatprep.subr.bf16.mxu1 %v7130_v37  ;;  %3007 = vmatprep.subr.bf16.mxu0 %v5786_v3  ;;  %v8360_v37 = vld [vmem:[#allocation48_spill] sm:$0xff]  ;;  %v5816_v3 = vld [vmem:[#allocation12 + $0x6c] ss:$16 sps:$4 sm:$0xff]  }
 0x6f2   :  { %3008 = vmatpush1.bf16.msra.mxu0 %v5784_v1  ;;  %3049 = vmatpush1.bf16.msra.mxu1 %v7132_v38  ;;  %v5811_v1 = vld [vmem:[#allocation12 + $0x60] ss:$16 sps:$4 sm:$0xff]  }
 0x6f3   :  { %3009 = vmatprep.subr.bf16.mxu0 %v7136_v41  ;;  %3050 = vmatprep.subr.bf16.mxu1 %v7139_v42 }
 0x6f6   :  { %3010 = vmatpush1.bf16.msra.mxu0 %v7134_v40  ;;  %3051 = vmatpush1.bf16.msra.mxu1 %v7143_v43  ;;  %v8361_v43 = vld [vmem:[#allocation31_spill] sm:$0xff] }
 0x6f7   :  { %3011 = vmatprep.subr.bf16.mxu0 %v7145_v44  ;;  %3052 = vmatprep.subr.bf16.mxu1 %v7151_v46  ;;  %v8362_v44 = vld [vmem:[#allocation46_spill] sm:$0xff] }
 0x6fa   :  { %3012 = vmatpush1.bf16.msra.mxu0 %v7149_v45  ;;  %3053 = vmatpush1.bf16.msra.mxu1 %v7157_v50  ;;  %v8363_v45 = vsel %vm6785_vm4, %v8361_v43, %v8362_v44  ;;  %v5826_v43 = vld [vmem:[#allocation12 + $0x28] ss:$16 sps:$4 sm:$0xff]   ;;  %v5828_v44 = vld [vmem:[#allocation12 + $0x2c] ss:$16 sps:$4 sm:$0xff]  }
 0x6fb   :  { %3013 = vmatprep.subr.bf16.mxu0 %v7154_v49  ;;  %3054 = vmatprep.subr.bf16.mxu1 %v7163_v13 }
 0x6fe   :  { %3014 = vmatpush1.bf16.msra.mxu0 %v7161_v51  ;;  %3055 = vmatpush1.bf16.msra.mxu1 %v7169_v7  ;;  %v8364_v7 = vld [vmem:[#allocation30_spill] sm:$0xff] }
 0x6ff   :  { %3015 = vmatprep.subr.bf16.mxu0 %v7166_v19  ;;  %3056 = vmatprep.subr.bf16.mxu1 %v7175_v9 }
 0x702   :  { %3016 = vmatpush1.bf16.msra.mxu0 %v7173_v2  ;;  %3057 = vmatpush1.bf16.msra.mxu1 %v7179_v0  ;;  %v8365_v2 = vld [vmem:[#allocation45_spill] sm:$0xff] }
 0x703   :  { %v8366_v9 = vsel %vm6777_vm3, %v8364_v7, %v8365_v2  ;;  %3361 = vmatprep.subr.bf16.mxu0 %v5789_v32  ;;  %3434 = vmatprep.subr.bf16.mxu1 %v5792_v15  ;;  %v8372_v2 = vld [vmem:[#allocation55_spill] sm:$0xff] }
 0x7a4   :  { %v2718_v28 = vpop.f32.mrf.mxu0  ;;  %v2759_v36 = vpop.f32.mrf.mxu1 }
 0x7a5   :  { %v2766_v38 = vadd.f32 %v2718_v28, %v8360_v37  ;;  %v2768_v0 = vadd.f32 %v2759_v36, %v8366_v9  ;;  %v5814_v28 = vld [vmem:[#allocation12 + $0x68] ss:$16 sps:$4 sm:$0xff]   ;;  %v5819_v36 = vld [vmem:[#allocation12 + $0x44] ss:$16 sps:$4 sm:$0xff]   ;;  %v5822_v37 = vld [vmem:[#allocation12 + $0x4c] ss:$16 sps:$4 sm:$0xff]  }
 0x7a6   :  { %v2720_v40 = vpop.f32.mrf.mxu0  ;;  %v2761_v41 = vpop.f32.mrf.mxu1 }
 0x7a7   :  { %v5385_v42 = vmul.f32 -1.442695, %v2766_v38  ;;  %v2767_v46 = vadd.f32 %v2720_v40, %v8363_v45  ;;  %v5387_v4 = vmul.f32 -1.442695, %v2768_v0  ;;  %v2769_v12 = vadd.f32 %v2761_v41, %v8369_v21  ;;  %v5817_v38 = vld [vmem:[#allocation12 + $0x40] ss:$16 sps:$4 sm:$0xff]  }
 0x7a8   :  { %v2722_v49 = vpop.f32.mrf.mxu0  ;;  %v2763_v50 = vpop.f32.mrf.mxu1  ;;  %v5820_v40 = vld [vmem:[#allocation12 + $0x48] ss:$16 sps:$4 sm:$0xff]   ;;  %v5825_v41 = vld [vmem:[#allocation12 + $0x24] ss:$16 sps:$4 sm:$0xff]  }
 0x7a9   :  { %6017 = vpow2.f32 %v5385_v42  ;;  %v5386_v51 = vmul.f32 -1.442695, %v2767_v46  ;;  %v5823_v42 = vld [vmem:[#allocation12 + $0x20] ss:$16 sps:$4 sm:$0xff]   ;;  %v5831_v45 = vld [vmem:[#allocation12 + $0x4] ss:$16 sps:$4 sm:$0xff]  }
 0x7aa   :  { %v2723_v13 = vpop.f32.mrf.mxu0  ;;  %v2764_v19 = vpop.f32.mrf.mxu1  ;;  %v5834_v46 = vld [vmem:[#allocation12 + $0xc] ss:$16 sps:$4 sm:$0xff]   ;;  %v5829_v49 = vld [vmem:[#allocation12] ss:$16 sps:$4 sm:$0xff]   ;;  %v5832_v50 = vld [vmem:[#allocation12 + $0x8] ss:$16 sps:$4 sm:$0xff]  }
 0x7ab   :  { %6019 = vpow2.f32 %v5386_v51  ;;  %v7364_v51 = vld [vmem:[#allocation14 + $0xe4] ss:$16 sps:$4 sm:$0xff]   ;;  %v7367_v13 = vld [vmem:[#allocation14 + $0xec] ss:$16 sps:$4 sm:$0xff]  }
 0x7ac   :  { %6021 = vpow2.f32 %v5387_v4  ;;  %8370 = vst [vmem:[#allocation27_spill] sm:$0xff] %v7364_v51  ;;  %8371 = vst [vmem:[#allocation33_spill] sm:$0xff] %v7367_v13  ;;  %v8374_v21 = vld [vmem:[#allocation52_spill] sm:$0xff] }
 0x7ad   :  { %6023 = vtanh.f32 %v2769_v12  ;;  %v8375_v12 = vsel %vm6785_vm4, %v8373_v52, %v8374_v21  ;;  %v7453_v52 = vld [vmem:[#allocation14 + $0x48] ss:$16 sps:$4 sm:$0xff]   ;;  %v7457_v21 = vld [vmem:[#allocation14 + $0x24] ss:$16 sps:$4 sm:$0xff]  }
 0x7b6   :  { %v6018_v14 = vpop.eup %6017 }
 0x7b7   :  { %v2779_v17 = vadd.f32 1.0, %v6018_v14 }
 0x7b8   :  { %v6020_v27 = vpop.eup %6019 }
 0x7b9   :  { %6025 = vrcp.f32 %v2779_v17  ;;  %v2780_v22 = vadd.f32 1.0, %v6020_v27  ;;  %v6022_v35 = vpop.eup %6021 }
 0x7ba   :  { %v6024_v55 = vpop.eup %6023  ;;  %v2781_v33 = vadd.f32 1.0, %v6022_v35 }
 0x7bb   :  { %6027 = vrcp.f32 %v2780_v22 }
 0x7bc   :  { %6029 = vrcp.f32 %v2781_v33 }
 0x7c6   :  { %v6026_v62 = vpop.eup %6025 }
 0x7c7   :  { %v2790_v29 = vmul.f32 %v6026_v62, %v6024_v55  ;;  %v8376_v62 = vld [vmem:[#allocation50_spill] sm:$0xff] }
 0x7c8   :  { %v6028_v26 = vpop.eup %6027 }
 0x7c9   :  { %v2789_v57 = vmul.f32 %v6028_v26, %v7313_v8  ;;  %v6030_v18 = vpop.eup %6029  ;;  %v5787_v8 = vld [vmem:[#allocation12 + $0xe0] ss:$16 sps:$4 sm:$0xff]  }
 0x7cb   :  { %v7357_v31 = vadd.f32 %v2790_v29, %v2789_v57  ;;  %v8377_v29 = vld [vmem:[#allocation49_spill] sm:$0xff] }
 0x7cc   :  { %v8378_v26 = vsel %vm6777_vm3, %v8376_v62, %v8377_v29  ;;  %v7479_v62 = vld [vmem:[#allocation14 + $0x8] ss:$16 sps:$4 sm:$0xff]  }
 0x7cd   :  { %6031 = vtanh.f32 %v7357_v31  ;;  %8383 = vst [vmem:[#allocation41_spill] sm:$0xff] %v7479_v62  ;;  %v3155_v29 = vld [vmem:[%s8208_s6] sm:$0xf] }
 0x7da   :  { %v6032_v25 = vpop.eup %6031 }
 0x7db   :  { %v2793_v48 = vmul.f32 %v6032_v25, %v6030_v18  ;;  %v8379_v18 = vld [vmem:[#allocation54_spill] sm:$0xff]  ;;  %v8380_v25 = vld [vmem:[#allocation53_spill] sm:$0xff] }
 0x7dd   :  { %v2794_v47 = vpack.c.bf16 %v2793_v48, %v2793_v48  ;;  %v8381_v48 = vsel %vm6789_vm5, %v8379_v18, %v8380_v25  ;;  %v8384_v25 = vld [vmem:[#allocation28_spill] sm:$0xff] }
 0x7df   :  { %2795 = vst.msk [vmem:[#allocation4 + $0x18] sm:$0xf] %vm891_vm6, %v2794_v47  ;;  %3034 = vmatmul.mubr.bf16.vlgmr.msra.gmra.mxu0 %v2794_v47  ;;  %3075 = vmatmul.mubr.bf16.vlgmr.msra.gmra.mxu1 %v2794_v47 }
 0x7e0   :  { %2796 = vst.msk [vmem:[#allocation4 + $0x4] sm:$0xf] %vm893_vm7, %v2794_v47  ;;  %3393 = vmatprep.mubr.bf16.mxu0 %v8330_v59  ;;  %3466 = vmatprep.mubr.bf16.mxu1 %v8330_v59 }
 0x7e1   :  { %3362 = vmatpush1.bf16.msra.mxu0 %v5787_v8  ;;  %3435 = vmatpush1.bf16.msra.mxu1 %v5790_v53 }
 0x7e2   :  { %3363 = vmatprep.subr.bf16.mxu0 %v5795_v61  ;;  %3436 = vmatprep.subr.bf16.mxu1 %v5798_v34 }
 0x7e5   :  { %3364 = vmatpush1.bf16.msra.mxu0 %v5793_v11  ;;  %3437 = vmatpush1.bf16.msra.mxu1 %v5796_v20 }
 0x7e6   :  { %3365 = vmatprep.subr.bf16.mxu0 %v5801_v54  ;;  %3438 = vmatprep.subr.bf16.mxu1 %v5804_v10 }
 0x7e9   :  { %3366 = vmatpush1.bf16.msra.mxu0 %v5799_v39  ;;  %3439 = vmatpush1.bf16.msra.mxu1 %v5802_v6 }
 0x7ea   :  { %3367 = vmatprep.subr.bf16.mxu0 %v5807_v60  ;;  %3440 = vmatprep.subr.bf16.mxu1 %v5810_v56 }
 0x7ed   :  { %3368 = vmatpush1.bf16.msra.mxu0 %v5805_v23  ;;  %3441 = vmatpush1.bf16.msra.mxu1 %v5808_v63 }
 0x7ee   :  { %3369 = vmatprep.subr.bf16.mxu0 %v5813_v5  ;;  %3442 = vmatprep.subr.bf16.mxu1 %v5816_v3  ;;  %v7389_v5 = vld [vmem:[#allocation14 + $0xe0] ss:$16 sps:$4 sm:$0xff]   ;;  %v7391_v3 = vld [vmem:[#allocation14 + $0xe8] ss:$16 sps:$4 sm:$0xff]  }
 0x7f1   :  { %3370 = vmatpush1.bf16.msra.mxu0 %v5811_v1  ;;  %3443 = vmatpush1.bf16.msra.mxu1 %v5814_v28  ;;  %v7393_v1 = vld [vmem:[#allocation14 + $0xc4] ss:$16 sps:$4 sm:$0xff]   ;;  %v7395_v28 = vld [vmem:[#allocation14 + $0xcc] ss:$16 sps:$4 sm:$0xff]  }
 0x7f2   :  { %3371 = vmatprep.subr.bf16.mxu0 %v5819_v36  ;;  %3444 = vmatprep.subr.bf16.mxu1 %v5822_v37  ;;  %v7399_v36 = vld [vmem:[#allocation14 + $0xc0] ss:$16 sps:$4 sm:$0xff]   ;;  %v7401_v37 = vld [vmem:[#allocation14 + $0xc8] ss:$16 sps:$4 sm:$0xff]  }
 0x7f5   :  { %3372 = vmatpush1.bf16.msra.mxu0 %v5817_v38  ;;  %3445 = vmatpush1.bf16.msra.mxu1 %v5820_v40  ;;  %v7405_v38 = vld [vmem:[#allocation14 + $0xa4] ss:$16 sps:$4 sm:$0xff]   ;;  %v7407_v40 = vld [vmem:[#allocation14 + $0xac] ss:$16 sps:$4 sm:$0xff]  }
 0x7f6   :  { %3373 = vmatprep.subr.bf16.mxu0 %v5825_v41  ;;  %3446 = vmatprep.subr.bf16.mxu1 %v5828_v44  ;;  %v7413_v41 = vld [vmem:[#allocation14 + $0xa0] ss:$16 sps:$4 sm:$0xff]   ;;  %v7419_v44 = vld [vmem:[#allocation14 + $0x84] ss:$16 sps:$4 sm:$0xff]  }
 0x7f9   :  { %3374 = vmatpush1.bf16.msra.mxu0 %v5823_v42  ;;  %3447 = vmatpush1.bf16.msra.mxu1 %v5826_v43  ;;  %v7415_v42 = vld [vmem:[#allocation14 + $0xa8] ss:$16 sps:$4 sm:$0xff]   ;;  %v5850_v43 = vld [vmem:[#allocation4 + $0x8] sm:$0xff]  }
 0x7fa   :  { %3375 = vmatprep.subr.bf16.mxu0 %v5831_v45  ;;  %3448 = vmatprep.subr.bf16.mxu1 %v5834_v46  ;;  %v7421_v45 = vld [vmem:[#allocation14 + $0x8c] ss:$16 sps:$4 sm:$0xff]   ;;  %v7425_v46 = vld [vmem:[#allocation14 + $0x80] ss:$16 sps:$4 sm:$0xff]  }
 0x7fd   :  { %3376 = vmatpush1.bf16.msra.mxu0 %v5829_v49  ;;  %3449 = vmatpush1.bf16.msra.mxu1 %v5832_v50  ;;  %v7427_v49 = vld [vmem:[#allocation14 + $0x88] ss:$16 sps:$4 sm:$0xff]   ;;  %v7431_v50 = vld [vmem:[#allocation14 + $0x64] ss:$16 sps:$4 sm:$0xff]  }
 0x7fe   :  { %3743 = vmatprep.subr.bf16.mxu0 %v7364_v51  ;;  %3784 = vmatprep.subr.bf16.mxu1 %v7367_v13 }
 0x89f   :  { %v3035_v19 = vpop.f32.mrf.mxu0  ;;  %v3076_v7 = vpop.f32.mrf.mxu1 }
 0x8a0   :  { %v3083_v9 = vadd.f32 %v3035_v19, %v8372_v2  ;;  %v3085_v33 = vadd.f32 %v3076_v7, %v8378_v26  ;;  %v7433_v19 = vld [vmem:[#allocation14 + $0x6c] ss:$16 sps:$4 sm:$0xff]   ;;  %v7439_v7 = vld [vmem:[#allocation14 + $0x60] ss:$16 sps:$4 sm:$0xff]   ;;  %v7441_v2 = vld [vmem:[#allocation14 + $0x68] ss:$16 sps:$4 sm:$0xff]  }
 0x8a1   :  { %v3037_v0 = vpop.f32.mrf.mxu0  ;;  %v3078_v4 = vpop.f32.mrf.mxu1 }
 0x8a2   :  { %v5420_v24 = vmul.f32 -1.442695, %v3083_v9  ;;  %v3084_v14 = vadd.f32 %v3037_v0, %v8375_v12  ;;  %v5422_v57 = vmul.f32 -1.442695, %v3085_v33  ;;  %v3086_v47 = vadd.f32 %v3078_v4, %v8381_v48  ;;  %v5863_v9 = vld [vmem:[#allocation4 + $0x10] sm:$0xff]  }
 0x8a3   :  { %v3039_v17 = vpop.f32.mrf.mxu0  ;;  %v3080_v27 = vpop.f32.mrf.mxu1  ;;  %v7445_v0 = vld [vmem:[#allocation14 + $0x44] ss:$16 sps:$4 sm:$0xff]   ;;  %v7447_v4 = vld [vmem:[#allocation14 + $0x4c] ss:$16 sps:$4 sm:$0xff]   ;;  %v8385_v48 = vsub.s32 0, %v8384_v25 }
 0x8a4   :  { %6033 = vpow2.f32 %v5420_v24  ;;  %v5421_v22 = vmul.f32 -1.442695, %v3084_v14  ;;  %v7451_v24 = vld [vmem:[#allocation14 + $0x40] ss:$16 sps:$4 sm:$0xff]   ;;  %v7459_v12 = vld [vmem:[#allocation14 + $0x2c] ss:$16 sps:$4 sm:$0xff]  }
 0x8a5   :  { %v3040_v35 = vpop.f32.mrf.mxu0  ;;  %v3081_v55 = vpop.f32.mrf.mxu1  ;;  %v7465_v14 = vld [vmem:[#allocation14 + $0x20] ss:$16 sps:$4 sm:$0xff]   ;;  %v7467_v17 = vld [vmem:[#allocation14 + $0x28] ss:$16 sps:$4 sm:$0xff]  }
 0x8a6   :  { %6035 = vpow2.f32 %v5421_v22  ;;  %v7471_v22 = vld [vmem:[#allocation14 + $0x4] ss:$16 sps:$4 sm:$0xff]   ;;  %v7473_v35 = vld [vmem:[#allocation14 + $0xc] ss:$16 sps:$4 sm:$0xff]   ;;  %v7477_v55 = vld [vmem:[#allocation14] ss:$16 sps:$4 sm:$0xff]  }
 0x8a7   :  { %6037 = vpow2.f32 %v5422_v57  ;;  %8382 = vst [vmem:[#allocation34_spill] sm:$0xff] %v7477_v55 }
 0x8a8   :  { %6039 = vtanh.f32 %v3086_v47  ;;  %v7538_v47 = vrot.slane %v3155_v29, %v8385_v48 }
 0x8b1   :  { %v6034_v32 = vpop.eup %6033 }
 0x8b2   :  { %v3096_v15 = vadd.f32 1.0, %v6034_v32  ;;  %v8386_v32 = vsub.s32 2, %v8384_v25 }
 0x8b3   :  { %v6036_v8 = vpop.eup %6035 }
 0x8b4   :  { %6041 = vrcp.f32 %v3096_v15  ;;  %v3097_v53 = vadd.f32 1.0, %v6036_v8  ;;  %v6038_v61 = vpop.eup %6037  ;;  %v7542_v15 = vrot.slane %v3155_v29, %v8386_v32 }
 0x8b5   :  { %v6040_v34 = vpop.eup %6039  ;;  %v3098_v10 = vadd.f32 1.0, %v6038_v61  ;;  %v8387_v61 = vsub.s32 1, %v8384_v25 }
 0x8b6   :  { %6043 = vrcp.f32 %v3097_v53 }
 0x8b7   :  { %6045 = vrcp.f32 %v3098_v10 }
 0x8c1   :  { %v6042_v11 = vpop.eup %6041 }
 0x8c2   :  { %v3107_v20 = vmul.f32 %v6042_v11, %v6040_v34  ;;  %v7546_v34 = vrot.slane %v3155_v29, %v8387_v61  ;;  %v8388_v11 = vsub.s32 3, %v8384_v25 }
 0x8c3   :  { %v6044_v54 = vpop.eup %6043 }
 0x8c4   :  { %v3106_v39 = vmul.f32 %v6044_v54, %v7357_v31  ;;  %v6046_v60 = vpop.eup %6045 }
 0x8c6   :  { %v3108_v6 = vadd.f32 %v3107_v20, %v3106_v39  ;;  %v7550_v20 = vrot.slane %v3155_v29, %v8388_v11 }
 0x8c8   :  { %6047 = vtanh.f32 %v3108_v6 }
 0x8d5   :  { %v6048_v56 = vpop.eup %6047 }
 0x8d6   :  { %v3110_v23 = vmul.f32 %v6048_v56, %v6046_v60 }
 0x8d8   :  { %v3111_v63 = vpack.c.bf16 %v3110_v23, %v3110_v23 }
 0x8da   :  { %3113 = vst.msk [vmem:[#allocation4] sm:$0xf] %vm893_vm7, %v3111_v63  ;;  %3114 = vst [vmem:[#allocation5] sm:$0xf] %v3111_v63 }
 0x8db   :  { %3112 = vst.msk [vmem:[#allocation4 + $0x1c] sm:$0xf] %vm891_vm6, %v3111_v63 }
 0x8e1   :  { %v5837_v31 = vld [vmem:[#allocation4] sm:$0xff]  }
 0x8e2   :  { %3394 = vmatmul.mubr.bf16.vlgmr.msra.gmra.mxu0 %v5837_v31  ;;  %3467 = vmatmul.mubr.bf16.vlgmr.msra.gmra.mxu1 %v5837_v31  ;;  %v5876_v27 = vld [vmem:[#allocation4 + $0x18] sm:$0xff]  }
 0x8e3   :  { %3744 = vmatpush1.bf16.msra.mxu0 %v7389_v5  ;;  %3785 = vmatpush1.bf16.msra.mxu1 %v7391_v3 }
 0x8e4   :  { %3745 = vmatprep.subr.bf16.mxu0 %v7393_v1  ;;  %3786 = vmatprep.subr.bf16.mxu1 %v7395_v28 }
 0x8e5   :  { %3403 = vmatprep.mubr.bf16.mxu0 %v8330_v59  ;;  %3476 = vmatprep.mubr.bf16.mxu1 %v8330_v59 }
 0x8e7   :  { %3746 = vmatpush1.bf16.msra.mxu0 %v7399_v36  ;;  %3787 = vmatpush1.bf16.msra.mxu1 %v7401_v37 }
 0x8e8   :  { %3747 = vmatprep.subr.bf16.mxu0 %v7405_v38  ;;  %3788 = vmatprep.subr.bf16.mxu1 %v7407_v40 }
 0x8ea   :  { %3404 = vmatmul.mubr.bf16.gmra.mxu0 %v5850_v43  ;;  %3477 = vmatmul.mubr.bf16.gmra.mxu1 %v5850_v43 }
 0x8eb   :  { %3748 = vmatpush1.bf16.msra.mxu0 %v7413_v41  ;;  %3789 = vmatpush1.bf16.msra.mxu1 %v7415_v42 }
 0x8ec   :  { %3749 = vmatprep.subr.bf16.mxu0 %v7419_v44  ;;  %3790 = vmatprep.subr.bf16.mxu1 %v7421_v45 }
 0x8ed   :  { %3413 = vmatprep.mubr.bf16.mxu0 %v8330_v59  ;;  %3486 = vmatprep.mubr.bf16.mxu1 %v8330_v59 }
 0x8ef   :  { %3750 = vmatpush1.bf16.msra.mxu0 %v7425_v46  ;;  %3791 = vmatpush1.bf16.msra.mxu1 %v7427_v49 }
 0x8f0   :  { %3751 = vmatprep.subr.bf16.mxu0 %v7431_v50  ;;  %3792 = vmatprep.subr.bf16.mxu1 %v7433_v19 }
 0x8f2   :  { %3414 = vmatmul.mubr.bf16.gmra.mxu0 %v5863_v9  ;;  %3487 = vmatmul.mubr.bf16.gmra.mxu1 %v5863_v9 }
 0x8f3   :  { %3752 = vmatpush1.bf16.msra.mxu0 %v7439_v7  ;;  %3793 = vmatpush1.bf16.msra.mxu1 %v7441_v2 }
 0x8f4   :  { %3753 = vmatprep.subr.bf16.mxu0 %v7445_v0  ;;  %3794 = vmatprep.subr.bf16.mxu1 %v7447_v4 }
 0x8f5   :  { %3423 = vmatprep.mubr.bf16.mxu0 %v8330_v59  ;;  %3496 = vmatprep.mubr.bf16.mxu1 %v8330_v59 }
 0x8f7   :  { %3754 = vmatpush1.bf16.msra.mxu0 %v7451_v24  ;;  %3795 = vmatpush1.bf16.msra.mxu1 %v7453_v52 }
 0x8f8   :  { %3755 = vmatprep.subr.bf16.mxu0 %v7457_v21  ;;  %3796 = vmatprep.subr.bf16.mxu1 %v7459_v12 }
 0x8fa   :  { %3424 = vmatmul.mubr.bf16.gmra.mxu0 %v5876_v27  ;;  %3497 = vmatmul.mubr.bf16.gmra.mxu1 %v5876_v27 }
 0x8fb   :  { %3756 = vmatpush1.bf16.msra.mxu0 %v7465_v14  ;;  %3797 = vmatpush1.bf16.msra.mxu1 %v7467_v17 }
 0x8fc   :  { %3757 = vmatprep.subr.bf16.mxu0 %v7471_v22  ;;  %3798 = vmatprep.subr.bf16.mxu1 %v7473_v35 }
 0x8fd   :  { %3775 = vmatprep.mubr.bf16.mxu0 %v8330_v59  ;;  %3816 = vmatprep.mubr.bf16.mxu1 %v8330_v59 }
 0x8ff   :  { %3758 = vmatpush1.bf16.msra.mxu0 %v7477_v55  ;;  %3799 = vmatpush1.bf16.msra.mxu1 %v7479_v62 }
 0x900   :  { %3866 = vmatprep.subr.bf16.mxu0 %v7364_v51  ;;  %3907 = vmatprep.subr.bf16.mxu1 %v7367_v13 }
 0x902   :  { %3776 = vmatmul.mubr.bf16.vlgmr.msra.gmra.mxu0 %v8330_v59  ;;  %3817 = vmatmul.mubr.bf16.vlgmr.msra.gmra.mxu1 %v8330_v59 }
 0x903   :  { %3867 = vmatpush1.bf16.msra.mxu0 %v7389_v5  ;;  %3908 = vmatpush1.bf16.msra.mxu1 %v7391_v3 }
 0x904   :  { %3868 = vmatprep.subr.bf16.mxu0 %v7393_v1  ;;  %3909 = vmatprep.subr.bf16.mxu1 %v7395_v28 }
 0x905   :  { %3898 = vmatprep.mubr.bf16.mxu0 %v8330_v59  ;;  %3939 = vmatprep.mubr.bf16.mxu1 %v8330_v59 }
 0x907   :  { %3869 = vmatpush1.bf16.msra.mxu0 %v7399_v36  ;;  %3910 = vmatpush1.bf16.msra.mxu1 %v7401_v37 }
 0x908   :  { %3870 = vmatprep.subr.bf16.mxu0 %v7405_v38  ;;  %3911 = vmatprep.subr.bf16.mxu1 %v7407_v40 }
 0x90b   :  { %3871 = vmatpush1.bf16.msra.mxu0 %v7413_v41  ;;  %3912 = vmatpush1.bf16.msra.mxu1 %v7415_v42 }
 0x90c   :  { %3872 = vmatprep.subr.bf16.mxu0 %v7419_v44  ;;  %3913 = vmatprep.subr.bf16.mxu1 %v7421_v45 }
 0x90f   :  { %3873 = vmatpush1.bf16.msra.mxu0 %v7425_v46  ;;  %3914 = vmatpush1.bf16.msra.mxu1 %v7427_v49 }
 0x910   :  { %3874 = vmatprep.subr.bf16.mxu0 %v7431_v50  ;;  %3915 = vmatprep.subr.bf16.mxu1 %v7433_v19 }
 0x913   :  { %3875 = vmatpush1.bf16.msra.mxu0 %v7439_v7  ;;  %3916 = vmatpush1.bf16.msra.mxu1 %v7441_v2 }
 0x914   :  { %3876 = vmatprep.subr.bf16.mxu0 %v7445_v0  ;;  %3917 = vmatprep.subr.bf16.mxu1 %v7447_v4 }
 0x917   :  { %3877 = vmatpush1.bf16.msra.mxu0 %v7451_v24  ;;  %3918 = vmatpush1.bf16.msra.mxu1 %v7453_v52 }
 0x918   :  { %3878 = vmatprep.subr.bf16.mxu0 %v7457_v21  ;;  %3919 = vmatprep.subr.bf16.mxu1 %v7459_v12 }
 0x91b   :  { %3879 = vmatpush1.bf16.msra.mxu0 %v7465_v14  ;;  %3920 = vmatpush1.bf16.msra.mxu1 %v7467_v17 }
 0x91c   :  { %3880 = vmatprep.subr.bf16.mxu0 %v7471_v22  ;;  %3921 = vmatprep.subr.bf16.mxu1 %v7473_v35 }
 0x91f   :  { %3881 = vmatpush1.bf16.msra.mxu0 %v7477_v55  ;;  %3922 = vmatpush1.bf16.msra.mxu1 %v7479_v62 }
 0x920   :  { %3989 = vmatprep.subr.bf16.mxu0 %v7364_v51  ;;  %4030 = vmatprep.subr.bf16.mxu1 %v7367_v13 }
 0x9a2   :  { %v7528_v26 = vpop.f32.mrf.mxu0  ;;  %v7530_v33 = vpop.f32.mrf.mxu1 }
 0x9a4   :  { %v7532_v57 = vpop.f32.mrf.mxu0  ;;  %v7534_v18 = vpop.f32.mrf.mxu1 }
 0x9a6   :  { %v3399_v8 = vpop.f32.mrf.mxu0  ;;  %v3472_v53 = vpop.f32.mrf.mxu1 }
 0x9a7   :  { %v7553_v54 = vadd.f32 %v3399_v8, %v7538_v47  ;;  %v7556_v10 = vadd.f32 %v3472_v53, %v7542_v15 }
 0x9a8   :  { %v3401_v39 = vpop.f32.mrf.mxu0  ;;  %v3474_v6 = vpop.f32.mrf.mxu1 }
 0x9a9   :  { %8389 = vst [vmem:[#allocation39_spill] sm:$0xff] %v7556_v10  ;;  %v7559_v60 = vadd.f32 %v3401_v39, %v7546_v34  ;;  %v7562_v56 = vadd.f32 %v3474_v6, %v7550_v20 }
 0x9aa   :  { %v3405_v23 = vpop.f32.mrf.mxu0  ;;  %v3478_v63 = vpop.f32.mrf.mxu1 }
 0x9ab   :  { %8390 = vst [vmem:[#allocation36_spill] sm:$0xff] %v7562_v56  ;;  %v3406_v31 = vadd.f32 %v3405_v23, %v7538_v47  ;;  %v7566_v43 = vadd.f32 %v3478_v63, %v7542_v15 }
 0x9ac   :  { %v3407_v9 = vpop.f32.mrf.mxu0  ;;  %v3480_v27 = vpop.f32.mrf.mxu1 }
 0x9ad   :  { %8391 = vst [vmem:[#allocation38_spill] sm:$0xff] %v7566_v43  ;;  %v7569_v29 = vadd.f32 %v3407_v9, %v7546_v34  ;;  %v7572_v25 = vadd.f32 %v3480_v27, %v7550_v20 }
 0x9ae   :  { %v3409_v48 = vpop.f32.mrf.mxu0  ;;  %v3482_v32 = vpop.f32.mrf.mxu1 }
 0x9af   :  { %8392 = vst [vmem:[#allocation35_spill] sm:$0xff] %v7572_v25  ;;  %v3410_v8 = vadd.f32 %v3409_v48, %v7538_v47  ;;  %v7576_v53 = vadd.f32 %v3482_v32, %v7542_v15 }
 0x9b0   :  { %v3411_v61 = vpop.f32.mrf.mxu0  ;;  %v3484_v11 = vpop.f32.mrf.mxu1 }
 0x9b1   :  { %8393 = vst [vmem:[#allocation40_spill] sm:$0xff] %v7576_v53  ;;  %v7579_v39 = vadd.f32 %v3411_v61, %v7546_v34  ;;  %v7582_v6 = vadd.f32 %v3484_v11, %v7550_v20 }
 0x9b2   :  { %v3415_v23 = vpop.f32.mrf.mxu0  ;;  %v3488_v63 = vpop.f32.mrf.mxu1 }
 0x9b3   :  { %8394 = vst [vmem:[#allocation37_spill] sm:$0xff] %v7579_v39  ;;  %8395 = vst [vmem:[#allocation42_spill] sm:$0xff] %v7582_v6  ;;  %v3416_v9 = vadd.f32 %v3415_v23, %v7538_v47  ;;  %v7586_v27 = vadd.f32 %v3488_v63, %v7542_v15 }
 0x9b4   :  { %v3417_v13 = vpop.f32.mrf.mxu0  ;;  %v3490_v48 = vpop.f32.mrf.mxu1 }
 0x9b5   :  { %8396 = vst [vmem:[#allocation44_spill] sm:$0xff] %v7586_v27  ;;  %v7589_v32 = vadd.f32 %v3417_v13, %v7546_v34  ;;  %v7592_v51 = vadd.f32 %v3490_v48, %v7550_v20  ;;  %v7596_v62 = vsel %vm206_vm2, %v3416_v9, %v3410_v8  ;;  %v7604_v55 = vsel %vm206_vm2, %v3410_v8, %v3416_v9 }
 0x9b6   :  { %8400 = vst [vmem:[#allocation31_spill] sm:$0xff] %v7596_v62  ;;  %v3419_v23 = vpop.f32.mrf.mxu0  ;;  %v3492_v63 = vpop.f32.mrf.mxu1  ;;  %8401 = vst [vmem:[#allocation46_spill] sm:$0xff] %v7604_v55 }
 0x9b7   :  { %8397 = vst [vmem:[#allocation43_spill] sm:$0xff] %v7589_v32  ;;  %8398 = vst [vmem:[#allocation48_spill] sm:$0xff] %v7592_v51  ;;  %v3420_v48 = vadd.f32 %v3419_v23, %v7538_v47  ;;  %v7612_v62 = vadd.f32 %v3492_v63, %v7542_v15  ;;  %v3396_v51 = vadd.f32 %v7528_v26, %v7538_v47 }
 0x9b8   :  { %v3421_v9 = vpop.f32.mrf.mxu0  ;;  %v3494_v55 = vpop.f32.mrf.mxu1 }
 0x9b9   :  { %v7631_v13 = vadd.f32 %v3421_v9, %v7546_v34  ;;  %v7634_v11 = vadd.f32 %v3494_v55, %v7550_v20  ;;  %v7638_v8 = vsel %vm206_vm2, %v3420_v48, %v3406_v31  ;;  %v7646_v63 = vsel %vm206_vm2, %v3406_v31, %v3420_v48 }
 0x9ba   :  { %v3425_v53 = vpop.f32.mrf.mxu0  ;;  %v3498_v27 = vpop.f32.mrf.mxu1  ;;  %8403 = vst [vmem:[#allocation45_spill] sm:$0xff] %v7646_v63 }
 0x9bb   :  { %8402 = vst [vmem:[#allocation30_spill] sm:$0xff] %v7634_v11  ;;  %v3426_v9 = vadd.f32 %v3425_v53, %v7538_v47  ;;  %v7654_v6 = vadd.f32 %v3498_v27, %v7542_v15 }
 0x9bc   :  { %v3427_v48 = vpop.f32.mrf.mxu0  ;;  %v3500_v63 = vpop.f32.mrf.mxu1 }
 0x9bd   :  { %8404 = vst [vmem:[#allocation32_spill] sm:$0xff] %v7654_v6  ;;  %v7673_v55 = vadd.f32 %v3427_v48, %v7546_v34  ;;  %v7676_v23 = vadd.f32 %v3500_v63, %v7550_v20  ;;  %v7681_v31 = vsel %vm206_vm2, %v3426_v9, %v7553_v54  ;;  %v7692_v63 = vsel %vm206_vm2, %v7553_v54, %v3426_v9 }
 0x9be   :  { %v3429_v27 = vpop.f32.mrf.mxu0  ;;  %v3502_v39 = vpop.f32.mrf.mxu1  ;;  %8407 = vst [vmem:[#allocation51_spill] sm:$0xff] %v7692_v63  ;;  %v7712_v9 = vadd.f32 %v7530_v33, %v7542_v15 }
 0x9bf   :  { %8405 = vst [vmem:[#allocation47_spill] sm:$0xff] %v7673_v55  ;;  %8406 = vst [vmem:[#allocation55_spill] sm:$0xff] %v7676_v23  ;;  %v3430_v32 = vadd.f32 %v3429_v27, %v7538_v47  ;;  %v7700_v25 = vadd.f32 %v3502_v39, %v7542_v15  ;;  %v7724_v27 = vadd.f32 %v7532_v57, %v7546_v34 }
 0x9c0   :  { %8409 = vst [vmem:[#allocation50_spill] sm:$0xff] %v7712_v9  ;;  %v3431_v48 = vpop.f32.mrf.mxu0  ;;  %v3504_v53 = vpop.f32.mrf.mxu1  ;;  %v7736_v47 = vadd.f32 %v7534_v18, %v7550_v20 }
 0x9c1   :  { %8408 = vst [vmem:[#allocation52_spill] sm:$0xff] %v7700_v25  ;;  %8410 = vst [vmem:[#allocation49_spill] sm:$0xff] %v7724_v27  ;;  %v7727_v54 = vadd.f32 %v3431_v48, %v7546_v34  ;;  %v7730_v33 = vadd.f32 %v3504_v53, %v7550_v20  ;;  %v3547_v15 = vsel %vm206_vm2, %v3430_v32, %v3396_v51 }
 0x9c2   :  { %8413 = vst [vmem:[#allocation28_spill] sm:$0xff] %v7736_v47  ;;  %v3777_v26 = vpop.f32.mrf.mxu0  ;;  %v3818_v63 = vpop.f32.mrf.mxu1  ;;  %v7740_v39 = vsel %vm206_vm2, %v3396_v51, %v3430_v32  ;;  %v3549_v43 = vsel %vm6777_vm3, %v7700_v25, %v7712_v9 }
 0x9c3   :  { %8411 = vst [vmem:[#allocation54_spill] sm:$0xff] %v7727_v54  ;;  %8412 = vst [vmem:[#allocation53_spill] sm:$0xff] %v7730_v33  ;;  %v3825_v34 = vadd.f32 %v3777_v26, %v3547_v15  ;;  %v3548_v53 = vsel %vm6785_vm4, %v7727_v54, %v7724_v27  ;;  %v3827_v20 = vadd.f32 %v3818_v63, %v3549_v43 }
 0x9c4   :  { %8414 = vst [vmem:[#allocation29_spill] sm:$0xff] %v7740_v39  ;;  %v3779_v48 = vpop.f32.mrf.mxu0  ;;  %v3820_v18 = vpop.f32.mrf.mxu1  ;;  %v3550_v51 = vsel %vm6789_vm5, %v7730_v33, %v7736_v47  ;;  %v8421_v47 = vsel %vm6789_vm5, %v7676_v23, %v7562_v56  ;;  %v8435_v56 = vld [vmem:[#allocation48_spill] sm:$0xff] }
 0x9c5   :  { %v5491_v32 = vmul.f32 -1.442695, %v3825_v34  ;;  %v3826_v61 = vadd.f32 %v3779_v48, %v3548_v53  ;;  %v5493_v34 = vmul.f32 -1.442695, %v3827_v20  ;;  %v3828_v48 = vadd.f32 %v3820_v18, %v3550_v51 }
 0x9c6   :  { %v3781_v26 = vpop.f32.mrf.mxu0  ;;  %v3822_v15 = vpop.f32.mrf.mxu1 }
 0x9c7   :  { %6049 = vpow2.f32 %v5491_v32  ;;  %v5492_v57 = vmul.f32 -1.442695, %v3826_v61 }
 0x9c8   :  { %v3782_v39 = vpop.f32.mrf.mxu0  ;;  %v3823_v11 = vpop.f32.mrf.mxu1 }
 0x9c9   :  { %6051 = vpow2.f32 %v5492_v57  ;;  %v8462_v30 = vld [vmem:[#allocation28_spill] sm:$0xff] }
 0x9ca   :  { %6053 = vpow2.f32 %v5493_v34 }
 0x9d4   :  { %v6050_v53 = vpop.eup %6049 }
 0x9d5   :  { %v3838_v26 = vadd.f32 1.0, %v6050_v53  ;;  %v8416_v53 = vld [vmem:[#allocation41_spill] sm:$0xff] }
 0x9d6   :  { %v6052_v32 = vpop.eup %6051 }
 0x9d7   :  { %6055 = vrcp.f32 %v3838_v26  ;;  %v3839_v11 = vadd.f32 1.0, %v6052_v32  ;;  %v6054_v39 = vpop.eup %6053  ;;  %v8418_v26 = vld [vmem:[#allocation33_spill] sm:$0xff] }
 0x9d8   :  { %6057 = vtanh.f32 %v3828_v48  ;;  %v3840_v43 = vadd.f32 1.0, %v6054_v39  ;;  %v8417_v48 = vld [vmem:[#allocation27_spill] sm:$0xff] }
 0x9d9   :  { %6059 = vrcp.f32 %v3839_v11 }
 0x9da   :  { %6061 = vrcp.f32 %v3840_v43  ;;  %v8419_v43 = vsel %vm6785_vm4, %v7673_v55, %v7559_v60 }
 0x9e4   :  { %v6056_v57 = vpop.eup %6055 }
 0x9e5   :  { %v6058_v61 = vpop.eup %6057 }
 0x9e6   :  { %v6060_v15 = vpop.eup %6059  ;;  %v3849_v25 = vmul.f32 %v6058_v61, %v6056_v57 }
 0x9e7   :  { %v3848_v63 = vmul.f32 0.0, %v6060_v15  ;;  %v6062_v18 = vpop.eup %6061 }
 0x9e9   :  { %v7766_v9 = vadd.f32 %v3849_v25, %v3848_v63  ;;  %v8415_v25 = vld [vmem:[#allocation34_spill] sm:$0xff] }
 0x9eb   :  { %6063 = vtanh.f32 %v7766_v9 }
 0x9f8   :  { %v6064_v20 = vpop.eup %6063 }
 0x9f9   :  { %v3852_v51 = vmul.f32 %v6064_v20, %v6062_v18 }
 0x9fb   :  { %v3853_v34 = vpack.c.bf16 %v3852_v51, %v3852_v51 }
 0x9fd   :  { %3899 = vmatmul.mubr.bf16.vlgmr.msra.gmra.mxu0 %v3853_v34  ;;  %3940 = vmatmul.mubr.bf16.vlgmr.msra.gmra.mxu1 %v3853_v34 }
 0x9fe   :  { %3990 = vmatpush1.bf16.msra.mxu0 %v7389_v5  ;;  %4031 = vmatpush1.bf16.msra.mxu1 %v7391_v3 }
 0x9ff   :  { %3991 = vmatprep.subr.bf16.mxu0 %v7393_v1  ;;  %4032 = vmatprep.subr.bf16.mxu1 %v7395_v28 }
 0xa00   :  { %4021 = vmatprep.mubr.bf16.mxu0 %v8330_v59  ;;  %4062 = vmatprep.mubr.bf16.mxu1 %v8330_v59 }
 0xa02   :  { %3992 = vmatpush1.bf16.msra.mxu0 %v7399_v36  ;;  %4033 = vmatpush1.bf16.msra.mxu1 %v7401_v37 }
 0xa03   :  { %3993 = vmatprep.subr.bf16.mxu0 %v7405_v38  ;;  %4034 = vmatprep.subr.bf16.mxu1 %v7407_v40 }
 0xa06   :  { %3994 = vmatpush1.bf16.msra.mxu0 %v7413_v41  ;;  %4035 = vmatpush1.bf16.msra.mxu1 %v7415_v42 }
 0xa07   :  { %3995 = vmatprep.subr.bf16.mxu0 %v7419_v44  ;;  %4036 = vmatprep.subr.bf16.mxu1 %v7421_v45 }
 0xa0a   :  { %3996 = vmatpush1.bf16.msra.mxu0 %v7425_v46  ;;  %4037 = vmatpush1.bf16.msra.mxu1 %v7427_v49 }
 0xa0b   :  { %3997 = vmatprep.subr.bf16.mxu0 %v7431_v50  ;;  %4038 = vmatprep.subr.bf16.mxu1 %v7433_v19 }
 0xa0e   :  { %3998 = vmatpush1.bf16.msra.mxu0 %v7439_v7  ;;  %4039 = vmatpush1.bf16.msra.mxu1 %v7441_v2 }
 0xa0f   :  { %3999 = vmatprep.subr.bf16.mxu0 %v7445_v0  ;;  %4040 = vmatprep.subr.bf16.mxu1 %v7447_v4 }
 0xa12   :  { %4000 = vmatpush1.bf16.msra.mxu0 %v7451_v24  ;;  %4041 = vmatpush1.bf16.msra.mxu1 %v7453_v52 }
 0xa13   :  { %4001 = vmatprep.subr.bf16.mxu0 %v7457_v21  ;;  %4042 = vmatprep.subr.bf16.mxu1 %v7459_v12 }
 0xa16   :  { %4002 = vmatpush1.bf16.msra.mxu0 %v7465_v14  ;;  %4043 = vmatpush1.bf16.msra.mxu1 %v7467_v17 }
 0xa17   :  { %4003 = vmatprep.subr.bf16.mxu0 %v7471_v22  ;;  %4044 = vmatprep.subr.bf16.mxu1 %v7473_v35 }
 0xa1a   :  { %4004 = vmatpush1.bf16.msra.mxu0 %v8415_v25  ;;  %4045 = vmatpush1.bf16.msra.mxu1 %v8416_v53 }
 0xa1b   :  { %4112 = vmatprep.subr.bf16.mxu0 %v8417_v48  ;;  %4153 = vmatprep.subr.bf16.mxu1 %v8418_v26 }
 0xabd   :  { %v3900_v32 = vpop.f32.mrf.mxu0  ;;  %v3941_v11 = vpop.f32.mrf.mxu1 }
 0xabe   :  { %v3948_v39 = vadd.f32 %v3900_v32, %v7681_v31  ;;  %v8420_v31 = vsel %vm6777_vm3, %v7654_v6, %v7556_v10  ;;  %v8436_v6 = vld [vmem:[#allocation42_spill] sm:$0xff] }
 0xabf   :  { %v3902_v57 = vpop.f32.mrf.mxu0  ;;  %v3943_v61 = vpop.f32.mrf.mxu1  ;;  %v3950_v32 = vadd.f32 %v3941_v11, %v8420_v31  ;;  %v8437_v10 = vsel %vm6789_vm5, %v8435_v56, %v8436_v6 }
 0xac0   :  { %v5494_v15 = vmul.f32 -1.442695, %v3948_v39  ;;  %v3949_v63 = vadd.f32 %v3902_v57, %v8419_v43  ;;  %v3951_v57 = vadd.f32 %v3943_v61, %v8421_v47 }
 0xac1   :  { %v3904_v18 = vpop.f32.mrf.mxu0  ;;  %v3945_v20 = vpop.f32.mrf.mxu1  ;;  %v5496_v39 = vmul.f32 -1.442695, %v3950_v32 }
 0xac2   :  { %6065 = vpow2.f32 %v5494_v15  ;;  %v5495_v51 = vmul.f32 -1.442695, %v3949_v63 }
 0xac3   :  { %v3905_v34 = vpop.f32.mrf.mxu0  ;;  %v3946_v33 = vpop.f32.mrf.mxu1 }
 0xac4   :  { %6067 = vpow2.f32 %v5495_v51 }
 0xac5   :  { %6069 = vpow2.f32 %v5496_v39 }
 0xac6   :  { %6071 = vtanh.f32 %v3951_v57 }
 0xacf   :  { %v6066_v43 = vpop.eup %6065 }
 0xad0   :  { %v3961_v18 = vadd.f32 1.0, %v6066_v43 }
 0xad1   :  { %v6068_v15 = vpop.eup %6067 }
 0xad2   :  { %6073 = vrcp.f32 %v3961_v18  ;;  %v3962_v33 = vadd.f32 1.0, %v6068_v15  ;;  %v6070_v63 = vpop.eup %6069 }
 0xad3   :  { %v6072_v20 = vpop.eup %6071  ;;  %v3963_v31 = vadd.f32 1.0, %v6070_v63 }
 0xad4   :  { %6075 = vrcp.f32 %v3962_v33 }
 0xad5   :  { %6077 = vrcp.f32 %v3963_v31 }
 0xadf   :  { %v6074_v51 = vpop.eup %6073 }
 0xae0   :  { %v3972_v34 = vmul.f32 %v6074_v51, %v6072_v20  ;;  %v8422_v20 = vsel %vm6785_vm4, %v7631_v13, %v7569_v29 }
 0xae1   :  { %v6076_v11 = vpop.eup %6075 }
 0xae2   :  { %v3971_v32 = vmul.f32 %v6076_v11, %v7766_v9  ;;  %v6078_v47 = vpop.eup %6077 }
 0xae4   :  { %v7820_v54 = vadd.f32 %v3972_v34, %v3971_v32 }
 0xae6   :  { %6079 = vtanh.f32 %v7820_v54 }
 0xaf3   :  { %v6080_v61 = vpop.eup %6079 }
 0xaf4   :  { %v3975_v39 = vmul.f32 %v6080_v61, %v6078_v47 }
 0xaf6   :  { %v3976_v57 = vpack.c.bf16 %v3975_v39, %v3975_v39 }
 0xaf8   :  { %4022 = vmatmul.mubr.bf16.vlgmr.msra.gmra.mxu0 %v3976_v57  ;;  %4063 = vmatmul.mubr.bf16.vlgmr.msra.gmra.mxu1 %v3976_v57 }
 0xaf9   :  { %4113 = vmatpush1.bf16.msra.mxu0 %v7389_v5  ;;  %4154 = vmatpush1.bf16.msra.mxu1 %v7391_v3 }
 0xafa   :  { %4114 = vmatprep.subr.bf16.mxu0 %v7393_v1  ;;  %4155 = vmatprep.subr.bf16.mxu1 %v7395_v28 }
 0xafb   :  { %4144 = vmatprep.mubr.bf16.mxu0 %v8330_v59  ;;  %4185 = vmatprep.mubr.bf16.mxu1 %v8330_v59 }
 0xafd   :  { %4115 = vmatpush1.bf16.msra.mxu0 %v7399_v36  ;;  %4156 = vmatpush1.bf16.msra.mxu1 %v7401_v37 }
 0xafe   :  { %4116 = vmatprep.subr.bf16.mxu0 %v7405_v38  ;;  %4157 = vmatprep.subr.bf16.mxu1 %v7407_v40 }
 0xb01   :  { %4117 = vmatpush1.bf16.msra.mxu0 %v7413_v41  ;;  %4158 = vmatpush1.bf16.msra.mxu1 %v7415_v42 }
 0xb02   :  { %4118 = vmatprep.subr.bf16.mxu0 %v7419_v44  ;;  %4159 = vmatprep.subr.bf16.mxu1 %v7421_v45 }
 0xb05   :  { %4119 = vmatpush1.bf16.msra.mxu0 %v7425_v46  ;;  %4160 = vmatpush1.bf16.msra.mxu1 %v7427_v49 }
 0xb06   :  { %4120 = vmatprep.subr.bf16.mxu0 %v7431_v50  ;;  %4161 = vmatprep.subr.bf16.mxu1 %v7433_v19 }
 0xb09   :  { %4121 = vmatpush1.bf16.msra.mxu0 %v7439_v7  ;;  %4162 = vmatpush1.bf16.msra.mxu1 %v7441_v2 }
 0xb0a   :  { %4122 = vmatprep.subr.bf16.mxu0 %v7445_v0  ;;  %4163 = vmatprep.subr.bf16.mxu1 %v7447_v4 }
 0xb0d   :  { %4123 = vmatpush1.bf16.msra.mxu0 %v7451_v24  ;;  %4164 = vmatpush1.bf16.msra.mxu1 %v7453_v52 }
 0xb0e   :  { %4124 = vmatprep.subr.bf16.mxu0 %v7457_v21  ;;  %4165 = vmatprep.subr.bf16.mxu1 %v7459_v12 }
 0xb11   :  { %4125 = vmatpush1.bf16.msra.mxu0 %v7465_v14  ;;  %4166 = vmatpush1.bf16.msra.mxu1 %v7467_v17 }
 0xb12   :  { %4126 = vmatprep.subr.bf16.mxu0 %v7471_v22  ;;  %4167 = vmatprep.subr.bf16.mxu1 %v7473_v35 }
 0xb15   :  { %4127 = vmatpush1.bf16.msra.mxu0 %v8415_v25  ;;  %4168 = vmatpush1.bf16.msra.mxu1 %v8416_v53 }
 0xb16   :  { %4227 = vmatprep.subr.bf16.mxu0 %v8417_v48  ;;  %4268 = vmatprep.subr.bf16.mxu1 %v8418_v26 }
 0xbb8   :  { %v4023_v9 = vpop.f32.mrf.mxu0  ;;  %v4064_v43 = vpop.f32.mrf.mxu1 }
 0xbb9   :  { %v4071_v18 = vadd.f32 %v4023_v9, %v7638_v8  ;;  %v8423_v8 = vld [vmem:[#allocation38_spill] sm:$0xff] }
 0xbba   :  { %v4025_v15 = vpop.f32.mrf.mxu0  ;;  %v4066_v33 = vpop.f32.mrf.mxu1  ;;  %v8424_v61 = vsel %vm6777_vm3, %v7612_v62, %v8423_v8  ;;  %v8425_v9 = vld [vmem:[#allocation30_spill] sm:$0xff] }
 0xbbb   :  { %v5497_v63 = vmul.f32 -1.442695, %v4071_v18  ;;  %v4072_v51 = vadd.f32 %v4025_v15, %v8422_v20  ;;  %v4073_v39 = vadd.f32 %v4064_v43, %v8424_v61  ;;  %v8426_v18 = vld [vmem:[#allocation35_spill] sm:$0xff] }
 0xbbc   :  { %v4027_v34 = vpop.f32.mrf.mxu0  ;;  %v4068_v11 = vpop.f32.mrf.mxu1  ;;  %v8427_v27 = vsel %vm6789_vm5, %v8425_v9, %v8426_v18 }
 0xbbd   :  { %6081 = vpow2.f32 %v5497_v63  ;;  %v5498_v31 = vmul.f32 -1.442695, %v4072_v51  ;;  %v5499_v57 = vmul.f32 -1.442695, %v4073_v39  ;;  %v4074_v15 = vadd.f32 %v4066_v33, %v8427_v27 }
 0xbbe   :  { %v4028_v32 = vpop.f32.mrf.mxu0  ;;  %v4069_v47 = vpop.f32.mrf.mxu1 }
 0xbbf   :  { %6083 = vpow2.f32 %v5498_v31 }
 0xbc0   :  { %6085 = vpow2.f32 %v5499_v57 }
 0xbc1   :  { %6087 = vtanh.f32 %v4074_v15 }
 0xbca   :  { %v6082_v20 = vpop.eup %6081 }
 0xbcb   :  { %v4084_v34 = vadd.f32 1.0, %v6082_v20 }
 0xbcc   :  { %v6084_v63 = vpop.eup %6083 }
 0xbcd   :  { %6089 = vrcp.f32 %v4084_v34  ;;  %v4085_v51 = vadd.f32 1.0, %v6084_v63  ;;  %v6086_v11 = vpop.eup %6085  ;;  %v8428_v34 = vld [vmem:[#allocation31_spill] sm:$0xff] }
 0xbce   :  { %v6088_v31 = vpop.eup %6087  ;;  %v4086_v61 = vadd.f32 1.0, %v6086_v11 }
 0xbcf   :  { %6091 = vrcp.f32 %v4085_v51 }
 0xbd0   :  { %6093 = vrcp.f32 %v4086_v61 }
 0xbda   :  { %v6090_v32 = vpop.eup %6089 }
 0xbdb   :  { %v4095_v47 = vmul.f32 %v6090_v32, %v6088_v31  ;;  %v8429_v32 = vld [vmem:[#allocation43_spill] sm:$0xff] }
 0xbdc   :  { %v6092_v43 = vpop.eup %6091 }
 0xbdd   :  { %v4094_v39 = vmul.f32 %v6092_v43, %v7820_v54  ;;  %v6094_v27 = vpop.eup %6093 }
 0xbdf   :  { %v7874_v23 = vadd.f32 %v4095_v47, %v4094_v39  ;;  %v8430_v47 = vld [vmem:[#allocation37_spill] sm:$0xff] }
 0xbe0   :  { %v8431_v43 = vsel %vm6785_vm4, %v8429_v32, %v8430_v47 }
 0xbe1   :  { %6095 = vtanh.f32 %v7874_v23 }
 0xbee   :  { %v6096_v33 = vpop.eup %6095 }
 0xbef   :  { %v4098_v57 = vmul.f32 %v6096_v33, %v6094_v27 }
 0xbf1   :  { %v4099_v15 = vpack.c.bf16 %v4098_v57, %v4098_v57 }
 0xbf3   :  { %4145 = vmatmul.mubr.bf16.vlgmr.msra.gmra.mxu0 %v4099_v15  ;;  %4186 = vmatmul.mubr.bf16.vlgmr.msra.gmra.mxu1 %v4099_v15  ;;  %v8433_v15 = vld [vmem:[#allocation40_spill] sm:$0xff] }
 0xbf4   :  { %4228 = vmatpush1.bf16.msra.mxu0 %v7389_v5  ;;  %4269 = vmatpush1.bf16.msra.mxu1 %v7391_v3 }
 0xbf5   :  { %4229 = vmatprep.subr.bf16.mxu0 %v7393_v1  ;;  %4270 = vmatprep.subr.bf16.mxu1 %v7395_v28 }
 0xbf6   :  { %4259 = vmatprep.mubr.bf16.mxu0 %v8330_v59  ;;  %4300 = vmatprep.mubr.bf16.mxu1 %v8330_v59 }
 0xbf8   :  { %4230 = vmatpush1.bf16.msra.mxu0 %v7399_v36  ;;  %4271 = vmatpush1.bf16.msra.mxu1 %v7401_v37 }
 0xbf9   :  { %4231 = vmatprep.subr.bf16.mxu0 %v7405_v38  ;;  %4272 = vmatprep.subr.bf16.mxu1 %v7407_v40 }
 0xbfc   :  { %4232 = vmatpush1.bf16.msra.mxu0 %v7413_v41  ;;  %4273 = vmatpush1.bf16.msra.mxu1 %v7415_v42 }
 0xbfd   :  { %4233 = vmatprep.subr.bf16.mxu0 %v7419_v44  ;;  %4274 = vmatprep.subr.bf16.mxu1 %v7421_v45 }
 0xc00   :  { %4234 = vmatpush1.bf16.msra.mxu0 %v7425_v46  ;;  %4275 = vmatpush1.bf16.msra.mxu1 %v7427_v49 }
 0xc01   :  { %4235 = vmatprep.subr.bf16.mxu0 %v7431_v50  ;;  %4276 = vmatprep.subr.bf16.mxu1 %v7433_v19 }
 0xc04   :  { %4236 = vmatpush1.bf16.msra.mxu0 %v7439_v7  ;;  %4277 = vmatpush1.bf16.msra.mxu1 %v7441_v2 }
 0xc05   :  { %4237 = vmatprep.subr.bf16.mxu0 %v7445_v0  ;;  %4278 = vmatprep.subr.bf16.mxu1 %v7447_v4 }
 0xc08   :  { %4238 = vmatpush1.bf16.msra.mxu0 %v7451_v24  ;;  %4279 = vmatpush1.bf16.msra.mxu1 %v7453_v52 }
 0xc09   :  { %4239 = vmatprep.subr.bf16.mxu0 %v7457_v21  ;;  %4280 = vmatprep.subr.bf16.mxu1 %v7459_v12 }
 0xc0c   :  { %4240 = vmatpush1.bf16.msra.mxu0 %v7465_v14  ;;  %4281 = vmatpush1.bf16.msra.mxu1 %v7467_v17 }
 0xc0d   :  { %4241 = vmatprep.subr.bf16.mxu0 %v7471_v22  ;;  %4282 = vmatprep.subr.bf16.mxu1 %v7473_v35 }
 0xc10   :  { %4242 = vmatpush1.bf16.msra.mxu0 %v8415_v25  ;;  %4283 = vmatpush1.bf16.msra.mxu1 %v8416_v53 }
 0xc11   :  { %4342 = vmatprep.subr.bf16.mxu0 %v8417_v48  ;;  %4383 = vmatprep.subr.bf16.mxu1 %v8418_v26  ;;  %v8432_v26 = vld [vmem:[#allocation44_spill] sm:$0xff] }
 0xcb3   :  { %v4146_v54 = vpop.f32.mrf.mxu0  ;;  %v4187_v20 = vpop.f32.mrf.mxu1 }
 0xcb4   :  { %v4194_v63 = vadd.f32 %v4146_v54, %v8428_v34  ;;  %v8434_v54 = vsel %vm6777_vm3, %v8432_v26, %v8433_v15 }
 0xcb5   :  { %v4148_v51 = vpop.f32.mrf.mxu0  ;;  %v4189_v11 = vpop.f32.mrf.mxu1  ;;  %v4196_v34 = vadd.f32 %v4187_v20, %v8434_v54 }
 0xcb6   :  { %v5500_v31 = vmul.f32 -1.442695, %v4194_v63  ;;  %v4195_v61 = vadd.f32 %v4148_v51, %v8431_v43  ;;  %v4197_v51 = vadd.f32 %v4189_v11, %v8437_v10 }
 0xcb7   :  { %v4150_v39 = vpop.f32.mrf.mxu0  ;;  %v4191_v27 = vpop.f32.mrf.mxu1  ;;  %v5502_v63 = vmul.f32 -1.442695, %v4196_v34 }
 0xcb8   :  { %6097 = vpow2.f32 %v5500_v31  ;;  %v5501_v33 = vmul.f32 -1.442695, %v4195_v61 }
 0xcb9   :  { %v4151_v48 = vpop.f32.mrf.mxu0  ;;  %v4192_v57 = vpop.f32.mrf.mxu1 }
 0xcba   :  { %6099 = vpow2.f32 %v5501_v33 }
 0xcbb   :  { %6101 = vpow2.f32 %v5502_v63 }
 0xcbc   :  { %6103 = vtanh.f32 %v4197_v51 }
 0xcc5   :  { %v6098_v43 = vpop.eup %6097 }
 0xcc6   :  { %v4207_v39 = vadd.f32 1.0, %v6098_v43  ;;  %v7989_v43 = vld [vmem:[#allocation14 + $0xe0] ss:$16 sps:$4 sm:$0xff]  }
 0xcc7   :  { %v6100_v31 = vpop.eup %6099 }
 0xcc8   :  { %6105 = vrcp.f32 %v4207_v39  ;;  %v4208_v61 = vadd.f32 1.0, %v6100_v31  ;;  %v6102_v27 = vpop.eup %6101  ;;  %v7992_v39 = vld [vmem:[#allocation14 + $0xe8] ss:$16 sps:$4 sm:$0xff]   ;;  %v7998_v31 = vld [vmem:[#allocation14 + $0xcc] ss:$16 sps:$4 sm:$0xff]  }
 0xcc9   :  { %v6104_v33 = vpop.eup %6103  ;;  %v4209_v54 = vadd.f32 1.0, %v6102_v27  ;;  %v8006_v27 = vld [vmem:[#allocation14 + $0xc8] ss:$16 sps:$4 sm:$0xff]  }
 0xcca   :  { %6107 = vrcp.f32 %v4208_v61  ;;  %v8003_v61 = vld [vmem:[#allocation14 + $0xc0] ss:$16 sps:$4 sm:$0xff]  }
 0xccb   :  { %6109 = vrcp.f32 %v4209_v54  ;;  %v8021_v54 = vld [vmem:[#allocation14 + $0x84] ss:$16 sps:$4 sm:$0xff]  }
 0xcd5   :  { %v6106_v48 = vpop.eup %6105 }
 0xcd6   :  { %v4218_v57 = vmul.f32 %v6106_v48, %v6104_v33  ;;  %v8009_v33 = vld [vmem:[#allocation14 + $0xa4] ss:$16 sps:$4 sm:$0xff]   ;;  %v8012_v48 = vld [vmem:[#allocation14 + $0xac] ss:$16 sps:$4 sm:$0xff]  }
 0xcd7   :  { %v6108_v20 = vpop.eup %6107 }
 0xcd8   :  { %v4217_v34 = vmul.f32 %v6108_v20, %v7874_v23  ;;  %v6110_v10 = vpop.eup %6109  ;;  %v8018_v20 = vld [vmem:[#allocation14 + $0xa8] ss:$16 sps:$4 sm:$0xff]  }
 0xcda   :  { %v7928_v55 = vadd.f32 %v4218_v57, %v4217_v34  ;;  %v8015_v57 = vld [vmem:[#allocation14 + $0xa0] ss:$16 sps:$4 sm:$0xff]   ;;  %v8024_v34 = vld [vmem:[#allocation14 + $0x8c] ss:$16 sps:$4 sm:$0xff]  }
 0xcdc   :  { %6111 = vtanh.f32 %v7928_v55 }
 0xce9   :  { %v6112_v11 = vpop.eup %6111 }
 0xcea   :  { %v4221_v63 = vmul.f32 %v6112_v11, %v6110_v10  ;;  %v8027_v10 = vld [vmem:[#allocation14 + $0x80] ss:$16 sps:$4 sm:$0xff]   ;;  %v8030_v11 = vld [vmem:[#allocation14 + $0x88] ss:$16 sps:$4 sm:$0xff]  }
 0xcec   :  { %v4222_v51 = vpack.c.bf16 %v4221_v63, %v4221_v63  ;;  %v8033_v63 = vld [vmem:[#allocation14 + $0x64] ss:$16 sps:$4 sm:$0xff]  }
 0xcee   :  { %4260 = vmatmul.mubr.bf16.vlgmr.msra.gmra.mxu0 %v4222_v51  ;;  %4301 = vmatmul.mubr.bf16.vlgmr.msra.gmra.mxu1 %v4222_v51  ;;  %v8036_v51 = vld [vmem:[#allocation14 + $0x6c] ss:$16 sps:$4 sm:$0xff]  }
 0xcef   :  { %4343 = vmatpush1.bf16.msra.mxu0 %v7389_v5  ;;  %4384 = vmatpush1.bf16.msra.mxu1 %v7391_v3  ;;  %v7963_v5 = vld [vmem:[#allocation14 + $0xe4] ss:$16 sps:$4 sm:$0xff]   ;;  %v7966_v3 = vld [vmem:[#allocation14 + $0xec] ss:$16 sps:$4 sm:$0xff]  }
 0xcf0   :  { %4344 = vmatprep.subr.bf16.mxu0 %v7393_v1  ;;  %4385 = vmatprep.subr.bf16.mxu1 %v7395_v28 }
 0xcf1   :  { %4374 = vmatprep.mubr.bf16.mxu0 %v8330_v59  ;;  %4415 = vmatprep.mubr.bf16.mxu1 %v8330_v59 }
 0xcf3   :  { %4345 = vmatpush1.bf16.msra.mxu0 %v7399_v36  ;;  %4386 = vmatpush1.bf16.msra.mxu1 %v7401_v37  ;;  %v8438_v36 = vld [vmem:[#allocation46_spill] sm:$0xff] }
 0xcf4   :  { %4346 = vmatprep.subr.bf16.mxu0 %v7405_v38  ;;  %4387 = vmatprep.subr.bf16.mxu1 %v7407_v40 }
 0xcf7   :  { %4347 = vmatpush1.bf16.msra.mxu0 %v7413_v41  ;;  %4388 = vmatpush1.bf16.msra.mxu1 %v7415_v42  ;;  %v8439_v42 = vsel %vm6785_vm4, %v8430_v47, %v8429_v32 }
 0xcf8   :  { %4348 = vmatprep.subr.bf16.mxu0 %v7419_v44  ;;  %4389 = vmatprep.subr.bf16.mxu1 %v7421_v45 }
 0xcfb   :  { %4349 = vmatpush1.bf16.msra.mxu0 %v7425_v46  ;;  %4390 = vmatpush1.bf16.msra.mxu1 %v7427_v49 }
 0xcfc   :  { %4350 = vmatprep.subr.bf16.mxu0 %v7431_v50  ;;  %4391 = vmatprep.subr.bf16.mxu1 %v7433_v19 }
 0xcff   :  { %4351 = vmatpush1.bf16.msra.mxu0 %v7439_v7  ;;  %4392 = vmatpush1.bf16.msra.mxu1 %v7441_v2  ;;  %v8440_v7 = vsel %vm6777_vm3, %v8433_v15, %v8432_v26 }
 0xd00   :  { %4352 = vmatprep.subr.bf16.mxu0 %v7445_v0  ;;  %4393 = vmatprep.subr.bf16.mxu1 %v7447_v4  ;;  %v8441_v4 = vsel %vm6789_vm5, %v8436_v6, %v8435_v56 }
 0xd03   :  { %4353 = vmatpush1.bf16.msra.mxu0 %v7451_v24  ;;  %4394 = vmatpush1.bf16.msra.mxu1 %v7453_v52 }
 0xd04   :  { %4354 = vmatprep.subr.bf16.mxu0 %v7457_v21  ;;  %4395 = vmatprep.subr.bf16.mxu1 %v7459_v12 }
 0xd07   :  { %4355 = vmatpush1.bf16.msra.mxu0 %v7465_v14  ;;  %4396 = vmatpush1.bf16.msra.mxu1 %v7467_v17 }
 0xd08   :  { %4356 = vmatprep.subr.bf16.mxu0 %v7471_v22  ;;  %4397 = vmatprep.subr.bf16.mxu1 %v7473_v35 }
 0xd0b   :  { %4357 = vmatpush1.bf16.msra.mxu0 %v8415_v25  ;;  %4398 = vmatpush1.bf16.msra.mxu1 %v8416_v53 }
 0xd0c   :  { %4457 = vmatprep.subr.bf16.mxu0 %v7963_v5  ;;  %4498 = vmatprep.subr.bf16.mxu1 %v7966_v3 }
 0xdae   :  { %v4261_v1 = vpop.f32.mrf.mxu0  ;;  %v4302_v28 = vpop.f32.mrf.mxu1 }
 0xdaf   :  { %v4309_v37 = vadd.f32 %v4261_v1, %v8438_v36  ;;  %v4311_v2 = vadd.f32 %v4302_v28, %v8440_v7  ;;  %v8039_v1 = vld [vmem:[#allocation14 + $0x60] ss:$16 sps:$4 sm:$0xff]   ;;  %v8042_v28 = vld [vmem:[#allocation14 + $0x68] ss:$16 sps:$4 sm:$0xff]   ;;  %v8045_v36 = vld [vmem:[#allocation14 + $0x44] ss:$16 sps:$4 sm:$0xff]  }
 0xdb0   :  { %v4263_v38 = vpop.f32.mrf.mxu0  ;;  %v4304_v40 = vpop.f32.mrf.mxu1 }
 0xdb1   :  { %v5503_v41 = vmul.f32 -1.442695, %v4309_v37  ;;  %v4310_v44 = vadd.f32 %v4263_v38, %v8439_v42  ;;  %v5505_v0 = vmul.f32 -1.442695, %v4311_v2  ;;  %v4312_v24 = vadd.f32 %v4304_v40, %v8441_v4  ;;  %v8048_v37 = vld [vmem:[#allocation14 + $0x4c] ss:$16 sps:$4 sm:$0xff]  }
 0xdb2   :  { %v4265_v45 = vpop.f32.mrf.mxu0  ;;  %v4306_v46 = vpop.f32.mrf.mxu1  ;;  %v8051_v38 = vld [vmem:[#allocation14 + $0x40] ss:$16 sps:$4 sm:$0xff]   ;;  %v8054_v40 = vld [vmem:[#allocation14 + $0x48] ss:$16 sps:$4 sm:$0xff]   ;;  %v8060_v42 = vld [vmem:[#allocation14 + $0x2c] ss:$16 sps:$4 sm:$0xff]  }
 0xdb3   :  { %6113 = vpow2.f32 %v5503_v41  ;;  %v5504_v49 = vmul.f32 -1.442695, %v4310_v44  ;;  %v8057_v41 = vld [vmem:[#allocation14 + $0x24] ss:$16 sps:$4 sm:$0xff]   ;;  %v8063_v44 = vld [vmem:[#allocation14 + $0x20] ss:$16 sps:$4 sm:$0xff]  }
 0xdb4   :  { %v4266_v50 = vpop.f32.mrf.mxu0  ;;  %v4307_v19 = vpop.f32.mrf.mxu1  ;;  %v8066_v45 = vld [vmem:[#allocation14 + $0x28] ss:$16 sps:$4 sm:$0xff]   ;;  %v8069_v46 = vld [vmem:[#allocation14 + $0x4] ss:$16 sps:$4 sm:$0xff]  }
 0xdb5   :  { %6115 = vpow2.f32 %v5504_v49  ;;  %v8072_v49 = vld [vmem:[#allocation14 + $0xc] ss:$16 sps:$4 sm:$0xff]   ;;  %v8075_v50 = vld [vmem:[#allocation14] ss:$16 sps:$4 sm:$0xff]   ;;  %v8078_v19 = vld [vmem:[#allocation14 + $0x8] ss:$16 sps:$4 sm:$0xff]  }
 0xdb6   :  { %6117 = vpow2.f32 %v5505_v0  ;;  %v8442_v0 = vld [vmem:[#allocation45_spill] sm:$0xff] }
 0xdb7   :  { %6119 = vtanh.f32 %v4312_v24 }
 0xdc0   :  { %v6114_v52 = vpop.eup %6113 }
 0xdc1   :  { %v4322_v21 = vadd.f32 1.0, %v6114_v52 }
 0xdc2   :  { %v6116_v12 = vpop.eup %6115 }
 0xdc3   :  { %6121 = vrcp.f32 %v4322_v21  ;;  %v4323_v14 = vadd.f32 1.0, %v6116_v12  ;;  %v6118_v17 = vpop.eup %6117  ;;  %v8443_v12 = vsel %vm6785_vm4, %v7569_v29, %v7631_v13  ;;  %v8445_v29 = vsel %vm6789_vm5, %v8426_v18, %v8425_v9 }
 0xdc4   :  { %v6120_v22 = vpop.eup %6119  ;;  %v4324_v53 = vadd.f32 1.0, %v6118_v17 }
 0xdc5   :  { %6123 = vrcp.f32 %v4323_v14 }
 0xdc6   :  { %6125 = vrcp.f32 %v4324_v53 }
 0xdd0   :  { %v6122_v35 = vpop.eup %6121 }
 0xdd1   :  { %v4333_v23 = vmul.f32 %v6122_v35, %v6120_v22 }
 0xdd2   :  { %v6124_v25 = vpop.eup %6123 }
 0xdd3   :  { %v4332_v32 = vmul.f32 %v6124_v25, %v7928_v55  ;;  %v6126_v56 = vpop.eup %6125  ;;  %v7995_v55 = vld [vmem:[#allocation14 + $0xc4] ss:$16 sps:$4 sm:$0xff]  }
 0xdd5   :  { %v7986_v47 = vadd.f32 %v4333_v23, %v4332_v32 }
 0xdd7   :  { %6127 = vtanh.f32 %v7986_v47 }
 0xde4   :  { %v6128_v6 = vpop.eup %6127 }
 0xde5   :  { %v4336_v26 = vmul.f32 %v6128_v6, %v6126_v56 }
 0xde7   :  { %v4337_v15 = vpack.c.bf16 %v4336_v26, %v4336_v26 }
 0xde9   :  { %4375 = vmatmul.mubr.bf16.vlgmr.msra.gmra.mxu0 %v4337_v15  ;;  %4416 = vmatmul.mubr.bf16.vlgmr.msra.gmra.mxu1 %v4337_v15 }
 0xdea   :  { %4458 = vmatpush1.bf16.msra.mxu0 %v7989_v43  ;;  %4499 = vmatpush1.bf16.msra.mxu1 %v7992_v39 }
 0xdeb   :  { %4459 = vmatprep.subr.bf16.mxu0 %v7995_v55  ;;  %4500 = vmatprep.subr.bf16.mxu1 %v7998_v31 }
 0xdec   :  { %4489 = vmatprep.mubr.bf16.mxu0 %v8330_v59  ;;  %4530 = vmatprep.mubr.bf16.mxu1 %v8330_v59 }
 0xdee   :  { %4460 = vmatpush1.bf16.msra.mxu0 %v8003_v61  ;;  %4501 = vmatpush1.bf16.msra.mxu1 %v8006_v27 }
 0xdef   :  { %4461 = vmatprep.subr.bf16.mxu0 %v8009_v33  ;;  %4502 = vmatprep.subr.bf16.mxu1 %v8012_v48 }
 0xdf2   :  { %4462 = vmatpush1.bf16.msra.mxu0 %v8015_v57  ;;  %4503 = vmatpush1.bf16.msra.mxu1 %v8018_v20 }
 0xdf3   :  { %4463 = vmatprep.subr.bf16.mxu0 %v8021_v54  ;;  %4504 = vmatprep.subr.bf16.mxu1 %v8024_v34 }
 0xdf6   :  { %4464 = vmatpush1.bf16.msra.mxu0 %v8027_v10  ;;  %4505 = vmatpush1.bf16.msra.mxu1 %v8030_v11 }
 0xdf7   :  { %4465 = vmatprep.subr.bf16.mxu0 %v8033_v63  ;;  %4506 = vmatprep.subr.bf16.mxu1 %v8036_v51 }
 0xdfa   :  { %4466 = vmatpush1.bf16.msra.mxu0 %v8039_v1  ;;  %4507 = vmatpush1.bf16.msra.mxu1 %v8042_v28 }
 0xdfb   :  { %4467 = vmatprep.subr.bf16.mxu0 %v8045_v36  ;;  %4508 = vmatprep.subr.bf16.mxu1 %v8048_v37 }
 0xdfe   :  { %4468 = vmatpush1.bf16.msra.mxu0 %v8051_v38  ;;  %4509 = vmatpush1.bf16.msra.mxu1 %v8054_v40 }
 0xdff   :  { %4469 = vmatprep.subr.bf16.mxu0 %v8057_v41  ;;  %4510 = vmatprep.subr.bf16.mxu1 %v8060_v42 }
 0xe02   :  { %4470 = vmatpush1.bf16.msra.mxu0 %v8063_v44  ;;  %4511 = vmatpush1.bf16.msra.mxu1 %v8066_v45 }
 0xe03   :  { %4471 = vmatprep.subr.bf16.mxu0 %v8069_v46  ;;  %4512 = vmatprep.subr.bf16.mxu1 %v8072_v49 }
 0xe06   :  { %4472 = vmatpush1.bf16.msra.mxu0 %v8075_v50  ;;  %4513 = vmatpush1.bf16.msra.mxu1 %v8078_v19 }
 0xe07   :  { %4572 = vmatprep.subr.bf16.mxu0 %v7963_v5  ;;  %4613 = vmatprep.subr.bf16.mxu1 %v7966_v3  ;;  %v8444_v3 = vsel %vm6777_vm3, %v8423_v8, %v7612_v62 }
 0xea9   :  { %v4376_v7 = vpop.f32.mrf.mxu0  ;;  %v4417_v2 = vpop.f32.mrf.mxu1 }
 0xeaa   :  { %v4424_v4 = vadd.f32 %v4376_v7, %v8442_v0  ;;  %v4426_v25 = vadd.f32 %v4417_v2, %v8444_v3  ;;  %v5887_v3 = vld [vmem:[#allocation15 + $0x78] sm:$0xff]  }
 0xeab   :  { %v4378_v24 = vpop.f32.mrf.mxu0  ;;  %v4419_v52 = vpop.f32.mrf.mxu1 }
 0xeac   :  { %v5506_v21 = vmul.f32 -1.442695, %v4424_v4  ;;  %v4425_v14 = vadd.f32 %v4378_v24, %v8443_v12  ;;  %v5508_v53 = vmul.f32 -1.442695, %v4426_v25  ;;  %v4427_v13 = vadd.f32 %v4419_v52, %v8445_v29  ;;  %v5888_v25 = vld [vmem:[#allocation15 + $0x38] sm:$0xff]   ;;  %v5890_v29 = vld [vmem:[#allocation15 + $0x30] sm:$0xff]  }
 0xead   :  { %v4380_v17 = vpop.f32.mrf.mxu0  ;;  %v4421_v22 = vpop.f32.mrf.mxu1 }
 0xeae   :  { %6129 = vpow2.f32 %v5506_v21  ;;  %v5507_v35 = vmul.f32 -1.442695, %v4425_v14 }
 0xeaf   :  { %v4381_v5 = vpop.f32.mrf.mxu0  ;;  %v4422_v23 = vpop.f32.mrf.mxu1 }
 0xeb0   :  { %6131 = vpow2.f32 %v5507_v35 }
 0xeb1   :  { %6133 = vpow2.f32 %v5508_v53  ;;  %v5889_v53 = vld [vmem:[#allocation15 + $0x70] sm:$0xff]  }
 0xeb2   :  { %6135 = vtanh.f32 %v4427_v13  ;;  %v5891_v13 = vld [vmem:[#allocation15 + $0x68] sm:$0xff]  }
 0xebb   :  { %v6130_v32 = vpop.eup %6129 }
 0xebc   :  { %v4437_v56 = vadd.f32 1.0, %v6130_v32  ;;  %v5892_v32 = vld [vmem:[#allocation15 + $0x28] sm:$0xff]  }
 0xebd   :  { %v6132_v6 = vpop.eup %6131 }
 0xebe   :  { %6137 = vrcp.f32 %v4437_v56  ;;  %v4438_v26 = vadd.f32 1.0, %v6132_v6  ;;  %v6134_v15 = vpop.eup %6133  ;;  %v5893_v56 = vld [vmem:[#allocation15 + $0x60] sm:$0xff]  }
 0xebf   :  { %v6136_v7 = vpop.eup %6135  ;;  %v4439_v2 = vadd.f32 1.0, %v6134_v15  ;;  %v5894_v6 = vld [vmem:[#allocation15 + $0x20] sm:$0xff]   ;;  %v5896_v15 = vld [vmem:[#allocation15 + $0x18] sm:$0xff]  }
 0xec0   :  { %6139 = vrcp.f32 %v4438_v26  ;;  %v5895_v26 = vld [vmem:[#allocation15 + $0x58] sm:$0xff]  }
 0xec1   :  { %6141 = vrcp.f32 %v4439_v2  ;;  %v5901_v2 = vld [vmem:[#allocation15 + $0x40] sm:$0xff]  }
 0xecb   :  { %v6138_v0 = vpop.eup %6137 }
 0xecc   :  { %v4448_v62 = vmul.f32 %v6138_v0, %v6136_v7  ;;  %v5897_v7 = vld [vmem:[#allocation15 + $0x50] sm:$0xff]  }
 0xecd   :  { %v6140_v8 = vpop.eup %6139  ;;  %v5898_v0 = vld [vmem:[#allocation15 + $0x10] sm:$0xff]  }
 0xece   :  { %v4447_v4 = vmul.f32 %v6140_v8, %v7986_v47  ;;  %v6142_v9 = vpop.eup %6141  ;;  %v5900_v8 = vld [vmem:[#allocation15 + $0x8] sm:$0xff]  }
 0xed0   :  { %v8100_v24 = vadd.f32 %v4448_v62, %v4447_v4  ;;  %v5899_v62 = vld [vmem:[#allocation15 + $0x48] sm:$0xff]   ;;  %v5902_v4 = vld [vmem:[#allocation15] sm:$0xff]  }
 0xed2   :  { %6143 = vtanh.f32 %v8100_v24 }
 0xedf   :  { %v6144_v18 = vpop.eup %6143 }
 0xee0   :  { %v4451_v52 = vmul.f32 %v6144_v18, %v6142_v9  ;;  %v6418_v9 = vmov 0.0   ;;  %v5906_v18 = vld [vmem:[#allocation17 + $0x30] sm:$0xff]  }
 0xee2   :  { %v4452_v21 = vpack.c.bf16 %v4451_v52, %v4451_v52  ;;  %v5907_v52 = vld [vmem:[#allocation17 + $0x28] sm:$0xff]  }
 0xee4   :  { %4490 = vmatmul.mubr.bf16.vlgmr.msra.gmra.mxu0 %v4452_v21  ;;  %4531 = vmatmul.mubr.bf16.vlgmr.msra.gmra.mxu1 %v4452_v21  ;;  %v5908_v21 = vld [vmem:[#allocation17 + $0x20] sm:$0xff]  }
 0xee5   :  { %4573 = vmatpush1.bf16.msra.mxu0 %v7989_v43  ;;  %4614 = vmatpush1.bf16.msra.mxu1 %v7992_v39  ;;  %v8446_v43 = vld [vmem:[#allocation51_spill] sm:$0xff] }
 0xee6   :  { %4574 = vmatprep.subr.bf16.mxu0 %v7995_v55  ;;  %4615 = vmatprep.subr.bf16.mxu1 %v7998_v31 }
 0xee7   :  { %4604 = vmatprep.mubr.bf16.mxu0 %v8330_v59  ;;  %4645 = vmatprep.mubr.bf16.mxu1 %v8330_v59 }
 0xee9   :  { %4575 = vmatpush1.bf16.msra.mxu0 %v8003_v61  ;;  %4616 = vmatpush1.bf16.msra.mxu1 %v8006_v27  ;;  %v8447_v27 = vld [vmem:[#allocation47_spill] sm:$0xff] }
 0xeea   :  { %4576 = vmatprep.subr.bf16.mxu0 %v8009_v33  ;;  %4617 = vmatprep.subr.bf16.mxu1 %v8012_v48  ;;  %v8448_v33 = vsel %vm6785_vm4, %v7559_v60, %v8447_v27 }
 0xeed   :  { %4577 = vmatpush1.bf16.msra.mxu0 %v8015_v57  ;;  %4618 = vmatpush1.bf16.msra.mxu1 %v8018_v20 }
 0xeee   :  { %4578 = vmatprep.subr.bf16.mxu0 %v8021_v54  ;;  %4619 = vmatprep.subr.bf16.mxu1 %v8024_v34 }
 0xef1   :  { %4579 = vmatpush1.bf16.msra.mxu0 %v8027_v10  ;;  %4620 = vmatpush1.bf16.msra.mxu1 %v8030_v11  ;;  %v8449_v11 = vld [vmem:[#allocation39_spill] sm:$0xff] }
 0xef2   :  { %4580 = vmatprep.subr.bf16.mxu0 %v8033_v63  ;;  %4621 = vmatprep.subr.bf16.mxu1 %v8036_v51  ;;  %v8450_v63 = vld [vmem:[#allocation32_spill] sm:$0xff] }
 0xef3   :  { %v8451_v51 = vsel %vm6777_vm3, %v8449_v11, %v8450_v63 }
 0xef5   :  { %4581 = vmatpush1.bf16.msra.mxu0 %v8039_v1  ;;  %4622 = vmatpush1.bf16.msra.mxu1 %v8042_v28 }
 0xef6   :  { %4582 = vmatprep.subr.bf16.mxu0 %v8045_v36  ;;  %4623 = vmatprep.subr.bf16.mxu1 %v8048_v37  ;;  %v8452_v36 = vld [vmem:[#allocation36_spill] sm:$0xff]  ;;  %v8453_v37 = vld [vmem:[#allocation55_spill] sm:$0xff] }
 0xef7   :  { %v8454_v60 = vsel %vm6789_vm5, %v8452_v36, %v8453_v37 }
 0xef9   :  { %4583 = vmatpush1.bf16.msra.mxu0 %v8051_v38  ;;  %4624 = vmatpush1.bf16.msra.mxu1 %v8054_v40 }
 0xefa   :  { %4584 = vmatprep.subr.bf16.mxu0 %v8057_v41  ;;  %4625 = vmatprep.subr.bf16.mxu1 %v8060_v42 }
 0xefd   :  { %4585 = vmatpush1.bf16.msra.mxu0 %v8063_v44  ;;  %4626 = vmatpush1.bf16.msra.mxu1 %v8066_v45 }
 0xefe   :  { %4586 = vmatprep.subr.bf16.mxu0 %v8069_v46  ;;  %4627 = vmatprep.subr.bf16.mxu1 %v8072_v49 }
 0xf01   :  { %4587 = vmatpush1.bf16.msra.mxu0 %v8075_v50  ;;  %4628 = vmatpush1.bf16.msra.mxu1 %v8078_v19 }
 0xf02   :  { %5559 = vmatprep.subr.bf16.mxu0 %v5887_v3  ;;  %5599 = vmatprep.subr.bf16.mxu1 %v6418_v9 }
 0xfa4   :  { %v4491_v59 = vpop.f32.mrf.mxu0  ;;  %v4532_v47 = vpop.f32.mrf.mxu1 }
 0xfa5   :  { %v4539_v39 = vadd.f32 %v4491_v59, %v8446_v43  ;;  %v4541_v1 = vadd.f32 %v4532_v47, %v8451_v51  ;;  %v5909_v59 = vld [vmem:[#allocation17 + $0x18] sm:$0xff]   ;;  %v5910_v47 = vld [vmem:[#allocation17 + $0x10] sm:$0xff]  }
 0xfa6   :  { %v4493_v55 = vpop.f32.mrf.mxu0  ;;  %v4534_v31 = vpop.f32.mrf.mxu1 }
 0xfa7   :  { %v5509_v61 = vmul.f32 -1.442695, %v4539_v39  ;;  %v4540_v48 = vadd.f32 %v4493_v55, %v8448_v33  ;;  %v5511_v28 = vmul.f32 -1.442695, %v4541_v1  ;;  %v4542_v38 = vadd.f32 %v4534_v31, %v8454_v60  ;;  %v8455_v55 = vld [vmem:[#allocation29_spill] sm:$0xff]  ;;  %v8459_v1 = vld [vmem:[#allocation50_spill] sm:$0xff] }
 0xfa8   :  { %v4495_v57 = vpop.f32.mrf.mxu0  ;;  %v4536_v20 = vpop.f32.mrf.mxu1 }
 0xfa9   :  { %6145 = vpow2.f32 %v5509_v61  ;;  %v5510_v54 = vmul.f32 -1.442695, %v4540_v48  ;;  %v8456_v48 = vld [vmem:[#allocation49_spill] sm:$0xff]  ;;  %v8457_v57 = vld [vmem:[#allocation54_spill] sm:$0xff] }
 0xfaa   :  { %v4496_v34 = vpop.f32.mrf.mxu0  ;;  %v4537_v10 = vpop.f32.mrf.mxu1  ;;  %v8458_v20 = vsel %vm6785_vm4, %v8456_v48, %v8457_v57 }
 0xfab   :  { %6147 = vpow2.f32 %v5510_v54 }
 0xfac   :  { %6149 = vpow2.f32 %v5511_v28  ;;  %v8460_v28 = vld [vmem:[#allocation52_spill] sm:$0xff] }
 0xfad   :  { %6151 = vtanh.f32 %v4542_v38  ;;  %v8461_v36 = vsel %vm6777_vm3, %v8459_v1, %v8460_v28  ;;  %v8463_v38 = vld [vmem:[#allocation53_spill] sm:$0xff] }
 0xfb6   :  { %v6146_v40 = vpop.eup %6145 }
 0xfb7   :  { %v4552_v41 = vadd.f32 1.0, %v6146_v40  ;;  %v8464_v40 = vsel %vm6789_vm5, %v8462_v30, %v8463_v38 }
 0xfb8   :  { %v6148_v42 = vpop.eup %6147 }
 0xfb9   :  { %6153 = vrcp.f32 %v4552_v41  ;;  %v4553_v44 = vadd.f32 1.0, %v6148_v42  ;;  %v6150_v45 = vpop.eup %6149 }
 0xfba   :  { %v6152_v46 = vpop.eup %6151  ;;  %v4554_v12 = vadd.f32 1.0, %v6150_v45 }
 0xfbb   :  { %6155 = vrcp.f32 %v4553_v44 }
 0xfbc   :  { %6157 = vrcp.f32 %v4554_v12 }
 0xfc6   :  { %v6154_v49 = vpop.eup %6153 }
 0xfc7   :  { %v4563_v50 = vmul.f32 %v6154_v49, %v6152_v46 }
 0xfc8   :  { %v6156_v19 = vpop.eup %6155 }
 0xfc9   :  { %v4562_v14 = vmul.f32 %v6156_v19, %v8100_v24  ;;  %v6158_v22 = vpop.eup %6157  ;;  %v5905_v24 = vld [vmem:[#allocation17 + $0x38] sm:$0xff]  }
 0xfcb   :  { %v8152_v17 = vadd.f32 %v4563_v50, %v4562_v14 }
 0xfcd   :  { %6159 = vtanh.f32 %v8152_v17 }
 0xfda   :  { %v6160_v35 = vpop.eup %6159 }
 0xfdb   :  { %v4566_v5 = vmul.f32 %v6160_v35, %v6158_v22 }
 0xfdd   :  { %v4567_v23 = vpack.c.bf16 %v4566_v5, %v4566_v5 }
 0xfdf   :  { %4605 = vmatmul.mubr.bf16.vlgmr.msra.gmra.mxu0 %v4567_v23  ;;  %4646 = vmatmul.mubr.bf16.vlgmr.msra.gmra.mxu1 %v4567_v23 }
 0xfe0   :  { %5560 = vmatpush3.bf16.msra.mxu0 %v5888_v25  ;;  %5600 = vmatpush3.bf16.msra.mxu1 %v5905_v24  ;;  %v5916_v24 = vld [vmem:[#allocation18 + $0x20] sm:$0xff]  }
 0xfe1   :  { %5561 = vmatprep.subr.bf16.mxu0 %v5889_v53  ;;  %5601 = vmatprep.subr.bf16.mxu1 %v6418_v9 }
 0xfe2   :  { %5615 = vmatprep.mubr.msk.bf16.mxu1 %vm6419_vm8, %v6418_v9 }
 0xfe4   :  { %5562 = vmatpush3.bf16.msra.mxu0 %v5890_v29  ;;  %5602 = vmatpush3.bf16.msra.mxu1 %v5906_v18  ;;  %v5917_v18 = vld [vmem:[#allocation18 + $0x18] sm:$0xff]  }
 0xfe5   :  { %5563 = vmatprep.subr.bf16.mxu0 %v5891_v13  ;;  %5603 = vmatprep.subr.bf16.mxu1 %v6418_v9  ;;  %v5911_v13 = vld [vmem:[#allocation17 + $0x8] sm:$0xff]  }
 0xfe8   :  { %5564 = vmatpush3.bf16.msra.mxu0 %v5892_v32  ;;  %5604 = vmatpush3.bf16.msra.mxu1 %v5907_v52  ;;  %v5912_v32 = vld [vmem:[#allocation17] sm:$0xff]   ;;  %v5918_v52 = vld [vmem:[#allocation18 + $0x10] sm:$0xff]  }
 0xfe9   :  { %5565 = vmatprep.subr.bf16.mxu0 %v5893_v56  ;;  %5605 = vmatprep.subr.bf16.mxu1 %v6418_v9  ;;  %v5914_v56 = vld [vmem:[#allocation18 + $0x30] sm:$0xff]  }
 0xfec   :  { %5566 = vmatpush3.bf16.msra.mxu0 %v5894_v6  ;;  %5606 = vmatpush3.bf16.msra.mxu1 %v5908_v21  ;;  %v5919_v21 = vld [vmem:[#allocation18 + $0x8] sm:$0xff]  }
 0xfed   :  { %5567 = vmatprep.subr.bf16.mxu0 %v5895_v26  ;;  %5607 = vmatprep.subr.bf16.mxu1 %v6418_v9  ;;  %v5515_v26 = vld [vmem:[%s8210_s8] ss:$0 sm:$0xff] }
 0xff0   :  { %5568 = vmatpush3.bf16.msra.mxu0 %v5896_v15  ;;  %5608 = vmatpush3.bf16.msra.mxu1 %v5909_v59  ;;  %v5920_v59 = vld [vmem:[#allocation18] sm:$0xff]  }
 0xff1   :  { %5569 = vmatprep.subr.bf16.mxu0 %v5897_v7  ;;  %5609 = vmatprep.subr.bf16.mxu1 %v6418_v9 }
 0xff4   :  { %5570 = vmatpush3.bf16.msra.mxu0 %v5898_v0  ;;  %5610 = vmatpush3.bf16.msra.mxu1 %v5910_v47  ;;  %v5534_v47 = vld [vmem:[%s8212_s10] ss:$0 sm:$0xff]  ;;  %s5104_s10 = sshll.u32 %s6420_s18, 4  ;;  %s5105_s10 = int_to_ptr.vmem [resolvable:$true] %s5104_s10 }
 0xff5   :  { %5571 = vmatprep.subr.bf16.mxu0 %v5899_v62  ;;  %5611 = vmatprep.subr.bf16.mxu1 %v6418_v9  ;;  %s6371_s19 = scalar_lea.vmem %s5105_s10, 128  ;;  %p6376_p13 = scmp.lt.s32.totalorder %s5105_s10, %s5105_s10 }
 0xff6   :  { %p6372_p12 = scmp.ne.s32.totalorder %s5105_s10, %s6371_s19  ;;  %p6377_p0 = scmp.lt.s32.totalorder %s6371_s19, %s6371_s19 }
 0xff8   :  { %5572 = vmatpush3.bf16.msra.mxu0 %v5900_v8  ;;  %5612 = vmatpush3.bf16.msra.mxu1 %v5911_v13  ;;  %p6378_p1 = por %p6377_p0, %p6376_p13 }
 0xff9   :  { %5573 = vmatprep.subr.bf16.mxu0 %v5901_v2  ;;  %5613 = vmatprep.subr.bf16.mxu1 %v6418_v9 }
 0xffa   :  { %p6379_p2 = pnand %p6378_p1, %p6372_p12 }
 0xffc   :  { %5574 = vmatpush3.bf16.msra.mxu0 %v5902_v4  ;;  %5614 = vmatpush3.bf16.msra.mxu1 %v5912_v32  ;;  %v5915_v4 = vld [vmem:[#allocation18 + $0x28] sm:$0xff]  }
 0xffd   :  { %5619 = vmatprep.subr.bf16.mxu0 %v6418_v9 }
0x109f   :  { %v4606_v43 = vpop.f32.mrf.mxu0  ;;  %v4647_v39 = vpop.f32.mrf.mxu1 }
0x10a0   :  { %v4654_v31 = vadd.f32 %v4606_v43, %v8455_v55  ;;  %v4656_v37 = vadd.f32 %v4647_v39, %v8461_v36 }
0x10a1   :  { %v4608_v61 = vpop.f32.mrf.mxu0  ;;  %v4649_v27 = vpop.f32.mrf.mxu1 }
0x10a2   :  { %v5512_v33 = vmul.f32 -1.442695, %v4654_v31  ;;  %v4655_v54 = vadd.f32 %v4608_v61, %v8458_v20  ;;  %v5514_v60 = vmul.f32 -1.442695, %v4656_v37  ;;  %v4657_v41 = vadd.f32 %v4649_v27, %v8464_v40 }
0x10a3   :  { %v4610_v34 = vpop.f32.mrf.mxu0  ;;  %v4651_v10 = vpop.f32.mrf.mxu1 }
0x10a4   :  { %6161 = vpow2.f32 %v5512_v33  ;;  %v5513_v11 = vmul.f32 -1.442695, %v4655_v54 }
0x10a5   :  { %v4611_v63 = vpop.f32.mrf.mxu0  ;;  %v4652_v51 = vpop.f32.mrf.mxu1 }
0x10a6   :  { %6163 = vpow2.f32 %v5513_v11 }
0x10a7   :  { %6165 = vpow2.f32 %v5514_v60 }
0x10a8   :  { %6167 = vtanh.f32 %v4657_v41 }
0x10b1   :  { %v6162_v42 = vpop.eup %6161 }
0x10b2   :  { %v4667_v44 = vadd.f32 1.0, %v6162_v42 }
0x10b3   :  { %v6164_v45 = vpop.eup %6163 }
0x10b4   :  { %6169 = vrcp.f32 %v4667_v44  ;;  %v4668_v46 = vadd.f32 1.0, %v6164_v45  ;;  %v6166_v16 = vpop.eup %6165 }
0x10b5   :  { %v6168_v49 = vpop.eup %6167  ;;  %v4669_v14 = vadd.f32 1.0, %v6166_v16 }
0x10b6   :  { %6171 = vrcp.f32 %v4668_v46 }
0x10b7   :  { %6173 = vrcp.f32 %v4669_v14 }
0x10c1   :  { %v6170_v50 = vpop.eup %6169 }
0x10c2   :  { %v4678_v19 = vmul.f32 %v6170_v50, %v6168_v49 }
0x10c3   :  { %v6172_v12 = vpop.eup %6171 }
0x10c4   :  { %v4677_v58 = vmul.f32 %v6172_v12, %v8152_v17  ;;  %v6174_v35 = vpop.eup %6173  ;;  %v5913_v17 = vld [vmem:[#allocation18 + $0x38] sm:$0xff]  }
0x10c6   :  { %v4679_v22 = vadd.f32 %v4678_v19, %v4677_v58 }
0x10c8   :  { %6175 = vtanh.f32 %v4679_v22 }
0x10d5   :  { %v6176_v5 = vpop.eup %6175 }
0x10d6   :  { %v4681_v23 = vmul.f32 %v6176_v5, %v6174_v35 }
0x10d8   :  { %v4682_v3 = vpack.c.bf16 %v4681_v23, %v4681_v23 }
0x10da   :  { %4683 = vst [vmem:[#allocation5 + $0x4] sm:$0xf] %v4682_v3 }
0x10e1   :  { %v4684_v25 = vld [vmem:[#allocation5] sm:$0xff] }
0x10e2   :  { %v5516_v53 = vcombine.low %v4684_v25, %v4684_v25  ;;  %v5517_v29 = vcombine.high %v4684_v25, %v4684_v25 }
0x10e4   :  { %4859 = vmatprep.mubr.bf16.mxu0 %v5517_v29 }
0x10e5   :  { %4860 = vmatmul.mubr.bf16.vlgmr.msra.gmra.mxu0 %v5516_v53 }
0x10e6   :  { %5635 = vmatprep.mubr.msk.bf16.mxu0 %vm6419_vm8, %v6418_v9  ;;  %5620 = vmatpush3.bf16.msra.mxu0 %v5913_v17 }
0x10e7   :  { %5621 = vmatprep.subr.bf16.mxu0 %v6418_v9 }
0x10ea   :  { %5622 = vmatpush3.bf16.msra.mxu0 %v5914_v56 }
0x10eb   :  { %5623 = vmatprep.subr.bf16.mxu0 %v6418_v9 }
0x10ee   :  { %5624 = vmatpush3.bf16.msra.mxu0 %v5915_v4 }
0x10ef   :  { %5625 = vmatprep.subr.bf16.mxu0 %v6418_v9 }
0x10f2   :  { %5626 = vmatpush3.bf16.msra.mxu0 %v5916_v24 }
0x10f3   :  { %5627 = vmatprep.subr.bf16.mxu0 %v6418_v9 }
0x10f6   :  { %5628 = vmatpush3.bf16.msra.mxu0 %v5917_v18 }
0x10f7   :  { %5629 = vmatprep.subr.bf16.mxu0 %v6418_v9 }
0x10fa   :  { %5630 = vmatpush3.bf16.msra.mxu0 %v5918_v52 }
0x10fb   :  { %5631 = vmatprep.subr.bf16.mxu0 %v6418_v9 }
0x10fe   :  { %5632 = vmatpush3.bf16.msra.mxu0 %v5919_v21 }
0x10ff   :  { %5633 = vmatprep.subr.bf16.mxu0 %v6418_v9  ;;  %v5544_v9 = vld [vmem:[%s8214_s12] ss:$0 sm:$0xff] }
0x1102   :  { %5634 = vmatpush3.bf16.msra.mxu0 %v5920_v59 }
0x11a5   :  { %v5575_v6 = vpop.f32.mrf.mxu0 }
0x11a7   :  { %v5576_v15 = vpop.f32.mrf.mxu0 }
0x11a8   :  { %v5577_v7 = vadd.f32 %v5576_v15, %v5575_v6 }
0x11a9   :  { %v5578_v0 = vpop.f32.mrf.mxu0 }
0x11aa   :  { %v4862_v62 = vadd.f32 %v5577_v7, %v5515_v26 }
0x11ab   :  { %v5579_v8 = vpop.f32.mrf.mxu0 }
0x11ac   :  { %v4867_v2 = vpack.c.bf16 %v4862_v62, %v4862_v62 }
0x11ae   :  { %5616 = vmatmul.mubr.bf16.vlgmr.msra.gmra.mxu1 %v4867_v2 }
0x126e   :  { %v4973_v43 = vpop.f32.mrf.mxu1 }
0x126f   :  { %v4974_v39 = vadd.f32 %v5534_v47, %v4973_v43 }
0x1270   :  { %v5617_v55 = vpop.f32.mrf.mxu1 }
0x1271   :  { %v4980_v31 = vmin.f32 %v4974_v39, 0.0  ;;  %vm4979_vm9 = vcmp.gt.f32.partialorder %v4974_v39, 0.0 }
0x1272   :  { %v4976_v61 = vpop.f32.mrf.mxu1 }
0x1273   :  { %v4981_v27 = vmul.f32 1.442695, %v4980_v31 }
0x1274   :  { %v5618_v33 = vpop.f32.mrf.mxu1 }
0x1275   :  { %6177 = vpow2.f32 %v4981_v27 }
0x1282   :  { %v6178_v48 = vpop.eup %6177 }
0x1283   :  { %v5543_v57 = vadd.f32 -1.0, %v6178_v48 }
0x1285   :  { %v4984_v20 = vsel %vm4979_vm9, %v4974_v39, %v5543_v57 }
0x1286   :  { %v4985_v54 = vpack.c.bf16 %v4984_v20, %v4984_v20 }
0x1288   :  { %5636 = vmatmul.mubr.bf16.vlgmr.msra.gmra.mxu0 %v4985_v54 }
0x1348   :  { %v5091_v34 = vpop.f32.mrf.mxu0 }
0x1349   :  { %v5092_v10 = vadd.f32 %v5544_v9, %v5091_v34 }
0x134a   :  { %v5637_v11 = vpop.f32.mrf.mxu0 }
0x134b   :  { %5097 = vst [vmem:[#allocation20] sm:$0xff] %v5092_v10 }
0x134c   :  { %v5094_v63 = vpop.f32.mrf.mxu0 }
0x134d   :  { %6382 = shalt.err (!%p6379_p2)
}
0x134e   :  { %5107 = dma.vmem_to_hbm [thread:$0]  %s5105_s10, 128, %s8215_s13, [#allocation8]   ;;  %v5638_v51 = vpop.f32.mrf.mxu0 }
0x134f   :  { %6401 = dma.done.wait [#allocation8], 128  }
0x1350   :  { %6402 = vsyncadd [#allocation8], 4294967168 }
0x1351   :  { %5111 = vsyncpa [#allocation7], 1 }
0x1352   :  { %5112 = vsyncpa [#allocation10], 1 }
0x1353   :  { %5113 = vsyncpa [#allocation13], 1 }
0x1354   :  { %5114 = vsyncpa [#allocation16], 1 }
0x1355   :  { %5115 = vsyncpa [#allocation19], 1 }
0x1356   :  { %5116 = vsyncpa [#allocation8], 1 }

</bundles_post_ra>
